<compile_context>
chip_gen: v6e
topology: v6e:2x2x1
jax: 0.10.0
libtpu: 0.0.40
codegen_flags: <defaults>
</compile_context>

<pallas_src>
import numpy as np

import jax
import jax.numpy as jnp
from jax import lax
from jax.experimental import pallas as pl
from jax.experimental.pallas import tpu as pltpu

LANE = 128                      # lane granule (last dim)
SUBLANE = 8                     # f32 sublane granule (second-to-last dim)
MATMUL_DTYPE = jnp.bfloat16     # MXU operand dtype; accumulation stays f32


def _round_up(x, m):
    return ((x + m - 1) // m) * m


# ----------------------------------------------------------------------------
# Weight packing: one fused (K, N) matrix per cell.
#   rows [0:H)      = W_hh^T      (h lives at lanes [0:H) of the [x|h|1] pack)
#   rows [H:H+Din)  = W_ih^T      (x lives at lanes [H:H+Din))
#   row  H+Din      = b_ih + b_hh (multiplied by the constant-1 bias lane)
#   cols [0:4H)     = gates i,f,g,o in PyTorch order; the rest is zero padding
# ----------------------------------------------------------------------------
def _pack_lstm(p, din, h, k_pad, n_pad):
    w = jnp.zeros((k_pad, n_pad), jnp.float32)
    w = w.at[0:h, 0:4 * h].set(jnp.transpose(p["w_hh"]))
    w = w.at[h:h + din, 0:4 * h].set(jnp.transpose(p["w_ih"]))
    w = w.at[h + din, 0:4 * h].set(p["b_ih"] + p["b_hh"])
    return w.astype(MATMUL_DTYPE)


def _pack_linear(p, din, k_pad, n_pad):
    n_out = p["w"].shape[0]
    w = jnp.zeros((k_pad, n_pad), jnp.float32)
    w = w.at[0:din, 0:n_out].set(jnp.transpose(p["w"]))
    w = w.at[din, 0:n_out].set(p["b"])
    return w.astype(MATMUL_DTYPE)


# ----------------------------------------------------------------------------
# Parameter construction (mimics PyTorch uniform(-1/sqrt(H), 1/sqrt(H)))
# ----------------------------------------------------------------------------
def init_lstm_params(key, input_dim, hidden_dim):
    k = 1.0 / jnp.sqrt(jnp.float32(hidden_dim))
    k0, k1, k2, k3 = jax.random.split(key, 4)
    return {
        "w_ih": jax.random.uniform(k0, (4 * hidden_dim, input_dim), jnp.float32, -k, k),
        "w_hh": jax.random.uniform(k1, (4 * hidden_dim, hidden_dim), jnp.float32, -k, k),
        "b_ih": jax.random.uniform(k2, (4 * hidden_dim,), jnp.float32, -k, k),
        "b_hh": jax.random.uniform(k3, (4 * hidden_dim,), jnp.float32, -k, k),
    }


def init_linear_params(key, in_dim, out_dim):
    k = 1.0 / jnp.sqrt(jnp.float32(in_dim))
    k0, k1 = jax.random.split(key)
    return {"w": jax.random.uniform(k0, (out_dim, in_dim), jnp.float32, -k, k),
            "b": jax.random.uniform(k1, (out_dim,), jnp.float32, -k, k)}


def init_autoencoder_params(key, seq_len, n_features, embedding_dim):
    del seq_len
    h = 2 * embedding_dim
    ks = jax.random.split(key, 5)
    return {
        "enc1": init_lstm_params(ks[0], n_features, h),
        "enc2": init_lstm_params(ks[1], h, embedding_dim),
        "dec1": init_lstm_params(ks[2], embedding_dim, embedding_dim),
        "dec2": init_lstm_params(ks[3], embedding_dim, h),
        "out": init_linear_params(ks[4], h, n_features),
    }


# ----------------------------------------------------------------------------
# Forward pass: one fused Pallas kernel + tiny pack/slice glue at the boundary
# ----------------------------------------------------------------------------
@jax.jit
def lstm_autoencoder_forward(x_bsf, params):
    B, S, F = x_bsf.shape
    E = params["enc2"]["w_hh"].shape[1]        # embedding_dim
    H = 2 * E                                  # hidden_dim
    Bp = _round_up(B, SUBLANE)                 # padded batch (sublane granule)

    # per-layer (hidden, input) dims and padded contraction / gate widths
    H1, H2, H3, H4 = H, E, E, H
    D1, D2, D3, D4, D5 = F, H1, E, H3, H4
    K1, N1 = _round_up(H1 + D1 + 1, LANE), _round_up(4 * H1, LANE)
    K2, N2 = _round_up(H2 + D2 + 1, LANE), _round_up(4 * H2, LANE)
    K3, N3 = _round_up(H3 + D3 + 1, LANE), _round_up(4 * H3, LANE)
    K4, N4 = _round_up(H4 + D4 + 1, LANE), _round_up(4 * H4, LANE)
    K5, N5 = _round_up(D5 + 1, LANE), _round_up(F, LANE)

    # enc1 input slab, pre-packed [0_H1 | x_t | 1 | 0...] per (t, batch row)
    x_tm = jnp.transpose(x_bsf, (1, 0, 2)).astype(jnp.float32)      # (S, B, F)
    x_slab = jnp.zeros((S, Bp, K1), jnp.float32)
    x_slab = x_slab.at[:, :B, H1:H1 + F].set(x_tm)
    x_slab = x_slab.at[:, :, H1 + F].set(1.0)
    # TODO(synk): for very long sequences switch to a lane-dense (Bp, S*F) input
    # slab + in-kernel lane scatter, and add time-chunk streaming (grid axis /
    # manual DMA) so the in/out slabs need not be fully VMEM-resident.

    # Decoder glue: i.repeat(S,1,1).reshape(-1,S,E) means the decoder input at
    # (batch b, time t) is hidden[(b*S + t) % B] -> B distinct batch-row
    # permutations indexed by t % B, encoded as one-hot matrices (applied once
    # per forward, off the recurrence critical path).
    perm_np = np.zeros((B, Bp, Bp), np.float32)
    for r in range(B):
        for b in range(B):
            perm_np[r, b, (b * S + r) % B] = 1.0
    perm = jnp.asarray(perm_np)

    w1 = _pack_lstm(params["enc1"], D1, H1, K1, N1)   # F  -> 2E
    w2 = _pack_lstm(params["enc2"], D2, H2, K2, N2)   # 2E -> E
    w3 = _pack_lstm(params["dec1"], D3, H3, K3, N3)   # E  -> E
    w4 = _pack_lstm(params["dec2"], D4, H4, K4, N4)   # E  -> 2E
    wo = _pack_linear(params["out"], D5, K5, N5)      # 2E -> F

    unroll = S if S <= 16 else 8

    def kernel(x_ref, perm_ref, w1_ref, w2_ref, w3_ref, w4_ref, wo_ref,
               out_ref, dec_in, proj_buf):
        f32 = jnp.float32

        def one_at(lane, width):
            # (Bp, width) f32 with 1.0 at `lane` (the bias lane), 0 elsewhere.
            return (lax.broadcasted_iota(jnp.int32, (Bp, width), 1) == lane
                    ).astype(f32)

        def place(v, off, width):
            # put v at lanes [off : off+v.shape[1]) of a zero (Bp, width) block
            parts = []
            if off:
                parts.append(jnp.zeros((v.shape[0], off), f32))
            parts.append(v)
            rest = width - off - v.shape[1]
            if rest:
                parts.append(jnp.zeros((v.shape[0], rest), f32))
            return jnp.concatenate(parts, axis=-1) if len(parts) > 1 else v

        def lstm_cell(x_packed, h, c, w_ref, hdim, width):
            # x_packed: (Bp, width) f32 with x at lanes [hdim:hdim+Din), 1.0 at
            # the bias lane and zeros at [0:hdim); h/c: (Bp, hdim) f32 values.
            xh = x_packed + place(h, 0, width)
            # TODO(synk): stage w_ref on the MXU across timesteps
            # (pltpu.matmul_push_rhs/matmul_acc_lhs) to avoid re-pushing the
            # same RHS every step.
            gates = jnp.dot(xh.astype(MATMUL_DTYPE), w_ref[...],
                            preferred_element_type=f32)            # (Bp, N)
            i_g = jax.nn.sigmoid(gates[:, 0 * hdim:1 * hdim])
            f_g = jax.nn.sigmoid(gates[:, 1 * hdim:2 * hdim])
            g_g = jnp.tanh(gates[:, 2 * hdim:3 * hdim])
            o_g = jax.nn.sigmoid(gates[:, 3 * hdim:4 * hdim])
            c_new = f_g * c + i_g * g_g
            h_new = o_g * jnp.tanh(c_new)
            return h_new, c_new

        def zeros_state(width):
            return jnp.zeros((Bp, width), f32)

        one_enc2 = one_at(H2 + D2, K2)
        one_dec1 = one_at(H3 + D3, K3)
        one_dec2 = one_at(H4 + D4, K4)
        one_proj = one_at(D5, K5)

        # ---- encoder: enc1 + enc2 per step; only the final h2 is needed ----
        def enc_step(t, carry):
            h1, c1, h2, c2 = carry
            h1, c1 = lstm_cell(x_ref[t], h1, c1, w1_ref, H1, K1)
            h2, c2 = lstm_cell(place(h1, H2, K2) + one_enc2,
                               h2, c2, w2_ref, H2, K2)
            return (h1, c1, h2, c2)

        enc_fin = lax.fori_loop(
            0, S, enc_step,
            (zeros_state(H1), zeros_state(H1), zeros_state(H2), zeros_state(H2)),
            unroll=unroll)
        h2_fin = enc_fin[2]                                       # (Bp, E)

        # ---- encoder -> decoder glue (once per forward) ----
        h2_placed = place(h2_fin, H3, K3)          # hidden at lanes [H3:H3+E)
        for r in range(B):                         # static unroll over phases
            dec_in[r] = (jnp.dot(perm_ref[r], h2_placed,
                                 preferred_element_type=f32) + one_dec1)

        # ---- decoder: dec1 + dec2 per step; packed h4 buffered per step ----
        def dec_step(t, carry):
            h3, c3, h4, c4 = carry
            h3, c3 = lstm_cell(dec_in[t % B], h3, c3, w3_ref, H3, K3)
            h4, c4 = lstm_cell(place(h3, H4, K4) + one_dec2,
                               h4, c4, w4_ref, H4, K4)
            row = pl.multiple_of(t * Bp, SUBLANE)
            proj_buf[pl.ds(row, Bp), :] = place(h4, 0, K5) + one_proj
            return (h3, c3, h4, c4)

        lax.fori_loop(
            0, S, dec_step,
            (zeros_state(H3), zeros_state(H3), zeros_state(H4), zeros_state(H4)),
            unroll=unroll)

        # ---- output Linear hoisted out of the recurrence: ONE big matmul ----
        out_ref[...] = jnp.dot(proj_buf[...].astype(MATMUL_DTYPE), wo_ref[...],
                               preferred_element_type=f32)

    out_flat = pl.pallas_call(
        kernel,
        out_shape=jax.ShapeDtypeStruct((S * Bp, N5), jnp.float32),
        scratch_shapes=[
            pltpu.VMEM((B, Bp, K3), jnp.float32),    # decoder-glue phase slabs
            pltpu.VMEM((S * Bp, K5), jnp.float32),   # packed h4 per timestep
        ],
    )(x_slab, perm, w1, w2, w3, w4, wo)

    # rows are (t, padded-batch); strip padding, back to (B, S, F)
    out = out_flat.reshape(S, Bp, N5)[:, :B, :F]
    return jnp.transpose(out, (1, 0, 2))


# ----------------------------------------------------------------------------
# Pure-JAX reference (mirrors torch.nn.LSTM / nn.Linear) for a sanity check
# ----------------------------------------------------------------------------
def _lstm_ref(x_bsd, p):
    B, S, _ = x_bsd.shape
    H = p["w_hh"].shape[1]

    def step(carry, x_t):
        h, c = carry
        gates = x_t @ p["w_ih"].T + p["b_ih"] + h @ p["w_hh"].T + p["b_hh"]
        i_g = jax.nn.sigmoid(gates[:, 0 * H:1 * H])
        f_g = jax.nn.sigmoid(gates[:, 1 * H:2 * H])
        g_g = jnp.tanh(gates[:, 2 * H:3 * H])
        o_g = jax.nn.sigmoid(gates[:, 3 * H:4 * H])
        c_n = f_g * c + i_g * g_g
        h_n = o_g * jnp.tanh(c_n)
        return (h_n, c_n), h_n

    init = (jnp.zeros((B, H), jnp.float32), jnp.zeros((B, H), jnp.float32))
    (h_last, _), ys = lax.scan(step, init, jnp.transpose(x_bsd, (1, 0, 2)))
    return jnp.transpose(ys, (1, 0, 2)), h_last


def forward_ref(x_bsf, params):
    B, S, _ = x_bsf.shape
    y, _ = _lstm_ref(x_bsf, params["enc1"])
    y, h_last = _lstm_ref(y, params["enc2"])
    E = h_last.shape[-1]
    rep = jnp.tile(h_last[None, :, :], (S, 1, 1)).reshape(B, S, E)
    d, _ = _lstm_ref(rep, params["dec1"])
    d, _ = _lstm_ref(d, params["dec2"])
    return d @ params["out"]["w"].T + params["out"]["b"]


# ----------------------------------------------------------------------------
if __name__ == "__main__":
    # small shapes consistent with the module: batch=2, seq_len=8,
    # n_features=1, embedding_dim=8 (-> hidden_dim=16)
    B, S, F, E = 2, 8, 1, 8

    key = jax.random.PRNGKey(0)
    kx, kp = jax.random.split(key)
    x = jax.random.normal(kx, (B, S, F), jnp.float32)
    params = init_autoencoder_params(kp, S, F, E)

    out = lstm_autoencoder_forward(x, params)
    out = jax.block_until_ready(out)
    assert out.shape == (B, S, F), out.shape

    ref = forward_ref(x, params)
    # bf16 MXU operands with f32 accumulation (per perf review) -> slightly
    # looser tolerance than a pure-f32 comparison.
    err = float(jnp.max(jnp.abs(out - ref)))
    assert jnp.allclose(out, ref, rtol=2e-2, atol=2e-2), err

    print("KERNEL_OK")
</pallas_src>

<mosaic_0001>
module attributes {stable_mosaic.version = 11 : i64} {
  func.func @kernel(%arg0: memref<8x8x128xf32, #tpu.memory_space<vmem>>, %arg1: memref<2x8x8xf32, #tpu.memory_space<vmem>>, %arg2: memref<128x128xbf16, #tpu.memory_space<vmem>>, %arg3: memref<128x128xbf16, #tpu.memory_space<vmem>>, %arg4: memref<128x128xbf16, #tpu.memory_space<vmem>>, %arg5: memref<128x128xbf16, #tpu.memory_space<vmem>>, %arg6: memref<128x128xbf16, #tpu.memory_space<vmem>>, %arg7: memref<64x128xf32, #tpu.memory_space<vmem>>, %arg8: memref<2x8x128xf32, #tpu.memory_space<vmem>>, %arg9: memref<64x128xf32, #tpu.memory_space<vmem>>) attributes {dimension_semantics = [], scalar_prefetch = 0 : i64, scratch_operands = 2 : i64, tpu.core_type = #tpu.core_type<tc>} {
    %0 = tpu.iota {dimensions = array<i32: 1>} : vector<8x128xi32>
    %c24_i32 = arith.constant 24 : i32
    %1 = vector.broadcast %c24_i32 : i32 to vector<8x128xi32>
    %2 = arith.cmpi eq, %0, %1 : vector<8x128xi32>
    %3 = arith.extui %2 : vector<8x128xi1> to vector<8x128xi32>
    %4 = arith.sitofp %3 : vector<8x128xi32> to vector<8x128xf32>
    %5 = tpu.iota {dimensions = array<i32: 1>} : vector<8x128xi32>
    %c16_i32 = arith.constant 16 : i32
    %6 = vector.broadcast %c16_i32 : i32 to vector<8x128xi32>
    %7 = arith.cmpi eq, %5, %6 : vector<8x128xi32>
    %8 = arith.extui %7 : vector<8x128xi1> to vector<8x128xi32>
    %9 = arith.sitofp %8 : vector<8x128xi32> to vector<8x128xf32>
    %10 = tpu.iota {dimensions = array<i32: 1>} : vector<8x128xi32>
    %c24_i32_0 = arith.constant 24 : i32
    %11 = vector.broadcast %c24_i32_0 : i32 to vector<8x128xi32>
    %12 = arith.cmpi eq, %10, %11 : vector<8x128xi32>
    %13 = arith.extui %12 : vector<8x128xi1> to vector<8x128xi32>
    %14 = arith.sitofp %13 : vector<8x128xi32> to vector<8x128xf32>
    %15 = tpu.iota {dimensions = array<i32: 1>} : vector<8x128xi32>
    %c16_i32_1 = arith.constant 16 : i32
    %16 = vector.broadcast %c16_i32_1 : i32 to vector<8x128xi32>
    %17 = arith.cmpi eq, %15, %16 : vector<8x128xi32>
    %18 = arith.extui %17 : vector<8x128xi1> to vector<8x128xi32>
    %19 = arith.sitofp %18 : vector<8x128xi32> to vector<8x128xf32>
    %cst = arith.constant 0.000000e+00 : f32
    %20 = vector.broadcast %cst : f32 to vector<8x16xf32>
    %cst_2 = arith.constant 0.000000e+00 : f32
    %21 = vector.broadcast %cst_2 : f32 to vector<8x16xf32>
    %cst_3 = arith.constant 0.000000e+00 : f32
    %22 = vector.broadcast %cst_3 : f32 to vector<8x8xf32>
    %cst_4 = arith.constant 0.000000e+00 : f32
    %23 = vector.broadcast %cst_4 : f32 to vector<8x8xf32>
    %c0_i32 = arith.constant 0 : i32
    %24 = arith.index_cast %c0_i32 : i32 to index
    %c0 = arith.constant 0 : index
    %c0_5 = arith.constant 0 : index
    %25 = vector.load %arg0[%24, %c0, %c0_5] : memref<8x8x128xf32, #tpu.memory_space<vmem>>, vector<1x8x128xf32>
    %26 = vector.shape_cast %25 : vector<1x8x128xf32> to vector<8x128xf32>
    %cst_6 = arith.constant 0.000000e+00 : f32
    %27 = vector.broadcast %cst_6 : f32 to vector<8x112xf32>
    %28 = tpu.concatenate %20, %27 in 1 : vector<8x16xf32>, vector<8x112xf32> -> vector<8x128xf32>
    %29 = arith.addf %26, %28 : vector<8x128xf32>
    %30 = arith.truncf %29 : vector<8x128xf32> to vector<8x128xbf16>
    %c0_7 = arith.constant 0 : index
    %c0_8 = arith.constant 0 : index
    %31 = vector.load %arg2[%c0_7, %c0_8] : memref<128x128xbf16, #tpu.memory_space<vmem>>, vector<128x128xbf16>
    %cst_9 = arith.constant dense<0.000000e+00> : vector<8x128xf32>
    %32 = tpu.matmul %30, %31, %cst_9 {dimension_numbers = #tpu.dot_dimension_numbers<[1], [0], [0], [1], [0, 0, 1, 1], [], []>} : vector<8x128xbf16>, vector<128x128xbf16>, vector<8x128xf32> -> vector<8x128xf32>
    %33 = vector.extract_strided_slice %32 {offsets = [0, 0], sizes = [8, 16], strides = [1, 1]} : vector<8x128xf32> to vector<8x16xf32>
    %34 = arith.negf %33 : vector<8x16xf32>
    %35 = math.exp %34 : vector<8x16xf32>
    %cst_10 = arith.constant 1.000000e+00 : f32
    %36 = vector.broadcast %cst_10 : f32 to vector<8x16xf32>
    %37 = arith.addf %36, %35 : vector<8x16xf32>
    %38 = arith.divf %36, %37 : vector<8x16xf32>
    %39 = vector.extract_strided_slice %32 {offsets = [0, 16], sizes = [8, 16], strides = [1, 1]} : vector<8x128xf32> to vector<8x16xf32>
    %40 = arith.negf %39 : vector<8x16xf32>
    %41 = math.exp %40 : vector<8x16xf32>
    %cst_11 = arith.constant 1.000000e+00 : f32
    %42 = vector.broadcast %cst_11 : f32 to vector<8x16xf32>
    %43 = arith.addf %42, %41 : vector<8x16xf32>
    %44 = arith.divf %42, %43 : vector<8x16xf32>
    %45 = vector.extract_strided_slice %32 {offsets = [0, 32], sizes = [8, 16], strides = [1, 1]} : vector<8x128xf32> to vector<8x16xf32>
    %46 = math.tanh %45 : vector<8x16xf32>
    %47 = vector.extract_strided_slice %32 {offsets = [0, 48], sizes = [8, 16], strides = [1, 1]} : vector<8x128xf32> to vector<8x16xf32>
    %48 = arith.negf %47 : vector<8x16xf32>
    %49 = math.exp %48 : vector<8x16xf32>
    %cst_12 = arith.constant 1.000000e+00 : f32
    %50 = vector.broadcast %cst_12 : f32 to vector<8x16xf32>
    %51 = arith.addf %50, %49 : vector<8x16xf32>
    %52 = arith.divf %50, %51 : vector<8x16xf32>
    %53 = arith.mulf %44, %21 : vector<8x16xf32>
    %54 = arith.mulf %38, %46 : vector<8x16xf32>
    %55 = arith.addf %53, %54 : vector<8x16xf32>
    %56 = math.tanh %55 : vector<8x16xf32>
    %57 = arith.mulf %52, %56 : vector<8x16xf32>
    %cst_13 = arith.constant 0.000000e+00 : f32
    %58 = vector.broadcast %cst_13 : f32 to vector<8x8xf32>
    %cst_14 = arith.constant 0.000000e+00 : f32
    %59 = vector.broadcast %cst_14 : f32 to vector<8x104xf32>
    %60 = tpu.concatenate %58, %57, %59 in 1 : vector<8x8xf32>, vector<8x16xf32>, vector<8x104xf32> -> vector<8x128xf32>
    %61 = arith.addf %60, %4 : vector<8x128xf32>
    %cst_15 = arith.constant 0.000000e+00 : f32
    %62 = vector.broadcast %cst_15 : f32 to vector<8x120xf32>
    %63 = tpu.concatenate %22, %62 in 1 : vector<8x8xf32>, vector<8x120xf32> -> vector<8x128xf32>
    %64 = arith.addf %61, %63 : vector<8x128xf32>
    %65 = arith.truncf %64 : vector<8x128xf32> to vector<8x128xbf16>
    %c0_16 = arith.constant 0 : index
    %c0_17 = arith.constant 0 : index
    %66 = vector.load %arg3[%c0_16, %c0_17] : memref<128x128xbf16, #tpu.memory_space<vmem>>, vector<128x128xbf16>
    %cst_18 = arith.constant dense<0.000000e+00> : vector<8x128xf32>
    %67 = tpu.matmul %65, %66, %cst_18 {dimension_numbers = #tpu.dot_dimension_numbers<[1], [0], [0], [1], [0, 0, 1, 1], [], []>} : vector<8x128xbf16>, vector<128x128xbf16>, vector<8x128xf32> -> vector<8x128xf32>
    %68 = vector.extract_strided_slice %67 {offsets = [0, 0], sizes = [8, 8], strides = [1, 1]} : vector<8x128xf32> to vector<8x8xf32>
    %69 = arith.negf %68 : vector<8x8xf32>
    %70 = math.exp %69 : vector<8x8xf32>
    %cst_19 = arith.constant 1.000000e+00 : f32
    %71 = vector.broadcast %cst_19 : f32 to vector<8x8xf32>
    %72 = arith.addf %71, %70 : vector<8x8xf32>
    %73 = arith.divf %71, %72 : vector<8x8xf32>
    %74 = vector.extract_strided_slice %67 {offsets = [0, 8], sizes = [8, 8], strides = [1, 1]} : vector<8x128xf32> to vector<8x8xf32>
    %75 = arith.negf %74 : vector<8x8xf32>
    %76 = math.exp %75 : vector<8x8xf32>
    %cst_20 = arith.constant 1.000000e+00 : f32
    %77 = vector.broadcast %cst_20 : f32 to vector<8x8xf32>
    %78 = arith.addf %77, %76 : vector<8x8xf32>
    %79 = arith.divf %77, %78 : vector<8x8xf32>
    %80 = vector.extract_strided_slice %67 {offsets = [0, 16], sizes = [8, 8], strides = [1, 1]} : vector<8x128xf32> to vector<8x8xf32>
    %81 = math.tanh %80 : vector<8x8xf32>
    %82 = vector.extract_strided_slice %67 {offsets = [0, 24], sizes = [8, 8], strides = [1, 1]} : vector<8x128xf32> to vector<8x8xf32>
    %83 = arith.negf %82 : vector<8x8xf32>
    %84 = math.exp %83 : vector<8x8xf32>
    %cst_21 = arith.constant 1.000000e+00 : f32
    %85 = vector.broadcast %cst_21 : f32 to vector<8x8xf32>
    %86 = arith.addf %85, %84 : vector<8x8xf32>
    %87 = arith.divf %85, %86 : vector<8x8xf32>
    %88 = arith.mulf %79, %23 : vector<8x8xf32>
    %89 = arith.mulf %73, %81 : vector<8x8xf32>
    %90 = arith.addf %88, %89 : vector<8x8xf32>
    %91 = math.tanh %90 : vector<8x8xf32>
    %92 = arith.mulf %87, %91 : vector<8x8xf32>
    %c1_i32 = arith.constant 1 : i32
    %93 = arith.index_cast %c1_i32 : i32 to index
    %c0_22 = arith.constant 0 : index
    %c0_23 = arith.constant 0 : index
    %94 = vector.load %arg0[%93, %c0_22, %c0_23] : memref<8x8x128xf32, #tpu.memory_space<vmem>>, vector<1x8x128xf32>
    %95 = vector.shape_cast %94 : vector<1x8x128xf32> to vector<8x128xf32>
    %cst_24 = arith.constant 0.000000e+00 : f32
    %96 = vector.broadcast %cst_24 : f32 to vector<8x112xf32>
    %97 = tpu.concatenate %57, %96 in 1 : vector<8x16xf32>, vector<8x112xf32> -> vector<8x128xf32>
    %98 = arith.addf %95, %97 : vector<8x128xf32>
    %99 = arith.truncf %98 : vector<8x128xf32> to vector<8x128xbf16>
    %c0_25 = arith.constant 0 : index
    %c0_26 = arith.constant 0 : index
    %100 = vector.load %arg2[%c0_25, %c0_26] : memref<128x128xbf16, #tpu.memory_space<vmem>>, vector<128x128xbf16>
    %cst_27 = arith.constant dense<0.000000e+00> : vector<8x128xf32>
    %101 = tpu.matmul %99, %100, %cst_27 {dimension_numbers = #tpu.dot_dimension_numbers<[1], [0], [0], [1], [0, 0, 1, 1], [], []>} : vector<8x128xbf16>, vector<128x128xbf16>, vector<8x128xf32> -> vector<8x128xf32>
    %102 = vector.extract_strided_slice %101 {offsets = [0, 0], sizes = [8, 16], strides = [1, 1]} : vector<8x128xf32> to vector<8x16xf32>
    %103 = arith.negf %102 : vector<8x16xf32>
    %104 = math.exp %103 : vector<8x16xf32>
    %cst_28 = arith.constant 1.000000e+00 : f32
    %105 = vector.broadcast %cst_28 : f32 to vector<8x16xf32>
    %106 = arith.addf %105, %104 : vector<8x16xf32>
    %107 = arith.divf %105, %106 : vector<8x16xf32>
    %108 = vector.extract_strided_slice %101 {offsets = [0, 16], sizes = [8, 16], strides = [1, 1]} : vector<8x128xf32> to vector<8x16xf32>
    %109 = arith.negf %108 : vector<8x16xf32>
    %110 = math.exp %109 : vector<8x16xf32>
    %cst_29 = arith.constant 1.000000e+00 : f32
    %111 = vector.broadcast %cst_29 : f32 to vector<8x16xf32>
    %112 = arith.addf %111, %110 : vector<8x16xf32>
    %113 = arith.divf %111, %112 : vector<8x16xf32>
    %114 = vector.extract_strided_slice %101 {offsets = [0, 32], sizes = [8, 16], strides = [1, 1]} : vector<8x128xf32> to vector<8x16xf32>
    %115 = math.tanh %114 : vector<8x16xf32>
    %116 = vector.extract_strided_slice %101 {offsets = [0, 48], sizes = [8, 16], strides = [1, 1]} : vector<8x128xf32> to vector<8x16xf32>
    %117 = arith.negf %116 : vector<8x16xf32>
    %118 = math.exp %117 : vector<8x16xf32>
    %cst_30 = arith.constant 1.000000e+00 : f32
    %119 = vector.broadcast %cst_30 : f32 to vector<8x16xf32>
    %120 = arith.addf %119, %118 : vector<8x16xf32>
    %121 = arith.divf %119, %120 : vector<8x16xf32>
    %122 = arith.mulf %113, %55 : vector<8x16xf32>
    %123 = arith.mulf %107, %115 : vector<8x16xf32>
    %124 = arith.addf %122, %123 : vector<8x16xf32>
    %125 = math.tanh %124 : vector<8x16xf32>
    %126 = arith.mulf %121, %125 : vector<8x16xf32>
    %cst_31 = arith.constant 0.000000e+00 : f32
    %127 = vector.broadcast %cst_31 : f32 to vector<8x8xf32>
    %cst_32 = arith.constant 0.000000e+00 : f32
    %128 = vector.broadcast %cst_32 : f32 to vector<8x104xf32>
    %129 = tpu.concatenate %127, %126, %128 in 1 : vector<8x8xf32>, vector<8x16xf32>, vector<8x104xf32> -> vector<8x128xf32>
    %130 = arith.addf %129, %4 : vector<8x128xf32>
    %cst_33 = arith.constant 0.000000e+00 : f32
    %131 = vector.broadcast %cst_33 : f32 to vector<8x120xf32>
    %132 = tpu.concatenate %92, %131 in 1 : vector<8x8xf32>, vector<8x120xf32> -> vector<8x128xf32>
    %133 = arith.addf %130, %132 : vector<8x128xf32>
    %134 = arith.truncf %133 : vector<8x128xf32> to vector<8x128xbf16>
    %c0_34 = arith.constant 0 : index
    %c0_35 = arith.constant 0 : index
    %135 = vector.load %arg3[%c0_34, %c0_35] : memref<128x128xbf16, #tpu.memory_space<vmem>>, vector<128x128xbf16>
    %cst_36 = arith.constant dense<0.000000e+00> : vector<8x128xf32>
    %136 = tpu.matmul %134, %135, %cst_36 {dimension_numbers = #tpu.dot_dimension_numbers<[1], [0], [0], [1], [0, 0, 1, 1], [], []>} : vector<8x128xbf16>, vector<128x128xbf16>, vector<8x128xf32> -> vector<8x128xf32>
    %137 = vector.extract_strided_slice %136 {offsets = [0, 0], sizes = [8, 8], strides = [1, 1]} : vector<8x128xf32> to vector<8x8xf32>
    %138 = arith.negf %137 : vector<8x8xf32>
    %139 = math.exp %138 : vector<8x8xf32>
    %cst_37 = arith.constant 1.000000e+00 : f32
    %140 = vector.broadcast %cst_37 : f32 to vector<8x8xf32>
    %141 = arith.addf %140, %139 : vector<8x8xf32>
    %142 = arith.divf %140, %141 : vector<8x8xf32>
    %143 = vector.extract_strided_slice %136 {offsets = [0, 8], sizes = [8, 8], strides = [1, 1]} : vector<8x128xf32> to vector<8x8xf32>
    %144 = arith.negf %143 : vector<8x8xf32>
    %145 = math.exp %144 : vector<8x8xf32>
    %cst_38 = arith.constant 1.000000e+00 : f32
    %146 = vector.broadcast %cst_38 : f32 to vector<8x8xf32>
    %147 = arith.addf %146, %145 : vector<8x8xf32>
    %148 = arith.divf %146, %147 : vector<8x8xf32>
    %149 = vector.extract_strided_slice %136 {offsets = [0, 16], sizes = [8, 8], strides = [1, 1]} : vector<8x128xf32> to vector<8x8xf32>
    %150 = math.tanh %149 : vector<8x8xf32>
    %151 = vector.extract_strided_slice %136 {offsets = [0, 24], sizes = [8, 8], strides = [1, 1]} : vector<8x128xf32> to vector<8x8xf32>
    %152 = arith.negf %151 : vector<8x8xf32>
    %153 = math.exp %152 : vector<8x8xf32>
    %cst_39 = arith.constant 1.000000e+00 : f32
    %154 = vector.broadcast %cst_39 : f32 to vector<8x8xf32>
    %155 = arith.addf %154, %153 : vector<8x8xf32>
    %156 = arith.divf %154, %155 : vector<8x8xf32>
    %157 = arith.mulf %148, %90 : vector<8x8xf32>
    %158 = arith.mulf %142, %150 : vector<8x8xf32>
    %159 = arith.addf %157, %158 : vector<8x8xf32>
    %160 = math.tanh %159 : vector<8x8xf32>
    %161 = arith.mulf %156, %160 : vector<8x8xf32>
    %c2_i32 = arith.constant 2 : i32
    %162 = arith.index_cast %c2_i32 : i32 to index
    %c0_40 = arith.constant 0 : index
    %c0_41 = arith.constant 0 : index
    %163 = vector.load %arg0[%162, %c0_40, %c0_41] : memref<8x8x128xf32, #tpu.memory_space<vmem>>, vector<1x8x128xf32>
    %164 = vector.shape_cast %163 : vector<1x8x128xf32> to vector<8x128xf32>
    %cst_42 = arith.constant 0.000000e+00 : f32
    %165 = vector.broadcast %cst_42 : f32 to vector<8x112xf32>
    %166 = tpu.concatenate %126, %165 in 1 : vector<8x16xf32>, vector<8x112xf32> -> vector<8x128xf32>
    %167 = arith.addf %164, %166 : vector<8x128xf32>
    %168 = arith.truncf %167 : vector<8x128xf32> to vector<8x128xbf16>
    %c0_43 = arith.constant 0 : index
    %c0_44 = arith.constant 0 : index
    %169 = vector.load %arg2[%c0_43, %c0_44] : memref<128x128xbf16, #tpu.memory_space<vmem>>, vector<128x128xbf16>
    %cst_45 = arith.constant dense<0.000000e+00> : vector<8x128xf32>
    %170 = tpu.matmul %168, %169, %cst_45 {dimension_numbers = #tpu.dot_dimension_numbers<[1], [0], [0], [1], [0, 0, 1, 1], [], []>} : vector<8x128xbf16>, vector<128x128xbf16>, vector<8x128xf32> -> vector<8x128xf32>
    %171 = vector.extract_strided_slice %170 {offsets = [0, 0], sizes = [8, 16], strides = [1, 1]} : vector<8x128xf32> to vector<8x16xf32>
    %172 = arith.negf %171 : vector<8x16xf32>
    %173 = math.exp %172 : vector<8x16xf32>
    %cst_46 = arith.constant 1.000000e+00 : f32
    %174 = vector.broadcast %cst_46 : f32 to vector<8x16xf32>
    %175 = arith.addf %174, %173 : vector<8x16xf32>
    %176 = arith.divf %174, %175 : vector<8x16xf32>
    %177 = vector.extract_strided_slice %170 {offsets = [0, 16], sizes = [8, 16], strides = [1, 1]} : vector<8x128xf32> to vector<8x16xf32>
    %178 = arith.negf %177 : vector<8x16xf32>
    %179 = math.exp %178 : vector<8x16xf32>
    %cst_47 = arith.constant 1.000000e+00 : f32
    %180 = vector.broadcast %cst_47 : f32 to vector<8x16xf32>
    %181 = arith.addf %180, %179 : vector<8x16xf32>
    %182 = arith.divf %180, %181 : vector<8x16xf32>
    %183 = vector.extract_strided_slice %170 {offsets = [0, 32], sizes = [8, 16], strides = [1, 1]} : vector<8x128xf32> to vector<8x16xf32>
    %184 = math.tanh %183 : vector<8x16xf32>
    %185 = vector.extract_strided_slice %170 {offsets = [0, 48], sizes = [8, 16], strides = [1, 1]} : vector<8x128xf32> to vector<8x16xf32>
    %186 = arith.negf %185 : vector<8x16xf32>
    %187 = math.exp %186 : vector<8x16xf32>
    %cst_48 = arith.constant 1.000000e+00 : f32
    %188 = vector.broadcast %cst_48 : f32 to vector<8x16xf32>
    %189 = arith.addf %188, %187 : vector<8x16xf32>
    %190 = arith.divf %188, %189 : vector<8x16xf32>
    %191 = arith.mulf %182, %124 : vector<8x16xf32>
    %192 = arith.mulf %176, %184 : vector<8x16xf32>
    %193 = arith.addf %191, %192 : vector<8x16xf32>
    %194 = math.tanh %193 : vector<8x16xf32>
    %195 = arith.mulf %190, %194 : vector<8x16xf32>
    %cst_49 = arith.constant 0.000000e+00 : f32
    %196 = vector.broadcast %cst_49 : f32 to vector<8x8xf32>
    %cst_50 = arith.constant 0.000000e+00 : f32
    %197 = vector.broadcast %cst_50 : f32 to vector<8x104xf32>
    %198 = tpu.concatenate %196, %195, %197 in 1 : vector<8x8xf32>, vector<8x16xf32>, vector<8x104xf32> -> vector<8x128xf32>
    %199 = arith.addf %198, %4 : vector<8x128xf32>
    %cst_51 = arith.constant 0.000000e+00 : f32
    %200 = vector.broadcast %cst_51 : f32 to vector<8x120xf32>
    %201 = tpu.concatenate %161, %200 in 1 : vector<8x8xf32>, vector<8x120xf32> -> vector<8x128xf32>
    %202 = arith.addf %199, %201 : vector<8x128xf32>
    %203 = arith.truncf %202 : vector<8x128xf32> to vector<8x128xbf16>
    %c0_52 = arith.constant 0 : index
    %c0_53 = arith.constant 0 : index
    %204 = vector.load %arg3[%c0_52, %c0_53] : memref<128x128xbf16, #tpu.memory_space<vmem>>, vector<128x128xbf16>
    %cst_54 = arith.constant dense<0.000000e+00> : vector<8x128xf32>
    %205 = tpu.matmul %203, %204, %cst_54 {dimension_numbers = #tpu.dot_dimension_numbers<[1], [0], [0], [1], [0, 0, 1, 1], [], []>} : vector<8x128xbf16>, vector<128x128xbf16>, vector<8x128xf32> -> vector<8x128xf32>
    %206 = vector.extract_strided_slice %205 {offsets = [0, 0], sizes = [8, 8], strides = [1, 1]} : vector<8x128xf32> to vector<8x8xf32>
    %207 = arith.negf %206 : vector<8x8xf32>
    %208 = math.exp %207 : vector<8x8xf32>
    %cst_55 = arith.constant 1.000000e+00 : f32
    %209 = vector.broadcast %cst_55 : f32 to vector<8x8xf32>
    %210 = arith.addf %209, %208 : vector<8x8xf32>
    %211 = arith.divf %209, %210 : vector<8x8xf32>
    %212 = vector.extract_strided_slice %205 {offsets = [0, 8], sizes = [8, 8], strides = [1, 1]} : vector<8x128xf32> to vector<8x8xf32>
    %213 = arith.negf %212 : vector<8x8xf32>
    %214 = math.exp %213 : vector<8x8xf32>
    %cst_56 = arith.constant 1.000000e+00 : f32
    %215 = vector.broadcast %cst_56 : f32 to vector<8x8xf32>
    %216 = arith.addf %215, %214 : vector<8x8xf32>
    %217 = arith.divf %215, %216 : vector<8x8xf32>
    %218 = vector.extract_strided_slice %205 {offsets = [0, 16], sizes = [8, 8], strides = [1, 1]} : vector<8x128xf32> to vector<8x8xf32>
    %219 = math.tanh %218 : vector<8x8xf32>
    %220 = vector.extract_strided_slice %205 {offsets = [0, 24], sizes = [8, 8], strides = [1, 1]} : vector<8x128xf32> to vector<8x8xf32>
    %221 = arith.negf %220 : vector<8x8xf32>
    %222 = math.exp %221 : vector<8x8xf32>
    %cst_57 = arith.constant 1.000000e+00 : f32
    %223 = vector.broadcast %cst_57 : f32 to vector<8x8xf32>
    %224 = arith.addf %223, %222 : vector<8x8xf32>
    %225 = arith.divf %223, %224 : vector<8x8xf32>
    %226 = arith.mulf %217, %159 : vector<8x8xf32>
    %227 = arith.mulf %211, %219 : vector<8x8xf32>
    %228 = arith.addf %226, %227 : vector<8x8xf32>
    %229 = math.tanh %228 : vector<8x8xf32>
    %230 = arith.mulf %225, %229 : vector<8x8xf32>
    %c3_i32 = arith.constant 3 : i32
    %231 = arith.index_cast %c3_i32 : i32 to index
    %c0_58 = arith.constant 0 : index
    %c0_59 = arith.constant 0 : index
    %232 = vector.load %arg0[%231, %c0_58, %c0_59] : memref<8x8x128xf32, #tpu.memory_space<vmem>>, vector<1x8x128xf32>
    %233 = vector.shape_cast %232 : vector<1x8x128xf32> to vector<8x128xf32>
    %cst_60 = arith.constant 0.000000e+00 : f32
    %234 = vector.broadcast %cst_60 : f32 to vector<8x112xf32>
    %235 = tpu.concatenate %195, %234 in 1 : vector<8x16xf32>, vector<8x112xf32> -> vector<8x128xf32>
    %236 = arith.addf %233, %235 : vector<8x128xf32>
    %237 = arith.truncf %236 : vector<8x128xf32> to vector<8x128xbf16>
    %c0_61 = arith.constant 0 : index
    %c0_62 = arith.constant 0 : index
    %238 = vector.load %arg2[%c0_61, %c0_62] : memref<128x128xbf16, #tpu.memory_space<vmem>>, vector<128x128xbf16>
    %cst_63 = arith.constant dense<0.000000e+00> : vector<8x128xf32>
    %239 = tpu.matmul %237, %238, %cst_63 {dimension_numbers = #tpu.dot_dimension_numbers<[1], [0], [0], [1], [0, 0, 1, 1], [], []>} : vector<8x128xbf16>, vector<128x128xbf16>, vector<8x128xf32> -> vector<8x128xf32>
    %240 = vector.extract_strided_slice %239 {offsets = [0, 0], sizes = [8, 16], strides = [1, 1]} : vector<8x128xf32> to vector<8x16xf32>
    %241 = arith.negf %240 : vector<8x16xf32>
    %242 = math.exp %241 : vector<8x16xf32>
    %cst_64 = arith.constant 1.000000e+00 : f32
    %243 = vector.broadcast %cst_64 : f32 to vector<8x16xf32>
    %244 = arith.addf %243, %242 : vector<8x16xf32>
    %245 = arith.divf %243, %244 : vector<8x16xf32>
    %246 = vector.extract_strided_slice %239 {offsets = [0, 16], sizes = [8, 16], strides = [1, 1]} : vector<8x128xf32> to vector<8x16xf32>
    %247 = arith.negf %246 : vector<8x16xf32>
    %248 = math.exp %247 : vector<8x16xf32>
    %cst_65 = arith.constant 1.000000e+00 : f32
    %249 = vector.broadcast %cst_65 : f32 to vector<8x16xf32>
    %250 = arith.addf %249, %248 : vector<8x16xf32>
    %251 = arith.divf %249, %250 : vector<8x16xf32>
    %252 = vector.extract_strided_slice %239 {offsets = [0, 32], sizes = [8, 16], strides = [1, 1]} : vector<8x128xf32> to vector<8x16xf32>
    %253 = math.tanh %252 : vector<8x16xf32>
    %254 = vector.extract_strided_slice %239 {offsets = [0, 48], sizes = [8, 16], strides = [1, 1]} : vector<8x128xf32> to vector<8x16xf32>
    %255 = arith.negf %254 : vector<8x16xf32>
    %256 = math.exp %255 : vector<8x16xf32>
    %cst_66 = arith.constant 1.000000e+00 : f32
    %257 = vector.broadcast %cst_66 : f32 to vector<8x16xf32>
    %258 = arith.addf %257, %256 : vector<8x16xf32>
    %259 = arith.divf %257, %258 : vector<8x16xf32>
    %260 = arith.mulf %251, %193 : vector<8x16xf32>
    %261 = arith.mulf %245, %253 : vector<8x16xf32>
    %262 = arith.addf %260, %261 : vector<8x16xf32>
    %263 = math.tanh %262 : vector<8x16xf32>
    %264 = arith.mulf %259, %263 : vector<8x16xf32>
    %cst_67 = arith.constant 0.000000e+00 : f32
    %265 = vector.broadcast %cst_67 : f32 to vector<8x8xf32>
    %cst_68 = arith.constant 0.000000e+00 : f32
    %266 = vector.broadcast %cst_68 : f32 to vector<8x104xf32>
    %267 = tpu.concatenate %265, %264, %266 in 1 : vector<8x8xf32>, vector<8x16xf32>, vector<8x104xf32> -> vector<8x128xf32>
    %268 = arith.addf %267, %4 : vector<8x128xf32>
    %cst_69 = arith.constant 0.000000e+00 : f32
    %269 = vector.broadcast %cst_69 : f32 to vector<8x120xf32>
    %270 = tpu.concatenate %230, %269 in 1 : vector<8x8xf32>, vector<8x120xf32> -> vector<8x128xf32>
    %271 = arith.addf %268, %270 : vector<8x128xf32>
    %272 = arith.truncf %271 : vector<8x128xf32> to vector<8x128xbf16>
    %c0_70 = arith.constant 0 : index
    %c0_71 = arith.constant 0 : index
    %273 = vector.load %arg3[%c0_70, %c0_71] : memref<128x128xbf16, #tpu.memory_space<vmem>>, vector<128x128xbf16>
    %cst_72 = arith.constant dense<0.000000e+00> : vector<8x128xf32>
    %274 = tpu.matmul %272, %273, %cst_72 {dimension_numbers = #tpu.dot_dimension_numbers<[1], [0], [0], [1], [0, 0, 1, 1], [], []>} : vector<8x128xbf16>, vector<128x128xbf16>, vector<8x128xf32> -> vector<8x128xf32>
    %275 = vector.extract_strided_slice %274 {offsets = [0, 0], sizes = [8, 8], strides = [1, 1]} : vector<8x128xf32> to vector<8x8xf32>
    %276 = arith.negf %275 : vector<8x8xf32>
    %277 = math.exp %276 : vector<8x8xf32>
    %cst_73 = arith.constant 1.000000e+00 : f32
    %278 = vector.broadcast %cst_73 : f32 to vector<8x8xf32>
    %279 = arith.addf %278, %277 : vector<8x8xf32>
    %280 = arith.divf %278, %279 : vector<8x8xf32>
    %281 = vector.extract_strided_slice %274 {offsets = [0, 8], sizes = [8, 8], strides = [1, 1]} : vector<8x128xf32> to vector<8x8xf32>
    %282 = arith.negf %281 : vector<8x8xf32>
    %283 = math.exp %282 : vector<8x8xf32>
    %cst_74 = arith.constant 1.000000e+00 : f32
    %284 = vector.broadcast %cst_74 : f32 to vector<8x8xf32>
    %285 = arith.addf %284, %283 : vector<8x8xf32>
    %286 = arith.divf %284, %285 : vector<8x8xf32>
    %287 = vector.extract_strided_slice %274 {offsets = [0, 16], sizes = [8, 8], strides = [1, 1]} : vector<8x128xf32> to vector<8x8xf32>
    %288 = math.tanh %287 : vector<8x8xf32>
    %289 = vector.extract_strided_slice %274 {offsets = [0, 24], sizes = [8, 8], strides = [1, 1]} : vector<8x128xf32> to vector<8x8xf32>
    %290 = arith.negf %289 : vector<8x8xf32>
    %291 = math.exp %290 : vector<8x8xf32>
    %cst_75 = arith.constant 1.000000e+00 : f32
    %292 = vector.broadcast %cst_75 : f32 to vector<8x8xf32>
    %293 = arith.addf %292, %291 : vector<8x8xf32>
    %294 = arith.divf %292, %293 : vector<8x8xf32>
    %295 = arith.mulf %286, %228 : vector<8x8xf32>
    %296 = arith.mulf %280, %288 : vector<8x8xf32>
    %297 = arith.addf %295, %296 : vector<8x8xf32>
    %298 = math.tanh %297 : vector<8x8xf32>
    %299 = arith.mulf %294, %298 : vector<8x8xf32>
    %c4_i32 = arith.constant 4 : i32
    %300 = arith.index_cast %c4_i32 : i32 to index
    %c0_76 = arith.constant 0 : index
    %c0_77 = arith.constant 0 : index
    %301 = vector.load %arg0[%300, %c0_76, %c0_77] : memref<8x8x128xf32, #tpu.memory_space<vmem>>, vector<1x8x128xf32>
    %302 = vector.shape_cast %301 : vector<1x8x128xf32> to vector<8x128xf32>
    %cst_78 = arith.constant 0.000000e+00 : f32
    %303 = vector.broadcast %cst_78 : f32 to vector<8x112xf32>
    %304 = tpu.concatenate %264, %303 in 1 : vector<8x16xf32>, vector<8x112xf32> -> vector<8x128xf32>
    %305 = arith.addf %302, %304 : vector<8x128xf32>
    %306 = arith.truncf %305 : vector<8x128xf32> to vector<8x128xbf16>
    %c0_79 = arith.constant 0 : index
    %c0_80 = arith.constant 0 : index
    %307 = vector.load %arg2[%c0_79, %c0_80] : memref<128x128xbf16, #tpu.memory_space<vmem>>, vector<128x128xbf16>
    %cst_81 = arith.constant dense<0.000000e+00> : vector<8x128xf32>
    %308 = tpu.matmul %306, %307, %cst_81 {dimension_numbers = #tpu.dot_dimension_numbers<[1], [0], [0], [1], [0, 0, 1, 1], [], []>} : vector<8x128xbf16>, vector<128x128xbf16>, vector<8x128xf32> -> vector<8x128xf32>
    %309 = vector.extract_strided_slice %308 {offsets = [0, 0], sizes = [8, 16], strides = [1, 1]} : vector<8x128xf32> to vector<8x16xf32>
    %310 = arith.negf %309 : vector<8x16xf32>
    %311 = math.exp %310 : vector<8x16xf32>
    %cst_82 = arith.constant 1.000000e+00 : f32
    %312 = vector.broadcast %cst_82 : f32 to vector<8x16xf32>
    %313 = arith.addf %312, %311 : vector<8x16xf32>
    %314 = arith.divf %312, %313 : vector<8x16xf32>
    %315 = vector.extract_strided_slice %308 {offsets = [0, 16], sizes = [8, 16], strides = [1, 1]} : vector<8x128xf32> to vector<8x16xf32>
    %316 = arith.negf %315 : vector<8x16xf32>
    %317 = math.exp %316 : vector<8x16xf32>
    %cst_83 = arith.constant 1.000000e+00 : f32
    %318 = vector.broadcast %cst_83 : f32 to vector<8x16xf32>
    %319 = arith.addf %318, %317 : vector<8x16xf32>
    %320 = arith.divf %318, %319 : vector<8x16xf32>
    %321 = vector.extract_strided_slice %308 {offsets = [0, 32], sizes = [8, 16], strides = [1, 1]} : vector<8x128xf32> to vector<8x16xf32>
    %322 = math.tanh %321 : vector<8x16xf32>
    %323 = vector.extract_strided_slice %308 {offsets = [0, 48], sizes = [8, 16], strides = [1, 1]} : vector<8x128xf32> to vector<8x16xf32>
    %324 = arith.negf %323 : vector<8x16xf32>
    %325 = math.exp %324 : vector<8x16xf32>
    %cst_84 = arith.constant 1.000000e+00 : f32
    %326 = vector.broadcast %cst_84 : f32 to vector<8x16xf32>
    %327 = arith.addf %326, %325 : vector<8x16xf32>
    %328 = arith.divf %326, %327 : vector<8x16xf32>
    %329 = arith.mulf %320, %262 : vector<8x16xf32>
    %330 = arith.mulf %314, %322 : vector<8x16xf32>
    %331 = arith.addf %329, %330 : vector<8x16xf32>
    %332 = math.tanh %331 : vector<8x16xf32>
    %333 = arith.mulf %328, %332 : vector<8x16xf32>
    %cst_85 = arith.constant 0.000000e+00 : f32
    %334 = vector.broadcast %cst_85 : f32 to vector<8x8xf32>
    %cst_86 = arith.constant 0.000000e+00 : f32
    %335 = vector.broadcast %cst_86 : f32 to vector<8x104xf32>
    %336 = tpu.concatenate %334, %333, %335 in 1 : vector<8x8xf32>, vector<8x16xf32>, vector<8x104xf32> -> vector<8x128xf32>
    %337 = arith.addf %336, %4 : vector<8x128xf32>
    %cst_87 = arith.constant 0.000000e+00 : f32
    %338 = vector.broadcast %cst_87 : f32 to vector<8x120xf32>
    %339 = tpu.concatenate %299, %338 in 1 : vector<8x8xf32>, vector<8x120xf32> -> vector<8x128xf32>
    %340 = arith.addf %337, %339 : vector<8x128xf32>
    %341 = arith.truncf %340 : vector<8x128xf32> to vector<8x128xbf16>
    %c0_88 = arith.constant 0 : index
    %c0_89 = arith.constant 0 : index
    %342 = vector.load %arg3[%c0_88, %c0_89] : memref<128x128xbf16, #tpu.memory_space<vmem>>, vector<128x128xbf16>
    %cst_90 = arith.constant dense<0.000000e+00> : vector<8x128xf32>
    %343 = tpu.matmul %341, %342, %cst_90 {dimension_numbers = #tpu.dot_dimension_numbers<[1], [0], [0], [1], [0, 0, 1, 1], [], []>} : vector<8x128xbf16>, vector<128x128xbf16>, vector<8x128xf32> -> vector<8x128xf32>
    %344 = vector.extract_strided_slice %343 {offsets = [0, 0], sizes = [8, 8], strides = [1, 1]} : vector<8x128xf32> to vector<8x8xf32>
    %345 = arith.negf %344 : vector<8x8xf32>
    %346 = math.exp %345 : vector<8x8xf32>
    %cst_91 = arith.constant 1.000000e+00 : f32
    %347 = vector.broadcast %cst_91 : f32 to vector<8x8xf32>
    %348 = arith.addf %347, %346 : vector<8x8xf32>
    %349 = arith.divf %347, %348 : vector<8x8xf32>
    %350 = vector.extract_strided_slice %343 {offsets = [0, 8], sizes = [8, 8], strides = [1, 1]} : vector<8x128xf32> to vector<8x8xf32>
    %351 = arith.negf %350 : vector<8x8xf32>
    %352 = math.exp %351 : vector<8x8xf32>
    %cst_92 = arith.constant 1.000000e+00 : f32
    %353 = vector.broadcast %cst_92 : f32 to vector<8x8xf32>
    %354 = arith.addf %353, %352 : vector<8x8xf32>
    %355 = arith.divf %353, %354 : vector<8x8xf32>
    %356 = vector.extract_strided_slice %343 {offsets = [0, 16], sizes = [8, 8], strides = [1, 1]} : vector<8x128xf32> to vector<8x8xf32>
    %357 = math.tanh %356 : vector<8x8xf32>
    %358 = vector.extract_strided_slice %343 {offsets = [0, 24], sizes = [8, 8], strides = [1, 1]} : vector<8x128xf32> to vector<8x8xf32>
    %359 = arith.negf %358 : vector<8x8xf32>
    %360 = math.exp %359 : vector<8x8xf32>
    %cst_93 = arith.constant 1.000000e+00 : f32
    %361 = vector.broadcast %cst_93 : f32 to vector<8x8xf32>
    %362 = arith.addf %361, %360 : vector<8x8xf32>
    %363 = arith.divf %361, %362 : vector<8x8xf32>
    %364 = arith.mulf %355, %297 : vector<8x8xf32>
    %365 = arith.mulf %349, %357 : vector<8x8xf32>
    %366 = arith.addf %364, %365 : vector<8x8xf32>
    %367 = math.tanh %366 : vector<8x8xf32>
    %368 = arith.mulf %363, %367 : vector<8x8xf32>
    %c5_i32 = arith.constant 5 : i32
    %369 = arith.index_cast %c5_i32 : i32 to index
    %c0_94 = arith.constant 0 : index
    %c0_95 = arith.constant 0 : index
    %370 = vector.load %arg0[%369, %c0_94, %c0_95] : memref<8x8x128xf32, #tpu.memory_space<vmem>>, vector<1x8x128xf32>
    %371 = vector.shape_cast %370 : vector<1x8x128xf32> to vector<8x128xf32>
    %cst_96 = arith.constant 0.000000e+00 : f32
    %372 = vector.broadcast %cst_96 : f32 to vector<8x112xf32>
    %373 = tpu.concatenate %333, %372 in 1 : vector<8x16xf32>, vector<8x112xf32> -> vector<8x128xf32>
    %374 = arith.addf %371, %373 : vector<8x128xf32>
    %375 = arith.truncf %374 : vector<8x128xf32> to vector<8x128xbf16>
    %c0_97 = arith.constant 0 : index
    %c0_98 = arith.constant 0 : index
    %376 = vector.load %arg2[%c0_97, %c0_98] : memref<128x128xbf16, #tpu.memory_space<vmem>>, vector<128x128xbf16>
    %cst_99 = arith.constant dense<0.000000e+00> : vector<8x128xf32>
    %377 = tpu.matmul %375, %376, %cst_99 {dimension_numbers = #tpu.dot_dimension_numbers<[1], [0], [0], [1], [0, 0, 1, 1], [], []>} : vector<8x128xbf16>, vector<128x128xbf16>, vector<8x128xf32> -> vector<8x128xf32>
    %378 = vector.extract_strided_slice %377 {offsets = [0, 0], sizes = [8, 16], strides = [1, 1]} : vector<8x128xf32> to vector<8x16xf32>
    %379 = arith.negf %378 : vector<8x16xf32>
    %380 = math.exp %379 : vector<8x16xf32>
    %cst_100 = arith.constant 1.000000e+00 : f32
    %381 = vector.broadcast %cst_100 : f32 to vector<8x16xf32>
    %382 = arith.addf %381, %380 : vector<8x16xf32>
    %383 = arith.divf %381, %382 : vector<8x16xf32>
    %384 = vector.extract_strided_slice %377 {offsets = [0, 16], sizes = [8, 16], strides = [1, 1]} : vector<8x128xf32> to vector<8x16xf32>
    %385 = arith.negf %384 : vector<8x16xf32>
    %386 = math.exp %385 : vector<8x16xf32>
    %cst_101 = arith.constant 1.000000e+00 : f32
    %387 = vector.broadcast %cst_101 : f32 to vector<8x16xf32>
    %388 = arith.addf %387, %386 : vector<8x16xf32>
    %389 = arith.divf %387, %388 : vector<8x16xf32>
    %390 = vector.extract_strided_slice %377 {offsets = [0, 32], sizes = [8, 16], strides = [1, 1]} : vector<8x128xf32> to vector<8x16xf32>
    %391 = math.tanh %390 : vector<8x16xf32>
    %392 = vector.extract_strided_slice %377 {offsets = [0, 48], sizes = [8, 16], strides = [1, 1]} : vector<8x128xf32> to vector<8x16xf32>
    %393 = arith.negf %392 : vector<8x16xf32>
    %394 = math.exp %393 : vector<8x16xf32>
    %cst_102 = arith.constant 1.000000e+00 : f32
    %395 = vector.broadcast %cst_102 : f32 to vector<8x16xf32>
    %396 = arith.addf %395, %394 : vector<8x16xf32>
    %397 = arith.divf %395, %396 : vector<8x16xf32>
    %398 = arith.mulf %389, %331 : vector<8x16xf32>
    %399 = arith.mulf %383, %391 : vector<8x16xf32>
    %400 = arith.addf %398, %399 : vector<8x16xf32>
    %401 = math.tanh %400 : vector<8x16xf32>
    %402 = arith.mulf %397, %401 : vector<8x16xf32>
    %cst_103 = arith.constant 0.000000e+00 : f32
    %403 = vector.broadcast %cst_103 : f32 to vector<8x8xf32>
    %cst_104 = arith.constant 0.000000e+00 : f32
    %404 = vector.broadcast %cst_104 : f32 to vector<8x104xf32>
    %405 = tpu.concatenate %403, %402, %404 in 1 : vector<8x8xf32>, vector<8x16xf32>, vector<8x104xf32> -> vector<8x128xf32>
    %406 = arith.addf %405, %4 : vector<8x128xf32>
    %cst_105 = arith.constant 0.000000e+00 : f32
    %407 = vector.broadcast %cst_105 : f32 to vector<8x120xf32>
    %408 = tpu.concatenate %368, %407 in 1 : vector<8x8xf32>, vector<8x120xf32> -> vector<8x128xf32>
    %409 = arith.addf %406, %408 : vector<8x128xf32>
    %410 = arith.truncf %409 : vector<8x128xf32> to vector<8x128xbf16>
    %c0_106 = arith.constant 0 : index
    %c0_107 = arith.constant 0 : index
    %411 = vector.load %arg3[%c0_106, %c0_107] : memref<128x128xbf16, #tpu.memory_space<vmem>>, vector<128x128xbf16>
    %cst_108 = arith.constant dense<0.000000e+00> : vector<8x128xf32>
    %412 = tpu.matmul %410, %411, %cst_108 {dimension_numbers = #tpu.dot_dimension_numbers<[1], [0], [0], [1], [0, 0, 1, 1], [], []>} : vector<8x128xbf16>, vector<128x128xbf16>, vector<8x128xf32> -> vector<8x128xf32>
    %413 = vector.extract_strided_slice %412 {offsets = [0, 0], sizes = [8, 8], strides = [1, 1]} : vector<8x128xf32> to vector<8x8xf32>
    %414 = arith.negf %413 : vector<8x8xf32>
    %415 = math.exp %414 : vector<8x8xf32>
    %cst_109 = arith.constant 1.000000e+00 : f32
    %416 = vector.broadcast %cst_109 : f32 to vector<8x8xf32>
    %417 = arith.addf %416, %415 : vector<8x8xf32>
    %418 = arith.divf %416, %417 : vector<8x8xf32>
    %419 = vector.extract_strided_slice %412 {offsets = [0, 8], sizes = [8, 8], strides = [1, 1]} : vector<8x128xf32> to vector<8x8xf32>
    %420 = arith.negf %419 : vector<8x8xf32>
    %421 = math.exp %420 : vector<8x8xf32>
    %cst_110 = arith.constant 1.000000e+00 : f32
    %422 = vector.broadcast %cst_110 : f32 to vector<8x8xf32>
    %423 = arith.addf %422, %421 : vector<8x8xf32>
    %424 = arith.divf %422, %423 : vector<8x8xf32>
    %425 = vector.extract_strided_slice %412 {offsets = [0, 16], sizes = [8, 8], strides = [1, 1]} : vector<8x128xf32> to vector<8x8xf32>
    %426 = math.tanh %425 : vector<8x8xf32>
    %427 = vector.extract_strided_slice %412 {offsets = [0, 24], sizes = [8, 8], strides = [1, 1]} : vector<8x128xf32> to vector<8x8xf32>
    %428 = arith.negf %427 : vector<8x8xf32>
    %429 = math.exp %428 : vector<8x8xf32>
    %cst_111 = arith.constant 1.000000e+00 : f32
    %430 = vector.broadcast %cst_111 : f32 to vector<8x8xf32>
    %431 = arith.addf %430, %429 : vector<8x8xf32>
    %432 = arith.divf %430, %431 : vector<8x8xf32>
    %433 = arith.mulf %424, %366 : vector<8x8xf32>
    %434 = arith.mulf %418, %426 : vector<8x8xf32>
    %435 = arith.addf %433, %434 : vector<8x8xf32>
    %436 = math.tanh %435 : vector<8x8xf32>
    %437 = arith.mulf %432, %436 : vector<8x8xf32>
    %c6_i32 = arith.constant 6 : i32
    %438 = arith.index_cast %c6_i32 : i32 to index
    %c0_112 = arith.constant 0 : index
    %c0_113 = arith.constant 0 : index
    %439 = vector.load %arg0[%438, %c0_112, %c0_113] : memref<8x8x128xf32, #tpu.memory_space<vmem>>, vector<1x8x128xf32>
    %440 = vector.shape_cast %439 : vector<1x8x128xf32> to vector<8x128xf32>
    %cst_114 = arith.constant 0.000000e+00 : f32
    %441 = vector.broadcast %cst_114 : f32 to vector<8x112xf32>
    %442 = tpu.concatenate %402, %441 in 1 : vector<8x16xf32>, vector<8x112xf32> -> vector<8x128xf32>
    %443 = arith.addf %440, %442 : vector<8x128xf32>
    %444 = arith.truncf %443 : vector<8x128xf32> to vector<8x128xbf16>
    %c0_115 = arith.constant 0 : index
    %c0_116 = arith.constant 0 : index
    %445 = vector.load %arg2[%c0_115, %c0_116] : memref<128x128xbf16, #tpu.memory_space<vmem>>, vector<128x128xbf16>
    %cst_117 = arith.constant dense<0.000000e+00> : vector<8x128xf32>
    %446 = tpu.matmul %444, %445, %cst_117 {dimension_numbers = #tpu.dot_dimension_numbers<[1], [0], [0], [1], [0, 0, 1, 1], [], []>} : vector<8x128xbf16>, vector<128x128xbf16>, vector<8x128xf32> -> vector<8x128xf32>
    %447 = vector.extract_strided_slice %446 {offsets = [0, 0], sizes = [8, 16], strides = [1, 1]} : vector<8x128xf32> to vector<8x16xf32>
    %448 = arith.negf %447 : vector<8x16xf32>
    %449 = math.exp %448 : vector<8x16xf32>
    %cst_118 = arith.constant 1.000000e+00 : f32
    %450 = vector.broadcast %cst_118 : f32 to vector<8x16xf32>
    %451 = arith.addf %450, %449 : vector<8x16xf32>
    %452 = arith.divf %450, %451 : vector<8x16xf32>
    %453 = vector.extract_strided_slice %446 {offsets = [0, 16], sizes = [8, 16], strides = [1, 1]} : vector<8x128xf32> to vector<8x16xf32>
    %454 = arith.negf %453 : vector<8x16xf32>
    %455 = math.exp %454 : vector<8x16xf32>
    %cst_119 = arith.constant 1.000000e+00 : f32
    %456 = vector.broadcast %cst_119 : f32 to vector<8x16xf32>
    %457 = arith.addf %456, %455 : vector<8x16xf32>
    %458 = arith.divf %456, %457 : vector<8x16xf32>
    %459 = vector.extract_strided_slice %446 {offsets = [0, 32], sizes = [8, 16], strides = [1, 1]} : vector<8x128xf32> to vector<8x16xf32>
    %460 = math.tanh %459 : vector<8x16xf32>
    %461 = vector.extract_strided_slice %446 {offsets = [0, 48], sizes = [8, 16], strides = [1, 1]} : vector<8x128xf32> to vector<8x16xf32>
    %462 = arith.negf %461 : vector<8x16xf32>
    %463 = math.exp %462 : vector<8x16xf32>
    %cst_120 = arith.constant 1.000000e+00 : f32
    %464 = vector.broadcast %cst_120 : f32 to vector<8x16xf32>
    %465 = arith.addf %464, %463 : vector<8x16xf32>
    %466 = arith.divf %464, %465 : vector<8x16xf32>
    %467 = arith.mulf %458, %400 : vector<8x16xf32>
    %468 = arith.mulf %452, %460 : vector<8x16xf32>
    %469 = arith.addf %467, %468 : vector<8x16xf32>
    %470 = math.tanh %469 : vector<8x16xf32>
    %471 = arith.mulf %466, %470 : vector<8x16xf32>
    %cst_121 = arith.constant 0.000000e+00 : f32
    %472 = vector.broadcast %cst_121 : f32 to vector<8x8xf32>
    %cst_122 = arith.constant 0.000000e+00 : f32
    %473 = vector.broadcast %cst_122 : f32 to vector<8x104xf32>
    %474 = tpu.concatenate %472, %471, %473 in 1 : vector<8x8xf32>, vector<8x16xf32>, vector<8x104xf32> -> vector<8x128xf32>
    %475 = arith.addf %474, %4 : vector<8x128xf32>
    %cst_123 = arith.constant 0.000000e+00 : f32
    %476 = vector.broadcast %cst_123 : f32 to vector<8x120xf32>
    %477 = tpu.concatenate %437, %476 in 1 : vector<8x8xf32>, vector<8x120xf32> -> vector<8x128xf32>
    %478 = arith.addf %475, %477 : vector<8x128xf32>
    %479 = arith.truncf %478 : vector<8x128xf32> to vector<8x128xbf16>
    %c0_124 = arith.constant 0 : index
    %c0_125 = arith.constant 0 : index
    %480 = vector.load %arg3[%c0_124, %c0_125] : memref<128x128xbf16, #tpu.memory_space<vmem>>, vector<128x128xbf16>
    %cst_126 = arith.constant dense<0.000000e+00> : vector<8x128xf32>
    %481 = tpu.matmul %479, %480, %cst_126 {dimension_numbers = #tpu.dot_dimension_numbers<[1], [0], [0], [1], [0, 0, 1, 1], [], []>} : vector<8x128xbf16>, vector<128x128xbf16>, vector<8x128xf32> -> vector<8x128xf32>
    %482 = vector.extract_strided_slice %481 {offsets = [0, 0], sizes = [8, 8], strides = [1, 1]} : vector<8x128xf32> to vector<8x8xf32>
    %483 = arith.negf %482 : vector<8x8xf32>
    %484 = math.exp %483 : vector<8x8xf32>
    %cst_127 = arith.constant 1.000000e+00 : f32
    %485 = vector.broadcast %cst_127 : f32 to vector<8x8xf32>
    %486 = arith.addf %485, %484 : vector<8x8xf32>
    %487 = arith.divf %485, %486 : vector<8x8xf32>
    %488 = vector.extract_strided_slice %481 {offsets = [0, 8], sizes = [8, 8], strides = [1, 1]} : vector<8x128xf32> to vector<8x8xf32>
    %489 = arith.negf %488 : vector<8x8xf32>
    %490 = math.exp %489 : vector<8x8xf32>
    %cst_128 = arith.constant 1.000000e+00 : f32
    %491 = vector.broadcast %cst_128 : f32 to vector<8x8xf32>
    %492 = arith.addf %491, %490 : vector<8x8xf32>
    %493 = arith.divf %491, %492 : vector<8x8xf32>
    %494 = vector.extract_strided_slice %481 {offsets = [0, 16], sizes = [8, 8], strides = [1, 1]} : vector<8x128xf32> to vector<8x8xf32>
    %495 = math.tanh %494 : vector<8x8xf32>
    %496 = vector.extract_strided_slice %481 {offsets = [0, 24], sizes = [8, 8], strides = [1, 1]} : vector<8x128xf32> to vector<8x8xf32>
    %497 = arith.negf %496 : vector<8x8xf32>
    %498 = math.exp %497 : vector<8x8xf32>
    %cst_129 = arith.constant 1.000000e+00 : f32
    %499 = vector.broadcast %cst_129 : f32 to vector<8x8xf32>
    %500 = arith.addf %499, %498 : vector<8x8xf32>
    %501 = arith.divf %499, %500 : vector<8x8xf32>
    %502 = arith.mulf %493, %435 : vector<8x8xf32>
    %503 = arith.mulf %487, %495 : vector<8x8xf32>
    %504 = arith.addf %502, %503 : vector<8x8xf32>
    %505 = math.tanh %504 : vector<8x8xf32>
    %506 = arith.mulf %501, %505 : vector<8x8xf32>
    %c7_i32 = arith.constant 7 : i32
    %507 = arith.index_cast %c7_i32 : i32 to index
    %c0_130 = arith.constant 0 : index
    %c0_131 = arith.constant 0 : index
    %508 = vector.load %arg0[%507, %c0_130, %c0_131] : memref<8x8x128xf32, #tpu.memory_space<vmem>>, vector<1x8x128xf32>
    %509 = vector.shape_cast %508 : vector<1x8x128xf32> to vector<8x128xf32>
    %cst_132 = arith.constant 0.000000e+00 : f32
    %510 = vector.broadcast %cst_132 : f32 to vector<8x112xf32>
    %511 = tpu.concatenate %471, %510 in 1 : vector<8x16xf32>, vector<8x112xf32> -> vector<8x128xf32>
    %512 = arith.addf %509, %511 : vector<8x128xf32>
    %513 = arith.truncf %512 : vector<8x128xf32> to vector<8x128xbf16>
    %c0_133 = arith.constant 0 : index
    %c0_134 = arith.constant 0 : index
    %514 = vector.load %arg2[%c0_133, %c0_134] : memref<128x128xbf16, #tpu.memory_space<vmem>>, vector<128x128xbf16>
    %cst_135 = arith.constant dense<0.000000e+00> : vector<8x128xf32>
    %515 = tpu.matmul %513, %514, %cst_135 {dimension_numbers = #tpu.dot_dimension_numbers<[1], [0], [0], [1], [0, 0, 1, 1], [], []>} : vector<8x128xbf16>, vector<128x128xbf16>, vector<8x128xf32> -> vector<8x128xf32>
    %516 = vector.extract_strided_slice %515 {offsets = [0, 0], sizes = [8, 16], strides = [1, 1]} : vector<8x128xf32> to vector<8x16xf32>
    %517 = arith.negf %516 : vector<8x16xf32>
    %518 = math.exp %517 : vector<8x16xf32>
    %cst_136 = arith.constant 1.000000e+00 : f32
    %519 = vector.broadcast %cst_136 : f32 to vector<8x16xf32>
    %520 = arith.addf %519, %518 : vector<8x16xf32>
    %521 = arith.divf %519, %520 : vector<8x16xf32>
    %522 = vector.extract_strided_slice %515 {offsets = [0, 16], sizes = [8, 16], strides = [1, 1]} : vector<8x128xf32> to vector<8x16xf32>
    %523 = arith.negf %522 : vector<8x16xf32>
    %524 = math.exp %523 : vector<8x16xf32>
    %cst_137 = arith.constant 1.000000e+00 : f32
    %525 = vector.broadcast %cst_137 : f32 to vector<8x16xf32>
    %526 = arith.addf %525, %524 : vector<8x16xf32>
    %527 = arith.divf %525, %526 : vector<8x16xf32>
    %528 = vector.extract_strided_slice %515 {offsets = [0, 32], sizes = [8, 16], strides = [1, 1]} : vector<8x128xf32> to vector<8x16xf32>
    %529 = math.tanh %528 : vector<8x16xf32>
    %530 = vector.extract_strided_slice %515 {offsets = [0, 48], sizes = [8, 16], strides = [1, 1]} : vector<8x128xf32> to vector<8x16xf32>
    %531 = arith.negf %530 : vector<8x16xf32>
    %532 = math.exp %531 : vector<8x16xf32>
    %cst_138 = arith.constant 1.000000e+00 : f32
    %533 = vector.broadcast %cst_138 : f32 to vector<8x16xf32>
    %534 = arith.addf %533, %532 : vector<8x16xf32>
    %535 = arith.divf %533, %534 : vector<8x16xf32>
    %536 = arith.mulf %527, %469 : vector<8x16xf32>
    %537 = arith.mulf %521, %529 : vector<8x16xf32>
    %538 = arith.addf %536, %537 : vector<8x16xf32>
    %539 = math.tanh %538 : vector<8x16xf32>
    %540 = arith.mulf %535, %539 : vector<8x16xf32>
    %cst_139 = arith.constant 0.000000e+00 : f32
    %541 = vector.broadcast %cst_139 : f32 to vector<8x8xf32>
    %cst_140 = arith.constant 0.000000e+00 : f32
    %542 = vector.broadcast %cst_140 : f32 to vector<8x104xf32>
    %543 = tpu.concatenate %541, %540, %542 in 1 : vector<8x8xf32>, vector<8x16xf32>, vector<8x104xf32> -> vector<8x128xf32>
    %544 = arith.addf %543, %4 : vector<8x128xf32>
    %cst_141 = arith.constant 0.000000e+00 : f32
    %545 = vector.broadcast %cst_141 : f32 to vector<8x120xf32>
    %546 = tpu.concatenate %506, %545 in 1 : vector<8x8xf32>, vector<8x120xf32> -> vector<8x128xf32>
    %547 = arith.addf %544, %546 : vector<8x128xf32>
    %548 = arith.truncf %547 : vector<8x128xf32> to vector<8x128xbf16>
    %c0_142 = arith.constant 0 : index
    %c0_143 = arith.constant 0 : index
    %549 = vector.load %arg3[%c0_142, %c0_143] : memref<128x128xbf16, #tpu.memory_space<vmem>>, vector<128x128xbf16>
    %cst_144 = arith.constant dense<0.000000e+00> : vector<8x128xf32>
    %550 = tpu.matmul %548, %549, %cst_144 {dimension_numbers = #tpu.dot_dimension_numbers<[1], [0], [0], [1], [0, 0, 1, 1], [], []>} : vector<8x128xbf16>, vector<128x128xbf16>, vector<8x128xf32> -> vector<8x128xf32>
    %551 = vector.extract_strided_slice %550 {offsets = [0, 0], sizes = [8, 8], strides = [1, 1]} : vector<8x128xf32> to vector<8x8xf32>
    %552 = arith.negf %551 : vector<8x8xf32>
    %553 = math.exp %552 : vector<8x8xf32>
    %cst_145 = arith.constant 1.000000e+00 : f32
    %554 = vector.broadcast %cst_145 : f32 to vector<8x8xf32>
    %555 = arith.addf %554, %553 : vector<8x8xf32>
    %556 = arith.divf %554, %555 : vector<8x8xf32>
    %557 = vector.extract_strided_slice %550 {offsets = [0, 8], sizes = [8, 8], strides = [1, 1]} : vector<8x128xf32> to vector<8x8xf32>
    %558 = arith.negf %557 : vector<8x8xf32>
    %559 = math.exp %558 : vector<8x8xf32>
    %cst_146 = arith.constant 1.000000e+00 : f32
    %560 = vector.broadcast %cst_146 : f32 to vector<8x8xf32>
    %561 = arith.addf %560, %559 : vector<8x8xf32>
    %562 = arith.divf %560, %561 : vector<8x8xf32>
    %563 = vector.extract_strided_slice %550 {offsets = [0, 16], sizes = [8, 8], strides = [1, 1]} : vector<8x128xf32> to vector<8x8xf32>
    %564 = math.tanh %563 : vector<8x8xf32>
    %565 = vector.extract_strided_slice %550 {offsets = [0, 24], sizes = [8, 8], strides = [1, 1]} : vector<8x128xf32> to vector<8x8xf32>
    %566 = arith.negf %565 : vector<8x8xf32>
    %567 = math.exp %566 : vector<8x8xf32>
    %cst_147 = arith.constant 1.000000e+00 : f32
    %568 = vector.broadcast %cst_147 : f32 to vector<8x8xf32>
    %569 = arith.addf %568, %567 : vector<8x8xf32>
    %570 = arith.divf %568, %569 : vector<8x8xf32>
    %571 = arith.mulf %562, %504 : vector<8x8xf32>
    %572 = arith.mulf %556, %564 : vector<8x8xf32>
    %573 = arith.addf %571, %572 : vector<8x8xf32>
    %574 = math.tanh %573 : vector<8x8xf32>
    %575 = arith.mulf %570, %574 : vector<8x8xf32>
    %c8_i32 = arith.constant 8 : i32
    %cst_148 = arith.constant 0.000000e+00 : f32
    %576 = vector.broadcast %cst_148 : f32 to vector<8x8xf32>
    %cst_149 = arith.constant 0.000000e+00 : f32
    %577 = vector.broadcast %cst_149 : f32 to vector<8x112xf32>
    %578 = tpu.concatenate %576, %575, %577 in 1 : vector<8x8xf32>, vector<8x8xf32>, vector<8x112xf32> -> vector<8x128xf32>
    %c0_150 = arith.constant 0 : index
    %c0_151 = arith.constant 0 : index
    %c0_152 = arith.constant 0 : index
    %579 = vector.load %arg1[%c0_150, %c0_151, %c0_152] : memref<2x8x8xf32, #tpu.memory_space<vmem>>, vector<1x8x8xf32>
    %580 = vector.shape_cast %579 : vector<1x8x8xf32> to vector<8x8xf32>
    %cst_153 = arith.constant dense<0.000000e+00> : vector<8x128xf32>
    %581 = tpu.matmul %580, %578, %cst_153 {dimension_numbers = #tpu.dot_dimension_numbers<[1], [0], [0], [1], [0, 0, 1, 1], [], []>} : vector<8x8xf32>, vector<8x128xf32>, vector<8x128xf32> -> vector<8x128xf32>
    %582 = arith.addf %581, %9 : vector<8x128xf32>
    %c0_154 = arith.constant 0 : index
    %c0_155 = arith.constant 0 : index
    %c0_156 = arith.constant 0 : index
    %583 = vector.load %arg8[%c0_154, %c0_155, %c0_156] : memref<2x8x128xf32, #tpu.memory_space<vmem>>, vector<1x8x128xf32>
    %584 = vector.shape_cast %583 : vector<1x8x128xf32> to vector<8x128xf32>
    %585 = vector.shape_cast %582 : vector<8x128xf32> to vector<1x8x128xf32>
    tpu.vector_store %arg8[%c0_154, %c0_155, %c0_156], %585 {strides = array<i32>} : memref<2x8x128xf32, #tpu.memory_space<vmem>>, vector<1x8x128xf32>,
    %c1 = arith.constant 1 : index
    %c0_157 = arith.constant 0 : index
    %c0_158 = arith.constant 0 : index
    %586 = vector.load %arg1[%c1, %c0_157, %c0_158] : memref<2x8x8xf32, #tpu.memory_space<vmem>>, vector<1x8x8xf32>
    %587 = vector.shape_cast %586 : vector<1x8x8xf32> to vector<8x8xf32>
    %cst_159 = arith.constant dense<0.000000e+00> : vector<8x128xf32>
    %588 = tpu.matmul %587, %578, %cst_159 {dimension_numbers = #tpu.dot_dimension_numbers<[1], [0], [0], [1], [0, 0, 1, 1], [], []>} : vector<8x8xf32>, vector<8x128xf32>, vector<8x128xf32> -> vector<8x128xf32>
    %589 = arith.addf %588, %9 : vector<8x128xf32>
    %c1_160 = arith.constant 1 : index
    %c0_161 = arith.constant 0 : index
    %c0_162 = arith.constant 0 : index
    %590 = vector.load %arg8[%c1_160, %c0_161, %c0_162] : memref<2x8x128xf32, #tpu.memory_space<vmem>>, vector<1x8x128xf32>
    %591 = vector.shape_cast %590 : vector<1x8x128xf32> to vector<8x128xf32>
    %592 = vector.shape_cast %589 : vector<8x128xf32> to vector<1x8x128xf32>
    tpu.vector_store %arg8[%c1_160, %c0_161, %c0_162], %592 {strides = array<i32>} : memref<2x8x128xf32, #tpu.memory_space<vmem>>, vector<1x8x128xf32>,
    %cst_163 = arith.constant 0.000000e+00 : f32
    %593 = vector.broadcast %cst_163 : f32 to vector<8x8xf32>
    %cst_164 = arith.constant 0.000000e+00 : f32
    %594 = vector.broadcast %cst_164 : f32 to vector<8x8xf32>
    %cst_165 = arith.constant 0.000000e+00 : f32
    %595 = vector.broadcast %cst_165 : f32 to vector<8x16xf32>
    %cst_166 = arith.constant 0.000000e+00 : f32
    %596 = vector.broadcast %cst_166 : f32 to vector<8x16xf32>
    %c0_i32_167 = arith.constant 0 : i32
    %c2_i32_168 = arith.constant 2 : i32
    %c0_i32_169 = arith.constant 0 : i32
    %597 = arith.cmpi eq, %c2_i32_168, %c0_i32_169 : i32
    %c1_i32_170 = arith.constant 1 : i32
    %598 = arith.select %597, %c1_i32_170, %c2_i32_168 : i32
    %599 = arith.remsi %c0_i32_167, %598 : i32
    %c0_i32_171 = arith.constant 0 : i32
    %600 = arith.cmpi ne, %599, %c0_i32_171 : i32
    %c0_i32_172 = arith.constant 0 : i32
    %601 = arith.cmpi slt, %599, %c0_i32_172 : i32
    %c0_i32_173 = arith.constant 0 : i32
    %602 = arith.cmpi slt, %598, %c0_i32_173 : i32
    %603 = arith.xori %601, %602 : i1
    %604 = arith.andi %603, %600 : i1
    %605 = arith.addi %599, %598 : i32
    %606 = arith.select %604, %605, %599 : i32
    %607 = arith.index_cast %606 : i32 to index
    %c0_174 = arith.constant 0 : index
    %c0_175 = arith.constant 0 : index
    %608 = vector.load %arg8[%607, %c0_174, %c0_175] : memref<2x8x128xf32, #tpu.memory_space<vmem>>, vector<1x8x128xf32>
    %609 = vector.shape_cast %608 : vector<1x8x128xf32> to vector<8x128xf32>
    %cst_176 = arith.constant 0.000000e+00 : f32
    %610 = vector.broadcast %cst_176 : f32 to vector<8x120xf32>
    %611 = tpu.concatenate %593, %610 in 1 : vector<8x8xf32>, vector<8x120xf32> -> vector<8x128xf32>
    %612 = arith.addf %609, %611 : vector<8x128xf32>
    %613 = arith.truncf %612 : vector<8x128xf32> to vector<8x128xbf16>
    %c0_177 = arith.constant 0 : index
    %c0_178 = arith.constant 0 : index
    %614 = vector.load %arg4[%c0_177, %c0_178] : memref<128x128xbf16, #tpu.memory_space<vmem>>, vector<128x128xbf16>
    %cst_179 = arith.constant dense<0.000000e+00> : vector<8x128xf32>
    %615 = tpu.matmul %613, %614, %cst_179 {dimension_numbers = #tpu.dot_dimension_numbers<[1], [0], [0], [1], [0, 0, 1, 1], [], []>} : vector<8x128xbf16>, vector<128x128xbf16>, vector<8x128xf32> -> vector<8x128xf32>
    %616 = vector.extract_strided_slice %615 {offsets = [0, 0], sizes = [8, 8], strides = [1, 1]} : vector<8x128xf32> to vector<8x8xf32>
    %617 = arith.negf %616 : vector<8x8xf32>
    %618 = math.exp %617 : vector<8x8xf32>
    %cst_180 = arith.constant 1.000000e+00 : f32
    %619 = vector.broadcast %cst_180 : f32 to vector<8x8xf32>
    %620 = arith.addf %619, %618 : vector<8x8xf32>
    %621 = arith.divf %619, %620 : vector<8x8xf32>
    %622 = vector.extract_strided_slice %615 {offsets = [0, 8], sizes = [8, 8], strides = [1, 1]} : vector<8x128xf32> to vector<8x8xf32>
    %623 = arith.negf %622 : vector<8x8xf32>
    %624 = math.exp %623 : vector<8x8xf32>
    %cst_181 = arith.constant 1.000000e+00 : f32
    %625 = vector.broadcast %cst_181 : f32 to vector<8x8xf32>
    %626 = arith.addf %625, %624 : vector<8x8xf32>
    %627 = arith.divf %625, %626 : vector<8x8xf32>
    %628 = vector.extract_strided_slice %615 {offsets = [0, 16], sizes = [8, 8], strides = [1, 1]} : vector<8x128xf32> to vector<8x8xf32>
    %629 = math.tanh %628 : vector<8x8xf32>
    %630 = vector.extract_strided_slice %615 {offsets = [0, 24], sizes = [8, 8], strides = [1, 1]} : vector<8x128xf32> to vector<8x8xf32>
    %631 = arith.negf %630 : vector<8x8xf32>
    %632 = math.exp %631 : vector<8x8xf32>
    %cst_182 = arith.constant 1.000000e+00 : f32
    %633 = vector.broadcast %cst_182 : f32 to vector<8x8xf32>
    %634 = arith.addf %633, %632 : vector<8x8xf32>
    %635 = arith.divf %633, %634 : vector<8x8xf32>
    %636 = arith.mulf %627, %594 : vector<8x8xf32>
    %637 = arith.mulf %621, %629 : vector<8x8xf32>
    %638 = arith.addf %636, %637 : vector<8x8xf32>
    %639 = math.tanh %638 : vector<8x8xf32>
    %640 = arith.mulf %635, %639 : vector<8x8xf32>
    %cst_183 = arith.constant 0.000000e+00 : f32
    %641 = vector.broadcast %cst_183 : f32 to vector<8x16xf32>
    %cst_184 = arith.constant 0.000000e+00 : f32
    %642 = vector.broadcast %cst_184 : f32 to vector<8x104xf32>
    %643 = tpu.concatenate %641, %640, %642 in 1 : vector<8x16xf32>, vector<8x8xf32>, vector<8x104xf32> -> vector<8x128xf32>
    %644 = arith.addf %643, %14 : vector<8x128xf32>
    %cst_185 = arith.constant 0.000000e+00 : f32
    %645 = vector.broadcast %cst_185 : f32 to vector<8x112xf32>
    %646 = tpu.concatenate %595, %645 in 1 : vector<8x16xf32>, vector<8x112xf32> -> vector<8x128xf32>
    %647 = arith.addf %644, %646 : vector<8x128xf32>
    %648 = arith.truncf %647 : vector<8x128xf32> to vector<8x128xbf16>
    %c0_186 = arith.constant 0 : index
    %c0_187 = arith.constant 0 : index
    %649 = vector.load %arg5[%c0_186, %c0_187] : memref<128x128xbf16, #tpu.memory_space<vmem>>, vector<128x128xbf16>
    %cst_188 = arith.constant dense<0.000000e+00> : vector<8x128xf32>
    %650 = tpu.matmul %648, %649, %cst_188 {dimension_numbers = #tpu.dot_dimension_numbers<[1], [0], [0], [1], [0, 0, 1, 1], [], []>} : vector<8x128xbf16>, vector<128x128xbf16>, vector<8x128xf32> -> vector<8x128xf32>
    %651 = vector.extract_strided_slice %650 {offsets = [0, 0], sizes = [8, 16], strides = [1, 1]} : vector<8x128xf32> to vector<8x16xf32>
    %652 = arith.negf %651 : vector<8x16xf32>
    %653 = math.exp %652 : vector<8x16xf32>
    %cst_189 = arith.constant 1.000000e+00 : f32
    %654 = vector.broadcast %cst_189 : f32 to vector<8x16xf32>
    %655 = arith.addf %654, %653 : vector<8x16xf32>
    %656 = arith.divf %654, %655 : vector<8x16xf32>
    %657 = vector.extract_strided_slice %650 {offsets = [0, 16], sizes = [8, 16], strides = [1, 1]} : vector<8x128xf32> to vector<8x16xf32>
    %658 = arith.negf %657 : vector<8x16xf32>
    %659 = math.exp %658 : vector<8x16xf32>
    %cst_190 = arith.constant 1.000000e+00 : f32
    %660 = vector.broadcast %cst_190 : f32 to vector<8x16xf32>
    %661 = arith.addf %660, %659 : vector<8x16xf32>
    %662 = arith.divf %660, %661 : vector<8x16xf32>
    %663 = vector.extract_strided_slice %650 {offsets = [0, 32], sizes = [8, 16], strides = [1, 1]} : vector<8x128xf32> to vector<8x16xf32>
    %664 = math.tanh %663 : vector<8x16xf32>
    %665 = vector.extract_strided_slice %650 {offsets = [0, 48], sizes = [8, 16], strides = [1, 1]} : vector<8x128xf32> to vector<8x16xf32>
    %666 = arith.negf %665 : vector<8x16xf32>
    %667 = math.exp %666 : vector<8x16xf32>
    %cst_191 = arith.constant 1.000000e+00 : f32
    %668 = vector.broadcast %cst_191 : f32 to vector<8x16xf32>
    %669 = arith.addf %668, %667 : vector<8x16xf32>
    %670 = arith.divf %668, %669 : vector<8x16xf32>
    %671 = arith.mulf %662, %596 : vector<8x16xf32>
    %672 = arith.mulf %656, %664 : vector<8x16xf32>
    %673 = arith.addf %671, %672 : vector<8x16xf32>
    %674 = math.tanh %673 : vector<8x16xf32>
    %675 = arith.mulf %670, %674 : vector<8x16xf32>
    %c8_i32_192 = arith.constant 8 : i32
    %676 = arith.muli %c0_i32_167, %c8_i32_192 : i32
    %677 = tpu.assume_multiple %676, 8 : i32
    %cst_193 = arith.constant 0.000000e+00 : f32
    %678 = vector.broadcast %cst_193 : f32 to vector<8x112xf32>
    %679 = tpu.concatenate %675, %678 in 1 : vector<8x16xf32>, vector<8x112xf32> -> vector<8x128xf32>
    %680 = arith.addf %679, %19 : vector<8x128xf32>
    %681 = arith.index_cast %677 : i32 to index
    %c0_194 = arith.constant 0 : index
    %682 = vector.load %arg9[%681, %c0_194] : memref<64x128xf32, #tpu.memory_space<vmem>>, vector<8x128xf32>
    tpu.vector_store %arg9[%681, %c0_194], %680 {strides = array<i32>} : memref<64x128xf32, #tpu.memory_space<vmem>>, vector<8x128xf32>,
    %c1_i32_195 = arith.constant 1 : i32
    %c2_i32_196 = arith.constant 2 : i32
    %c0_i32_197 = arith.constant 0 : i32
    %683 = arith.cmpi eq, %c2_i32_196, %c0_i32_197 : i32
    %c1_i32_198 = arith.constant 1 : i32
    %684 = arith.select %683, %c1_i32_198, %c2_i32_196 : i32
    %685 = arith.remsi %c1_i32_195, %684 : i32
    %c0_i32_199 = arith.constant 0 : i32
    %686 = arith.cmpi ne, %685, %c0_i32_199 : i32
    %c0_i32_200 = arith.constant 0 : i32
    %687 = arith.cmpi slt, %685, %c0_i32_200 : i32
    %c0_i32_201 = arith.constant 0 : i32
    %688 = arith.cmpi slt, %684, %c0_i32_201 : i32
    %689 = arith.xori %687, %688 : i1
    %690 = arith.andi %689, %686 : i1
    %691 = arith.addi %685, %684 : i32
    %692 = arith.select %690, %691, %685 : i32
    %693 = arith.index_cast %692 : i32 to index
    %c0_202 = arith.constant 0 : index
    %c0_203 = arith.constant 0 : index
    %694 = vector.load %arg8[%693, %c0_202, %c0_203] : memref<2x8x128xf32, #tpu.memory_space<vmem>>, vector<1x8x128xf32>
    %695 = vector.shape_cast %694 : vector<1x8x128xf32> to vector<8x128xf32>
    %cst_204 = arith.constant 0.000000e+00 : f32
    %696 = vector.broadcast %cst_204 : f32 to vector<8x120xf32>
    %697 = tpu.concatenate %640, %696 in 1 : vector<8x8xf32>, vector<8x120xf32> -> vector<8x128xf32>
    %698 = arith.addf %695, %697 : vector<8x128xf32>
    %699 = arith.truncf %698 : vector<8x128xf32> to vector<8x128xbf16>
    %c0_205 = arith.constant 0 : index
    %c0_206 = arith.constant 0 : index
    %700 = vector.load %arg4[%c0_205, %c0_206] : memref<128x128xbf16, #tpu.memory_space<vmem>>, vector<128x128xbf16>
    %cst_207 = arith.constant dense<0.000000e+00> : vector<8x128xf32>
    %701 = tpu.matmul %699, %700, %cst_207 {dimension_numbers = #tpu.dot_dimension_numbers<[1], [0], [0], [1], [0, 0, 1, 1], [], []>} : vector<8x128xbf16>, vector<128x128xbf16>, vector<8x128xf32> -> vector<8x128xf32>
    %702 = vector.extract_strided_slice %701 {offsets = [0, 0], sizes = [8, 8], strides = [1, 1]} : vector<8x128xf32> to vector<8x8xf32>
    %703 = arith.negf %702 : vector<8x8xf32>
    %704 = math.exp %703 : vector<8x8xf32>
    %cst_208 = arith.constant 1.000000e+00 : f32
    %705 = vector.broadcast %cst_208 : f32 to vector<8x8xf32>
    %706 = arith.addf %705, %704 : vector<8x8xf32>
    %707 = arith.divf %705, %706 : vector<8x8xf32>
    %708 = vector.extract_strided_slice %701 {offsets = [0, 8], sizes = [8, 8], strides = [1, 1]} : vector<8x128xf32> to vector<8x8xf32>
    %709 = arith.negf %708 : vector<8x8xf32>
    %710 = math.exp %709 : vector<8x8xf32>
    %cst_209 = arith.constant 1.000000e+00 : f32
    %711 = vector.broadcast %cst_209 : f32 to vector<8x8xf32>
    %712 = arith.addf %711, %710 : vector<8x8xf32>
    %713 = arith.divf %711, %712 : vector<8x8xf32>
    %714 = vector.extract_strided_slice %701 {offsets = [0, 16], sizes = [8, 8], strides = [1, 1]} : vector<8x128xf32> to vector<8x8xf32>
    %715 = math.tanh %714 : vector<8x8xf32>
    %716 = vector.extract_strided_slice %701 {offsets = [0, 24], sizes = [8, 8], strides = [1, 1]} : vector<8x128xf32> to vector<8x8xf32>
    %717 = arith.negf %716 : vector<8x8xf32>
    %718 = math.exp %717 : vector<8x8xf32>
    %cst_210 = arith.constant 1.000000e+00 : f32
    %719 = vector.broadcast %cst_210 : f32 to vector<8x8xf32>
    %720 = arith.addf %719, %718 : vector<8x8xf32>
    %721 = arith.divf %719, %720 : vector<8x8xf32>
    %722 = arith.mulf %713, %638 : vector<8x8xf32>
    %723 = arith.mulf %707, %715 : vector<8x8xf32>
    %724 = arith.addf %722, %723 : vector<8x8xf32>
    %725 = math.tanh %724 : vector<8x8xf32>
    %726 = arith.mulf %721, %725 : vector<8x8xf32>
    %cst_211 = arith.constant 0.000000e+00 : f32
    %727 = vector.broadcast %cst_211 : f32 to vector<8x16xf32>
    %cst_212 = arith.constant 0.000000e+00 : f32
    %728 = vector.broadcast %cst_212 : f32 to vector<8x104xf32>
    %729 = tpu.concatenate %727, %726, %728 in 1 : vector<8x16xf32>, vector<8x8xf32>, vector<8x104xf32> -> vector<8x128xf32>
    %730 = arith.addf %729, %14 : vector<8x128xf32>
    %cst_213 = arith.constant 0.000000e+00 : f32
    %731 = vector.broadcast %cst_213 : f32 to vector<8x112xf32>
    %732 = tpu.concatenate %675, %731 in 1 : vector<8x16xf32>, vector<8x112xf32> -> vector<8x128xf32>
    %733 = arith.addf %730, %732 : vector<8x128xf32>
    %734 = arith.truncf %733 : vector<8x128xf32> to vector<8x128xbf16>
    %c0_214 = arith.constant 0 : index
    %c0_215 = arith.constant 0 : index
    %735 = vector.load %arg5[%c0_214, %c0_215] : memref<128x128xbf16, #tpu.memory_space<vmem>>, vector<128x128xbf16>
    %cst_216 = arith.constant dense<0.000000e+00> : vector<8x128xf32>
    %736 = tpu.matmul %734, %735, %cst_216 {dimension_numbers = #tpu.dot_dimension_numbers<[1], [0], [0], [1], [0, 0, 1, 1], [], []>} : vector<8x128xbf16>, vector<128x128xbf16>, vector<8x128xf32> -> vector<8x128xf32>
    %737 = vector.extract_strided_slice %736 {offsets = [0, 0], sizes = [8, 16], strides = [1, 1]} : vector<8x128xf32> to vector<8x16xf32>
    %738 = arith.negf %737 : vector<8x16xf32>
    %739 = math.exp %738 : vector<8x16xf32>
    %cst_217 = arith.constant 1.000000e+00 : f32
    %740 = vector.broadcast %cst_217 : f32 to vector<8x16xf32>
    %741 = arith.addf %740, %739 : vector<8x16xf32>
    %742 = arith.divf %740, %741 : vector<8x16xf32>
    %743 = vector.extract_strided_slice %736 {offsets = [0, 16], sizes = [8, 16], strides = [1, 1]} : vector<8x128xf32> to vector<8x16xf32>
    %744 = arith.negf %743 : vector<8x16xf32>
    %745 = math.exp %744 : vector<8x16xf32>
    %cst_218 = arith.constant 1.000000e+00 : f32
    %746 = vector.broadcast %cst_218 : f32 to vector<8x16xf32>
    %747 = arith.addf %746, %745 : vector<8x16xf32>
    %748 = arith.divf %746, %747 : vector<8x16xf32>
    %749 = vector.extract_strided_slice %736 {offsets = [0, 32], sizes = [8, 16], strides = [1, 1]} : vector<8x128xf32> to vector<8x16xf32>
    %750 = math.tanh %749 : vector<8x16xf32>
    %751 = vector.extract_strided_slice %736 {offsets = [0, 48], sizes = [8, 16], strides = [1, 1]} : vector<8x128xf32> to vector<8x16xf32>
    %752 = arith.negf %751 : vector<8x16xf32>
    %753 = math.exp %752 : vector<8x16xf32>
    %cst_219 = arith.constant 1.000000e+00 : f32
    %754 = vector.broadcast %cst_219 : f32 to vector<8x16xf32>
    %755 = arith.addf %754, %753 : vector<8x16xf32>
    %756 = arith.divf %754, %755 : vector<8x16xf32>
    %757 = arith.mulf %748, %673 : vector<8x16xf32>
    %758 = arith.mulf %742, %750 : vector<8x16xf32>
    %759 = arith.addf %757, %758 : vector<8x16xf32>
    %760 = math.tanh %759 : vector<8x16xf32>
    %761 = arith.mulf %756, %760 : vector<8x16xf32>
    %c8_i32_220 = arith.constant 8 : i32
    %762 = arith.muli %c1_i32_195, %c8_i32_220 : i32
    %763 = tpu.assume_multiple %762, 8 : i32
    %cst_221 = arith.constant 0.000000e+00 : f32
    %764 = vector.broadcast %cst_221 : f32 to vector<8x112xf32>
    %765 = tpu.concatenate %761, %764 in 1 : vector<8x16xf32>, vector<8x112xf32> -> vector<8x128xf32>
    %766 = arith.addf %765, %19 : vector<8x128xf32>
    %767 = arith.index_cast %763 : i32 to index
    %c0_222 = arith.constant 0 : index
    %768 = vector.load %arg9[%767, %c0_222] : memref<64x128xf32, #tpu.memory_space<vmem>>, vector<8x128xf32>
    tpu.vector_store %arg9[%767, %c0_222], %766 {strides = array<i32>} : memref<64x128xf32, #tpu.memory_space<vmem>>, vector<8x128xf32>,
    %c2_i32_223 = arith.constant 2 : i32
    %c2_i32_224 = arith.constant 2 : i32
    %c0_i32_225 = arith.constant 0 : i32
    %769 = arith.cmpi eq, %c2_i32_224, %c0_i32_225 : i32
    %c1_i32_226 = arith.constant 1 : i32
    %770 = arith.select %769, %c1_i32_226, %c2_i32_224 : i32
    %771 = arith.remsi %c2_i32_223, %770 : i32
    %c0_i32_227 = arith.constant 0 : i32
    %772 = arith.cmpi ne, %771, %c0_i32_227 : i32
    %c0_i32_228 = arith.constant 0 : i32
    %773 = arith.cmpi slt, %771, %c0_i32_228 : i32
    %c0_i32_229 = arith.constant 0 : i32
    %774 = arith.cmpi slt, %770, %c0_i32_229 : i32
    %775 = arith.xori %773, %774 : i1
    %776 = arith.andi %775, %772 : i1
    %777 = arith.addi %771, %770 : i32
    %778 = arith.select %776, %777, %771 : i32
    %779 = arith.index_cast %778 : i32 to index
    %c0_230 = arith.constant 0 : index
    %c0_231 = arith.constant 0 : index
    %780 = vector.load %arg8[%779, %c0_230, %c0_231] : memref<2x8x128xf32, #tpu.memory_space<vmem>>, vector<1x8x128xf32>
    %781 = vector.shape_cast %780 : vector<1x8x128xf32> to vector<8x128xf32>
    %cst_232 = arith.constant 0.000000e+00 : f32
    %782 = vector.broadcast %cst_232 : f32 to vector<8x120xf32>
    %783 = tpu.concatenate %726, %782 in 1 : vector<8x8xf32>, vector<8x120xf32> -> vector<8x128xf32>
    %784 = arith.addf %781, %783 : vector<8x128xf32>
    %785 = arith.truncf %784 : vector<8x128xf32> to vector<8x128xbf16>
    %c0_233 = arith.constant 0 : index
    %c0_234 = arith.constant 0 : index
    %786 = vector.load %arg4[%c0_233, %c0_234] : memref<128x128xbf16, #tpu.memory_space<vmem>>, vector<128x128xbf16>
    %cst_235 = arith.constant dense<0.000000e+00> : vector<8x128xf32>
    %787 = tpu.matmul %785, %786, %cst_235 {dimension_numbers = #tpu.dot_dimension_numbers<[1], [0], [0], [1], [0, 0, 1, 1], [], []>} : vector<8x128xbf16>, vector<128x128xbf16>, vector<8x128xf32> -> vector<8x128xf32>
    %788 = vector.extract_strided_slice %787 {offsets = [0, 0], sizes = [8, 8], strides = [1, 1]} : vector<8x128xf32> to vector<8x8xf32>
    %789 = arith.negf %788 : vector<8x8xf32>
    %790 = math.exp %789 : vector<8x8xf32>
    %cst_236 = arith.constant 1.000000e+00 : f32
    %791 = vector.broadcast %cst_236 : f32 to vector<8x8xf32>
    %792 = arith.addf %791, %790 : vector<8x8xf32>
    %793 = arith.divf %791, %792 : vector<8x8xf32>
    %794 = vector.extract_strided_slice %787 {offsets = [0, 8], sizes = [8, 8], strides = [1, 1]} : vector<8x128xf32> to vector<8x8xf32>
    %795 = arith.negf %794 : vector<8x8xf32>
    %796 = math.exp %795 : vector<8x8xf32>
    %cst_237 = arith.constant 1.000000e+00 : f32
    %797 = vector.broadcast %cst_237 : f32 to vector<8x8xf32>
    %798 = arith.addf %797, %796 : vector<8x8xf32>
    %799 = arith.divf %797, %798 : vector<8x8xf32>
    %800 = vector.extract_strided_slice %787 {offsets = [0, 16], sizes = [8, 8], strides = [1, 1]} : vector<8x128xf32> to vector<8x8xf32>
    %801 = math.tanh %800 : vector<8x8xf32>
    %802 = vector.extract_strided_slice %787 {offsets = [0, 24], sizes = [8, 8], strides = [1, 1]} : vector<8x128xf32> to vector<8x8xf32>
    %803 = arith.negf %802 : vector<8x8xf32>
    %804 = math.exp %803 : vector<8x8xf32>
    %cst_238 = arith.constant 1.000000e+00 : f32
    %805 = vector.broadcast %cst_238 : f32 to vector<8x8xf32>
    %806 = arith.addf %805, %804 : vector<8x8xf32>
    %807 = arith.divf %805, %806 : vector<8x8xf32>
    %808 = arith.mulf %799, %724 : vector<8x8xf32>
    %809 = arith.mulf %793, %801 : vector<8x8xf32>
    %810 = arith.addf %808, %809 : vector<8x8xf32>
    %811 = math.tanh %810 : vector<8x8xf32>
    %812 = arith.mulf %807, %811 : vector<8x8xf32>
    %cst_239 = arith.constant 0.000000e+00 : f32
    %813 = vector.broadcast %cst_239 : f32 to vector<8x16xf32>
    %cst_240 = arith.constant 0.000000e+00 : f32
    %814 = vector.broadcast %cst_240 : f32 to vector<8x104xf32>
    %815 = tpu.concatenate %813, %812, %814 in 1 : vector<8x16xf32>, vector<8x8xf32>, vector<8x104xf32> -> vector<8x128xf32>
    %816 = arith.addf %815, %14 : vector<8x128xf32>
    %cst_241 = arith.constant 0.000000e+00 : f32
    %817 = vector.broadcast %cst_241 : f32 to vector<8x112xf32>
    %818 = tpu.concatenate %761, %817 in 1 : vector<8x16xf32>, vector<8x112xf32> -> vector<8x128xf32>
    %819 = arith.addf %816, %818 : vector<8x128xf32>
    %820 = arith.truncf %819 : vector<8x128xf32> to vector<8x128xbf16>
    %c0_242 = arith.constant 0 : index
    %c0_243 = arith.constant 0 : index
    %821 = vector.load %arg5[%c0_242, %c0_243] : memref<128x128xbf16, #tpu.memory_space<vmem>>, vector<128x128xbf16>
    %cst_244 = arith.constant dense<0.000000e+00> : vector<8x128xf32>
    %822 = tpu.matmul %820, %821, %cst_244 {dimension_numbers = #tpu.dot_dimension_numbers<[1], [0], [0], [1], [0, 0, 1, 1], [], []>} : vector<8x128xbf16>, vector<128x128xbf16>, vector<8x128xf32> -> vector<8x128xf32>
    %823 = vector.extract_strided_slice %822 {offsets = [0, 0], sizes = [8, 16], strides = [1, 1]} : vector<8x128xf32> to vector<8x16xf32>
    %824 = arith.negf %823 : vector<8x16xf32>
    %825 = math.exp %824 : vector<8x16xf32>
    %cst_245 = arith.constant 1.000000e+00 : f32
    %826 = vector.broadcast %cst_245 : f32 to vector<8x16xf32>
    %827 = arith.addf %826, %825 : vector<8x16xf32>
    %828 = arith.divf %826, %827 : vector<8x16xf32>
    %829 = vector.extract_strided_slice %822 {offsets = [0, 16], sizes = [8, 16], strides = [1, 1]} : vector<8x128xf32> to vector<8x16xf32>
    %830 = arith.negf %829 : vector<8x16xf32>
    %831 = math.exp %830 : vector<8x16xf32>
    %cst_246 = arith.constant 1.000000e+00 : f32
    %832 = vector.broadcast %cst_246 : f32 to vector<8x16xf32>
    %833 = arith.addf %832, %831 : vector<8x16xf32>
    %834 = arith.divf %832, %833 : vector<8x16xf32>
    %835 = vector.extract_strided_slice %822 {offsets = [0, 32], sizes = [8, 16], strides = [1, 1]} : vector<8x128xf32> to vector<8x16xf32>
    %836 = math.tanh %835 : vector<8x16xf32>
    %837 = vector.extract_strided_slice %822 {offsets = [0, 48], sizes = [8, 16], strides = [1, 1]} : vector<8x128xf32> to vector<8x16xf32>
    %838 = arith.negf %837 : vector<8x16xf32>
    %839 = math.exp %838 : vector<8x16xf32>
    %cst_247 = arith.constant 1.000000e+00 : f32
    %840 = vector.broadcast %cst_247 : f32 to vector<8x16xf32>
    %841 = arith.addf %840, %839 : vector<8x16xf32>
    %842 = arith.divf %840, %841 : vector<8x16xf32>
    %843 = arith.mulf %834, %759 : vector<8x16xf32>
    %844 = arith.mulf %828, %836 : vector<8x16xf32>
    %845 = arith.addf %843, %844 : vector<8x16xf32>
    %846 = math.tanh %845 : vector<8x16xf32>
    %847 = arith.mulf %842, %846 : vector<8x16xf32>
    %c8_i32_248 = arith.constant 8 : i32
    %848 = arith.muli %c2_i32_223, %c8_i32_248 : i32
    %849 = tpu.assume_multiple %848, 8 : i32
    %cst_249 = arith.constant 0.000000e+00 : f32
    %850 = vector.broadcast %cst_249 : f32 to vector<8x112xf32>
    %851 = tpu.concatenate %847, %850 in 1 : vector<8x16xf32>, vector<8x112xf32> -> vector<8x128xf32>
    %852 = arith.addf %851, %19 : vector<8x128xf32>
    %853 = arith.index_cast %849 : i32 to index
    %c0_250 = arith.constant 0 : index
    %854 = vector.load %arg9[%853, %c0_250] : memref<64x128xf32, #tpu.memory_space<vmem>>, vector<8x128xf32>
    tpu.vector_store %arg9[%853, %c0_250], %852 {strides = array<i32>} : memref<64x128xf32, #tpu.memory_space<vmem>>, vector<8x128xf32>,
    %c3_i32_251 = arith.constant 3 : i32
    %c2_i32_252 = arith.constant 2 : i32
    %c0_i32_253 = arith.constant 0 : i32
    %855 = arith.cmpi eq, %c2_i32_252, %c0_i32_253 : i32
    %c1_i32_254 = arith.constant 1 : i32
    %856 = arith.select %855, %c1_i32_254, %c2_i32_252 : i32
    %857 = arith.remsi %c3_i32_251, %856 : i32
    %c0_i32_255 = arith.constant 0 : i32
    %858 = arith.cmpi ne, %857, %c0_i32_255 : i32
    %c0_i32_256 = arith.constant 0 : i32
    %859 = arith.cmpi slt, %857, %c0_i32_256 : i32
    %c0_i32_257 = arith.constant 0 : i32
    %860 = arith.cmpi slt, %856, %c0_i32_257 : i32
    %861 = arith.xori %859, %860 : i1
    %862 = arith.andi %861, %858 : i1
    %863 = arith.addi %857, %856 : i32
    %864 = arith.select %862, %863, %857 : i32
    %865 = arith.index_cast %864 : i32 to index
    %c0_258 = arith.constant 0 : index
    %c0_259 = arith.constant 0 : index
    %866 = vector.load %arg8[%865, %c0_258, %c0_259] : memref<2x8x128xf32, #tpu.memory_space<vmem>>, vector<1x8x128xf32>
    %867 = vector.shape_cast %866 : vector<1x8x128xf32> to vector<8x128xf32>
    %cst_260 = arith.constant 0.000000e+00 : f32
    %868 = vector.broadcast %cst_260 : f32 to vector<8x120xf32>
    %869 = tpu.concatenate %812, %868 in 1 : vector<8x8xf32>, vector<8x120xf32> -> vector<8x128xf32>
    %870 = arith.addf %867, %869 : vector<8x128xf32>
    %871 = arith.truncf %870 : vector<8x128xf32> to vector<8x128xbf16>
    %c0_261 = arith.constant 0 : index
    %c0_262 = arith.constant 0 : index
    %872 = vector.load %arg4[%c0_261, %c0_262] : memref<128x128xbf16, #tpu.memory_space<vmem>>, vector<128x128xbf16>
    %cst_263 = arith.constant dense<0.000000e+00> : vector<8x128xf32>
    %873 = tpu.matmul %871, %872, %cst_263 {dimension_numbers = #tpu.dot_dimension_numbers<[1], [0], [0], [1], [0, 0, 1, 1], [], []>} : vector<8x128xbf16>, vector<128x128xbf16>, vector<8x128xf32> -> vector<8x128xf32>
    %874 = vector.extract_strided_slice %873 {offsets = [0, 0], sizes = [8, 8], strides = [1, 1]} : vector<8x128xf32> to vector<8x8xf32>
    %875 = arith.negf %874 : vector<8x8xf32>
    %876 = math.exp %875 : vector<8x8xf32>
    %cst_264 = arith.constant 1.000000e+00 : f32
    %877 = vector.broadcast %cst_264 : f32 to vector<8x8xf32>
    %878 = arith.addf %877, %876 : vector<8x8xf32>
    %879 = arith.divf %877, %878 : vector<8x8xf32>
    %880 = vector.extract_strided_slice %873 {offsets = [0, 8], sizes = [8, 8], strides = [1, 1]} : vector<8x128xf32> to vector<8x8xf32>
    %881 = arith.negf %880 : vector<8x8xf32>
    %882 = math.exp %881 : vector<8x8xf32>
    %cst_265 = arith.constant 1.000000e+00 : f32
    %883 = vector.broadcast %cst_265 : f32 to vector<8x8xf32>
    %884 = arith.addf %883, %882 : vector<8x8xf32>
    %885 = arith.divf %883, %884 : vector<8x8xf32>
    %886 = vector.extract_strided_slice %873 {offsets = [0, 16], sizes = [8, 8], strides = [1, 1]} : vector<8x128xf32> to vector<8x8xf32>
    %887 = math.tanh %886 : vector<8x8xf32>
    %888 = vector.extract_strided_slice %873 {offsets = [0, 24], sizes = [8, 8], strides = [1, 1]} : vector<8x128xf32> to vector<8x8xf32>
    %889 = arith.negf %888 : vector<8x8xf32>
    %890 = math.exp %889 : vector<8x8xf32>
    %cst_266 = arith.constant 1.000000e+00 : f32
    %891 = vector.broadcast %cst_266 : f32 to vector<8x8xf32>
    %892 = arith.addf %891, %890 : vector<8x8xf32>
    %893 = arith.divf %891, %892 : vector<8x8xf32>
    %894 = arith.mulf %885, %810 : vector<8x8xf32>
    %895 = arith.mulf %879, %887 : vector<8x8xf32>
    %896 = arith.addf %894, %895 : vector<8x8xf32>
    %897 = math.tanh %896 : vector<8x8xf32>
    %898 = arith.mulf %893, %897 : vector<8x8xf32>
    %cst_267 = arith.constant 0.000000e+00 : f32
    %899 = vector.broadcast %cst_267 : f32 to vector<8x16xf32>
    %cst_268 = arith.constant 0.000000e+00 : f32
    %900 = vector.broadcast %cst_268 : f32 to vector<8x104xf32>
    %901 = tpu.concatenate %899, %898, %900 in 1 : vector<8x16xf32>, vector<8x8xf32>, vector<8x104xf32> -> vector<8x128xf32>
    %902 = arith.addf %901, %14 : vector<8x128xf32>
    %cst_269 = arith.constant 0.000000e+00 : f32
    %903 = vector.broadcast %cst_269 : f32 to vector<8x112xf32>
    %904 = tpu.concatenate %847, %903 in 1 : vector<8x16xf32>, vector<8x112xf32> -> vector<8x128xf32>
    %905 = arith.addf %902, %904 : vector<8x128xf32>
    %906 = arith.truncf %905 : vector<8x128xf32> to vector<8x128xbf16>
    %c0_270 = arith.constant 0 : index
    %c0_271 = arith.constant 0 : index
    %907 = vector.load %arg5[%c0_270, %c0_271] : memref<128x128xbf16, #tpu.memory_space<vmem>>, vector<128x128xbf16>
    %cst_272 = arith.constant dense<0.000000e+00> : vector<8x128xf32>
    %908 = tpu.matmul %906, %907, %cst_272 {dimension_numbers = #tpu.dot_dimension_numbers<[1], [0], [0], [1], [0, 0, 1, 1], [], []>} : vector<8x128xbf16>, vector<128x128xbf16>, vector<8x128xf32> -> vector<8x128xf32>
    %909 = vector.extract_strided_slice %908 {offsets = [0, 0], sizes = [8, 16], strides = [1, 1]} : vector<8x128xf32> to vector<8x16xf32>
    %910 = arith.negf %909 : vector<8x16xf32>
    %911 = math.exp %910 : vector<8x16xf32>
    %cst_273 = arith.constant 1.000000e+00 : f32
    %912 = vector.broadcast %cst_273 : f32 to vector<8x16xf32>
    %913 = arith.addf %912, %911 : vector<8x16xf32>
    %914 = arith.divf %912, %913 : vector<8x16xf32>
    %915 = vector.extract_strided_slice %908 {offsets = [0, 16], sizes = [8, 16], strides = [1, 1]} : vector<8x128xf32> to vector<8x16xf32>
    %916 = arith.negf %915 : vector<8x16xf32>
    %917 = math.exp %916 : vector<8x16xf32>
    %cst_274 = arith.constant 1.000000e+00 : f32
    %918 = vector.broadcast %cst_274 : f32 to vector<8x16xf32>
    %919 = arith.addf %918, %917 : vector<8x16xf32>
    %920 = arith.divf %918, %919 : vector<8x16xf32>
    %921 = vector.extract_strided_slice %908 {offsets = [0, 32], sizes = [8, 16], strides = [1, 1]} : vector<8x128xf32> to vector<8x16xf32>
    %922 = math.tanh %921 : vector<8x16xf32>
    %923 = vector.extract_strided_slice %908 {offsets = [0, 48], sizes = [8, 16], strides = [1, 1]} : vector<8x128xf32> to vector<8x16xf32>
    %924 = arith.negf %923 : vector<8x16xf32>
    %925 = math.exp %924 : vector<8x16xf32>
    %cst_275 = arith.constant 1.000000e+00 : f32
    %926 = vector.broadcast %cst_275 : f32 to vector<8x16xf32>
    %927 = arith.addf %926, %925 : vector<8x16xf32>
    %928 = arith.divf %926, %927 : vector<8x16xf32>
    %929 = arith.mulf %920, %845 : vector<8x16xf32>
    %930 = arith.mulf %914, %922 : vector<8x16xf32>
    %931 = arith.addf %929, %930 : vector<8x16xf32>
    %932 = math.tanh %931 : vector<8x16xf32>
    %933 = arith.mulf %928, %932 : vector<8x16xf32>
    %c8_i32_276 = arith.constant 8 : i32
    %934 = arith.muli %c3_i32_251, %c8_i32_276 : i32
    %935 = tpu.assume_multiple %934, 8 : i32
    %cst_277 = arith.constant 0.000000e+00 : f32
    %936 = vector.broadcast %cst_277 : f32 to vector<8x112xf32>
    %937 = tpu.concatenate %933, %936 in 1 : vector<8x16xf32>, vector<8x112xf32> -> vector<8x128xf32>
    %938 = arith.addf %937, %19 : vector<8x128xf32>
    %939 = arith.index_cast %935 : i32 to index
    %c0_278 = arith.constant 0 : index
    %940 = vector.load %arg9[%939, %c0_278] : memref<64x128xf32, #tpu.memory_space<vmem>>, vector<8x128xf32>
    tpu.vector_store %arg9[%939, %c0_278], %938 {strides = array<i32>} : memref<64x128xf32, #tpu.memory_space<vmem>>, vector<8x128xf32>,
    %c4_i32_279 = arith.constant 4 : i32
    %c2_i32_280 = arith.constant 2 : i32
    %c0_i32_281 = arith.constant 0 : i32
    %941 = arith.cmpi eq, %c2_i32_280, %c0_i32_281 : i32
    %c1_i32_282 = arith.constant 1 : i32
    %942 = arith.select %941, %c1_i32_282, %c2_i32_280 : i32
    %943 = arith.remsi %c4_i32_279, %942 : i32
    %c0_i32_283 = arith.constant 0 : i32
    %944 = arith.cmpi ne, %943, %c0_i32_283 : i32
    %c0_i32_284 = arith.constant 0 : i32
    %945 = arith.cmpi slt, %943, %c0_i32_284 : i32
    %c0_i32_285 = arith.constant 0 : i32
    %946 = arith.cmpi slt, %942, %c0_i32_285 : i32
    %947 = arith.xori %945, %946 : i1
    %948 = arith.andi %947, %944 : i1
    %949 = arith.addi %943, %942 : i32
    %950 = arith.select %948, %949, %943 : i32
    %951 = arith.index_cast %950 : i32 to index
    %c0_286 = arith.constant 0 : index
    %c0_287 = arith.constant 0 : index
    %952 = vector.load %arg8[%951, %c0_286, %c0_287] : memref<2x8x128xf32, #tpu.memory_space<vmem>>, vector<1x8x128xf32>
    %953 = vector.shape_cast %952 : vector<1x8x128xf32> to vector<8x128xf32>
    %cst_288 = arith.constant 0.000000e+00 : f32
    %954 = vector.broadcast %cst_288 : f32 to vector<8x120xf32>
    %955 = tpu.concatenate %898, %954 in 1 : vector<8x8xf32>, vector<8x120xf32> -> vector<8x128xf32>
    %956 = arith.addf %953, %955 : vector<8x128xf32>
    %957 = arith.truncf %956 : vector<8x128xf32> to vector<8x128xbf16>
    %c0_289 = arith.constant 0 : index
    %c0_290 = arith.constant 0 : index
    %958 = vector.load %arg4[%c0_289, %c0_290] : memref<128x128xbf16, #tpu.memory_space<vmem>>, vector<128x128xbf16>
    %cst_291 = arith.constant dense<0.000000e+00> : vector<8x128xf32>
    %959 = tpu.matmul %957, %958, %cst_291 {dimension_numbers = #tpu.dot_dimension_numbers<[1], [0], [0], [1], [0, 0, 1, 1], [], []>} : vector<8x128xbf16>, vector<128x128xbf16>, vector<8x128xf32> -> vector<8x128xf32>
    %960 = vector.extract_strided_slice %959 {offsets = [0, 0], sizes = [8, 8], strides = [1, 1]} : vector<8x128xf32> to vector<8x8xf32>
    %961 = arith.negf %960 : vector<8x8xf32>
    %962 = math.exp %961 : vector<8x8xf32>
    %cst_292 = arith.constant 1.000000e+00 : f32
    %963 = vector.broadcast %cst_292 : f32 to vector<8x8xf32>
    %964 = arith.addf %963, %962 : vector<8x8xf32>
    %965 = arith.divf %963, %964 : vector<8x8xf32>
    %966 = vector.extract_strided_slice %959 {offsets = [0, 8], sizes = [8, 8], strides = [1, 1]} : vector<8x128xf32> to vector<8x8xf32>
    %967 = arith.negf %966 : vector<8x8xf32>
    %968 = math.exp %967 : vector<8x8xf32>
    %cst_293 = arith.constant 1.000000e+00 : f32
    %969 = vector.broadcast %cst_293 : f32 to vector<8x8xf32>
    %970 = arith.addf %969, %968 : vector<8x8xf32>
    %971 = arith.divf %969, %970 : vector<8x8xf32>
    %972 = vector.extract_strided_slice %959 {offsets = [0, 16], sizes = [8, 8], strides = [1, 1]} : vector<8x128xf32> to vector<8x8xf32>
    %973 = math.tanh %972 : vector<8x8xf32>
    %974 = vector.extract_strided_slice %959 {offsets = [0, 24], sizes = [8, 8], strides = [1, 1]} : vector<8x128xf32> to vector<8x8xf32>
    %975 = arith.negf %974 : vector<8x8xf32>
    %976 = math.exp %975 : vector<8x8xf32>
    %cst_294 = arith.constant 1.000000e+00 : f32
    %977 = vector.broadcast %cst_294 : f32 to vector<8x8xf32>
    %978 = arith.addf %977, %976 : vector<8x8xf32>
    %979 = arith.divf %977, %978 : vector<8x8xf32>
    %980 = arith.mulf %971, %896 : vector<8x8xf32>
    %981 = arith.mulf %965, %973 : vector<8x8xf32>
    %982 = arith.addf %980, %981 : vector<8x8xf32>
    %983 = math.tanh %982 : vector<8x8xf32>
    %984 = arith.mulf %979, %983 : vector<8x8xf32>
    %cst_295 = arith.constant 0.000000e+00 : f32
    %985 = vector.broadcast %cst_295 : f32 to vector<8x16xf32>
    %cst_296 = arith.constant 0.000000e+00 : f32
    %986 = vector.broadcast %cst_296 : f32 to vector<8x104xf32>
    %987 = tpu.concatenate %985, %984, %986 in 1 : vector<8x16xf32>, vector<8x8xf32>, vector<8x104xf32> -> vector<8x128xf32>
    %988 = arith.addf %987, %14 : vector<8x128xf32>
    %cst_297 = arith.constant 0.000000e+00 : f32
    %989 = vector.broadcast %cst_297 : f32 to vector<8x112xf32>
    %990 = tpu.concatenate %933, %989 in 1 : vector<8x16xf32>, vector<8x112xf32> -> vector<8x128xf32>
    %991 = arith.addf %988, %990 : vector<8x128xf32>
    %992 = arith.truncf %991 : vector<8x128xf32> to vector<8x128xbf16>
    %c0_298 = arith.constant 0 : index
    %c0_299 = arith.constant 0 : index
    %993 = vector.load %arg5[%c0_298, %c0_299] : memref<128x128xbf16, #tpu.memory_space<vmem>>, vector<128x128xbf16>
    %cst_300 = arith.constant dense<0.000000e+00> : vector<8x128xf32>
    %994 = tpu.matmul %992, %993, %cst_300 {dimension_numbers = #tpu.dot_dimension_numbers<[1], [0], [0], [1], [0, 0, 1, 1], [], []>} : vector<8x128xbf16>, vector<128x128xbf16>, vector<8x128xf32> -> vector<8x128xf32>
    %995 = vector.extract_strided_slice %994 {offsets = [0, 0], sizes = [8, 16], strides = [1, 1]} : vector<8x128xf32> to vector<8x16xf32>
    %996 = arith.negf %995 : vector<8x16xf32>
    %997 = math.exp %996 : vector<8x16xf32>
    %cst_301 = arith.constant 1.000000e+00 : f32
    %998 = vector.broadcast %cst_301 : f32 to vector<8x16xf32>
    %999 = arith.addf %998, %997 : vector<8x16xf32>
    %1000 = arith.divf %998, %999 : vector<8x16xf32>
    %1001 = vector.extract_strided_slice %994 {offsets = [0, 16], sizes = [8, 16], strides = [1, 1]} : vector<8x128xf32> to vector<8x16xf32>
    %1002 = arith.negf %1001 : vector<8x16xf32>
    %1003 = math.exp %1002 : vector<8x16xf32>
    %cst_302 = arith.constant 1.000000e+00 : f32
    %1004 = vector.broadcast %cst_302 : f32 to vector<8x16xf32>
    %1005 = arith.addf %1004, %1003 : vector<8x16xf32>
    %1006 = arith.divf %1004, %1005 : vector<8x16xf32>
    %1007 = vector.extract_strided_slice %994 {offsets = [0, 32], sizes = [8, 16], strides = [1, 1]} : vector<8x128xf32> to vector<8x16xf32>
    %1008 = math.tanh %1007 : vector<8x16xf32>
    %1009 = vector.extract_strided_slice %994 {offsets = [0, 48], sizes = [8, 16], strides = [1, 1]} : vector<8x128xf32> to vector<8x16xf32>
    %1010 = arith.negf %1009 : vector<8x16xf32>
    %1011 = math.exp %1010 : vector<8x16xf32>
    %cst_303 = arith.constant 1.000000e+00 : f32
    %1012 = vector.broadcast %cst_303 : f32 to vector<8x16xf32>
    %1013 = arith.addf %1012, %1011 : vector<8x16xf32>
    %1014 = arith.divf %1012, %1013 : vector<8x16xf32>
    %1015 = arith.mulf %1006, %931 : vector<8x16xf32>
    %1016 = arith.mulf %1000, %1008 : vector<8x16xf32>
    %1017 = arith.addf %1015, %1016 : vector<8x16xf32>
    %1018 = math.tanh %1017 : vector<8x16xf32>
    %1019 = arith.mulf %1014, %1018 : vector<8x16xf32>
    %c8_i32_304 = arith.constant 8 : i32
    %1020 = arith.muli %c4_i32_279, %c8_i32_304 : i32
    %1021 = tpu.assume_multiple %1020, 8 : i32
    %cst_305 = arith.constant 0.000000e+00 : f32
    %1022 = vector.broadcast %cst_305 : f32 to vector<8x112xf32>
    %1023 = tpu.concatenate %1019, %1022 in 1 : vector<8x16xf32>, vector<8x112xf32> -> vector<8x128xf32>
    %1024 = arith.addf %1023, %19 : vector<8x128xf32>
    %1025 = arith.index_cast %1021 : i32 to index
    %c0_306 = arith.constant 0 : index
    %1026 = vector.load %arg9[%1025, %c0_306] : memref<64x128xf32, #tpu.memory_space<vmem>>, vector<8x128xf32>
    tpu.vector_store %arg9[%1025, %c0_306], %1024 {strides = array<i32>} : memref<64x128xf32, #tpu.memory_space<vmem>>, vector<8x128xf32>,
    %c5_i32_307 = arith.constant 5 : i32
    %c2_i32_308 = arith.constant 2 : i32
    %c0_i32_309 = arith.constant 0 : i32
    %1027 = arith.cmpi eq, %c2_i32_308, %c0_i32_309 : i32
    %c1_i32_310 = arith.constant 1 : i32
    %1028 = arith.select %1027, %c1_i32_310, %c2_i32_308 : i32
    %1029 = arith.remsi %c5_i32_307, %1028 : i32
    %c0_i32_311 = arith.constant 0 : i32
    %1030 = arith.cmpi ne, %1029, %c0_i32_311 : i32
    %c0_i32_312 = arith.constant 0 : i32
    %1031 = arith.cmpi slt, %1029, %c0_i32_312 : i32
    %c0_i32_313 = arith.constant 0 : i32
    %1032 = arith.cmpi slt, %1028, %c0_i32_313 : i32
    %1033 = arith.xori %1031, %1032 : i1
    %1034 = arith.andi %1033, %1030 : i1
    %1035 = arith.addi %1029, %1028 : i32
    %1036 = arith.select %1034, %1035, %1029 : i32
    %1037 = arith.index_cast %1036 : i32 to index
    %c0_314 = arith.constant 0 : index
    %c0_315 = arith.constant 0 : index
    %1038 = vector.load %arg8[%1037, %c0_314, %c0_315] : memref<2x8x128xf32, #tpu.memory_space<vmem>>, vector<1x8x128xf32>
    %1039 = vector.shape_cast %1038 : vector<1x8x128xf32> to vector<8x128xf32>
    %cst_316 = arith.constant 0.000000e+00 : f32
    %1040 = vector.broadcast %cst_316 : f32 to vector<8x120xf32>
    %1041 = tpu.concatenate %984, %1040 in 1 : vector<8x8xf32>, vector<8x120xf32> -> vector<8x128xf32>
    %1042 = arith.addf %1039, %1041 : vector<8x128xf32>
    %1043 = arith.truncf %1042 : vector<8x128xf32> to vector<8x128xbf16>
    %c0_317 = arith.constant 0 : index
    %c0_318 = arith.constant 0 : index
    %1044 = vector.load %arg4[%c0_317, %c0_318] : memref<128x128xbf16, #tpu.memory_space<vmem>>, vector<128x128xbf16>
    %cst_319 = arith.constant dense<0.000000e+00> : vector<8x128xf32>
    %1045 = tpu.matmul %1043, %1044, %cst_319 {dimension_numbers = #tpu.dot_dimension_numbers<[1], [0], [0], [1], [0, 0, 1, 1], [], []>} : vector<8x128xbf16>, vector<128x128xbf16>, vector<8x128xf32> -> vector<8x128xf32>
    %1046 = vector.extract_strided_slice %1045 {offsets = [0, 0], sizes = [8, 8], strides = [1, 1]} : vector<8x128xf32> to vector<8x8xf32>
    %1047 = arith.negf %1046 : vector<8x8xf32>
    %1048 = math.exp %1047 : vector<8x8xf32>
    %cst_320 = arith.constant 1.000000e+00 : f32
    %1049 = vector.broadcast %cst_320 : f32 to vector<8x8xf32>
    %1050 = arith.addf %1049, %1048 : vector<8x8xf32>
    %1051 = arith.divf %1049, %1050 : vector<8x8xf32>
    %1052 = vector.extract_strided_slice %1045 {offsets = [0, 8], sizes = [8, 8], strides = [1, 1]} : vector<8x128xf32> to vector<8x8xf32>
    %1053 = arith.negf %1052 : vector<8x8xf32>
    %1054 = math.exp %1053 : vector<8x8xf32>
    %cst_321 = arith.constant 1.000000e+00 : f32
    %1055 = vector.broadcast %cst_321 : f32 to vector<8x8xf32>
    %1056 = arith.addf %1055, %1054 : vector<8x8xf32>
    %1057 = arith.divf %1055, %1056 : vector<8x8xf32>
    %1058 = vector.extract_strided_slice %1045 {offsets = [0, 16], sizes = [8, 8], strides = [1, 1]} : vector<8x128xf32> to vector<8x8xf32>
    %1059 = math.tanh %1058 : vector<8x8xf32>
    %1060 = vector.extract_strided_slice %1045 {offsets = [0, 24], sizes = [8, 8], strides = [1, 1]} : vector<8x128xf32> to vector<8x8xf32>
    %1061 = arith.negf %1060 : vector<8x8xf32>
    %1062 = math.exp %1061 : vector<8x8xf32>
    %cst_322 = arith.constant 1.000000e+00 : f32
    %1063 = vector.broadcast %cst_322 : f32 to vector<8x8xf32>
    %1064 = arith.addf %1063, %1062 : vector<8x8xf32>
    %1065 = arith.divf %1063, %1064 : vector<8x8xf32>
    %1066 = arith.mulf %1057, %982 : vector<8x8xf32>
    %1067 = arith.mulf %1051, %1059 : vector<8x8xf32>
    %1068 = arith.addf %1066, %1067 : vector<8x8xf32>
    %1069 = math.tanh %1068 : vector<8x8xf32>
    %1070 = arith.mulf %1065, %1069 : vector<8x8xf32>
    %cst_323 = arith.constant 0.000000e+00 : f32
    %1071 = vector.broadcast %cst_323 : f32 to vector<8x16xf32>
    %cst_324 = arith.constant 0.000000e+00 : f32
    %1072 = vector.broadcast %cst_324 : f32 to vector<8x104xf32>
    %1073 = tpu.concatenate %1071, %1070, %1072 in 1 : vector<8x16xf32>, vector<8x8xf32>, vector<8x104xf32> -> vector<8x128xf32>
    %1074 = arith.addf %1073, %14 : vector<8x128xf32>
    %cst_325 = arith.constant 0.000000e+00 : f32
    %1075 = vector.broadcast %cst_325 : f32 to vector<8x112xf32>
    %1076 = tpu.concatenate %1019, %1075 in 1 : vector<8x16xf32>, vector<8x112xf32> -> vector<8x128xf32>
    %1077 = arith.addf %1074, %1076 : vector<8x128xf32>
    %1078 = arith.truncf %1077 : vector<8x128xf32> to vector<8x128xbf16>
    %c0_326 = arith.constant 0 : index
    %c0_327 = arith.constant 0 : index
    %1079 = vector.load %arg5[%c0_326, %c0_327] : memref<128x128xbf16, #tpu.memory_space<vmem>>, vector<128x128xbf16>
    %cst_328 = arith.constant dense<0.000000e+00> : vector<8x128xf32>
    %1080 = tpu.matmul %1078, %1079, %cst_328 {dimension_numbers = #tpu.dot_dimension_numbers<[1], [0], [0], [1], [0, 0, 1, 1], [], []>} : vector<8x128xbf16>, vector<128x128xbf16>, vector<8x128xf32> -> vector<8x128xf32>
    %1081 = vector.extract_strided_slice %1080 {offsets = [0, 0], sizes = [8, 16], strides = [1, 1]} : vector<8x128xf32> to vector<8x16xf32>
    %1082 = arith.negf %1081 : vector<8x16xf32>
    %1083 = math.exp %1082 : vector<8x16xf32>
    %cst_329 = arith.constant 1.000000e+00 : f32
    %1084 = vector.broadcast %cst_329 : f32 to vector<8x16xf32>
    %1085 = arith.addf %1084, %1083 : vector<8x16xf32>
    %1086 = arith.divf %1084, %1085 : vector<8x16xf32>
    %1087 = vector.extract_strided_slice %1080 {offsets = [0, 16], sizes = [8, 16], strides = [1, 1]} : vector<8x128xf32> to vector<8x16xf32>
    %1088 = arith.negf %1087 : vector<8x16xf32>
    %1089 = math.exp %1088 : vector<8x16xf32>
    %cst_330 = arith.constant 1.000000e+00 : f32
    %1090 = vector.broadcast %cst_330 : f32 to vector<8x16xf32>
    %1091 = arith.addf %1090, %1089 : vector<8x16xf32>
    %1092 = arith.divf %1090, %1091 : vector<8x16xf32>
    %1093 = vector.extract_strided_slice %1080 {offsets = [0, 32], sizes = [8, 16], strides = [1, 1]} : vector<8x128xf32> to vector<8x16xf32>
    %1094 = math.tanh %1093 : vector<8x16xf32>
    %1095 = vector.extract_strided_slice %1080 {offsets = [0, 48], sizes = [8, 16], strides = [1, 1]} : vector<8x128xf32> to vector<8x16xf32>
    %1096 = arith.negf %1095 : vector<8x16xf32>
    %1097 = math.exp %1096 : vector<8x16xf32>
    %cst_331 = arith.constant 1.000000e+00 : f32
    %1098 = vector.broadcast %cst_331 : f32 to vector<8x16xf32>
    %1099 = arith.addf %1098, %1097 : vector<8x16xf32>
    %1100 = arith.divf %1098, %1099 : vector<8x16xf32>
    %1101 = arith.mulf %1092, %1017 : vector<8x16xf32>
    %1102 = arith.mulf %1086, %1094 : vector<8x16xf32>
    %1103 = arith.addf %1101, %1102 : vector<8x16xf32>
    %1104 = math.tanh %1103 : vector<8x16xf32>
    %1105 = arith.mulf %1100, %1104 : vector<8x16xf32>
    %c8_i32_332 = arith.constant 8 : i32
    %1106 = arith.muli %c5_i32_307, %c8_i32_332 : i32
    %1107 = tpu.assume_multiple %1106, 8 : i32
    %cst_333 = arith.constant 0.000000e+00 : f32
    %1108 = vector.broadcast %cst_333 : f32 to vector<8x112xf32>
    %1109 = tpu.concatenate %1105, %1108 in 1 : vector<8x16xf32>, vector<8x112xf32> -> vector<8x128xf32>
    %1110 = arith.addf %1109, %19 : vector<8x128xf32>
    %1111 = arith.index_cast %1107 : i32 to index
    %c0_334 = arith.constant 0 : index
    %1112 = vector.load %arg9[%1111, %c0_334] : memref<64x128xf32, #tpu.memory_space<vmem>>, vector<8x128xf32>
    tpu.vector_store %arg9[%1111, %c0_334], %1110 {strides = array<i32>} : memref<64x128xf32, #tpu.memory_space<vmem>>, vector<8x128xf32>,
    %c6_i32_335 = arith.constant 6 : i32
    %c2_i32_336 = arith.constant 2 : i32
    %c0_i32_337 = arith.constant 0 : i32
    %1113 = arith.cmpi eq, %c2_i32_336, %c0_i32_337 : i32
    %c1_i32_338 = arith.constant 1 : i32
    %1114 = arith.select %1113, %c1_i32_338, %c2_i32_336 : i32
    %1115 = arith.remsi %c6_i32_335, %1114 : i32
    %c0_i32_339 = arith.constant 0 : i32
    %1116 = arith.cmpi ne, %1115, %c0_i32_339 : i32
    %c0_i32_340 = arith.constant 0 : i32
    %1117 = arith.cmpi slt, %1115, %c0_i32_340 : i32
    %c0_i32_341 = arith.constant 0 : i32
    %1118 = arith.cmpi slt, %1114, %c0_i32_341 : i32
    %1119 = arith.xori %1117, %1118 : i1
    %1120 = arith.andi %1119, %1116 : i1
    %1121 = arith.addi %1115, %1114 : i32
    %1122 = arith.select %1120, %1121, %1115 : i32
    %1123 = arith.index_cast %1122 : i32 to index
    %c0_342 = arith.constant 0 : index
    %c0_343 = arith.constant 0 : index
    %1124 = vector.load %arg8[%1123, %c0_342, %c0_343] : memref<2x8x128xf32, #tpu.memory_space<vmem>>, vector<1x8x128xf32>
    %1125 = vector.shape_cast %1124 : vector<1x8x128xf32> to vector<8x128xf32>
    %cst_344 = arith.constant 0.000000e+00 : f32
    %1126 = vector.broadcast %cst_344 : f32 to vector<8x120xf32>
    %1127 = tpu.concatenate %1070, %1126 in 1 : vector<8x8xf32>, vector<8x120xf32> -> vector<8x128xf32>
    %1128 = arith.addf %1125, %1127 : vector<8x128xf32>
    %1129 = arith.truncf %1128 : vector<8x128xf32> to vector<8x128xbf16>
    %c0_345 = arith.constant 0 : index
    %c0_346 = arith.constant 0 : index
    %1130 = vector.load %arg4[%c0_345, %c0_346] : memref<128x128xbf16, #tpu.memory_space<vmem>>, vector<128x128xbf16>
    %cst_347 = arith.constant dense<0.000000e+00> : vector<8x128xf32>
    %1131 = tpu.matmul %1129, %1130, %cst_347 {dimension_numbers = #tpu.dot_dimension_numbers<[1], [0], [0], [1], [0, 0, 1, 1], [], []>} : vector<8x128xbf16>, vector<128x128xbf16>, vector<8x128xf32> -> vector<8x128xf32>
    %1132 = vector.extract_strided_slice %1131 {offsets = [0, 0], sizes = [8, 8], strides = [1, 1]} : vector<8x128xf32> to vector<8x8xf32>
    %1133 = arith.negf %1132 : vector<8x8xf32>
    %1134 = math.exp %1133 : vector<8x8xf32>
    %cst_348 = arith.constant 1.000000e+00 : f32
    %1135 = vector.broadcast %cst_348 : f32 to vector<8x8xf32>
    %1136 = arith.addf %1135, %1134 : vector<8x8xf32>
    %1137 = arith.divf %1135, %1136 : vector<8x8xf32>
    %1138 = vector.extract_strided_slice %1131 {offsets = [0, 8], sizes = [8, 8], strides = [1, 1]} : vector<8x128xf32> to vector<8x8xf32>
    %1139 = arith.negf %1138 : vector<8x8xf32>
    %1140 = math.exp %1139 : vector<8x8xf32>
    %cst_349 = arith.constant 1.000000e+00 : f32
    %1141 = vector.broadcast %cst_349 : f32 to vector<8x8xf32>
    %1142 = arith.addf %1141, %1140 : vector<8x8xf32>
    %1143 = arith.divf %1141, %1142 : vector<8x8xf32>
    %1144 = vector.extract_strided_slice %1131 {offsets = [0, 16], sizes = [8, 8], strides = [1, 1]} : vector<8x128xf32> to vector<8x8xf32>
    %1145 = math.tanh %1144 : vector<8x8xf32>
    %1146 = vector.extract_strided_slice %1131 {offsets = [0, 24], sizes = [8, 8], strides = [1, 1]} : vector<8x128xf32> to vector<8x8xf32>
    %1147 = arith.negf %1146 : vector<8x8xf32>
    %1148 = math.exp %1147 : vector<8x8xf32>
    %cst_350 = arith.constant 1.000000e+00 : f32
    %1149 = vector.broadcast %cst_350 : f32 to vector<8x8xf32>
    %1150 = arith.addf %1149, %1148 : vector<8x8xf32>
    %1151 = arith.divf %1149, %1150 : vector<8x8xf32>
    %1152 = arith.mulf %1143, %1068 : vector<8x8xf32>
    %1153 = arith.mulf %1137, %1145 : vector<8x8xf32>
    %1154 = arith.addf %1152, %1153 : vector<8x8xf32>
    %1155 = math.tanh %1154 : vector<8x8xf32>
    %1156 = arith.mulf %1151, %1155 : vector<8x8xf32>
    %cst_351 = arith.constant 0.000000e+00 : f32
    %1157 = vector.broadcast %cst_351 : f32 to vector<8x16xf32>
    %cst_352 = arith.constant 0.000000e+00 : f32
    %1158 = vector.broadcast %cst_352 : f32 to vector<8x104xf32>
    %1159 = tpu.concatenate %1157, %1156, %1158 in 1 : vector<8x16xf32>, vector<8x8xf32>, vector<8x104xf32> -> vector<8x128xf32>
    %1160 = arith.addf %1159, %14 : vector<8x128xf32>
    %cst_353 = arith.constant 0.000000e+00 : f32
    %1161 = vector.broadcast %cst_353 : f32 to vector<8x112xf32>
    %1162 = tpu.concatenate %1105, %1161 in 1 : vector<8x16xf32>, vector<8x112xf32> -> vector<8x128xf32>
    %1163 = arith.addf %1160, %1162 : vector<8x128xf32>
    %1164 = arith.truncf %1163 : vector<8x128xf32> to vector<8x128xbf16>
    %c0_354 = arith.constant 0 : index
    %c0_355 = arith.constant 0 : index
    %1165 = vector.load %arg5[%c0_354, %c0_355] : memref<128x128xbf16, #tpu.memory_space<vmem>>, vector<128x128xbf16>
    %cst_356 = arith.constant dense<0.000000e+00> : vector<8x128xf32>
    %1166 = tpu.matmul %1164, %1165, %cst_356 {dimension_numbers = #tpu.dot_dimension_numbers<[1], [0], [0], [1], [0, 0, 1, 1], [], []>} : vector<8x128xbf16>, vector<128x128xbf16>, vector<8x128xf32> -> vector<8x128xf32>
    %1167 = vector.extract_strided_slice %1166 {offsets = [0, 0], sizes = [8, 16], strides = [1, 1]} : vector<8x128xf32> to vector<8x16xf32>
    %1168 = arith.negf %1167 : vector<8x16xf32>
    %1169 = math.exp %1168 : vector<8x16xf32>
    %cst_357 = arith.constant 1.000000e+00 : f32
    %1170 = vector.broadcast %cst_357 : f32 to vector<8x16xf32>
    %1171 = arith.addf %1170, %1169 : vector<8x16xf32>
    %1172 = arith.divf %1170, %1171 : vector<8x16xf32>
    %1173 = vector.extract_strided_slice %1166 {offsets = [0, 16], sizes = [8, 16], strides = [1, 1]} : vector<8x128xf32> to vector<8x16xf32>
    %1174 = arith.negf %1173 : vector<8x16xf32>
    %1175 = math.exp %1174 : vector<8x16xf32>
    %cst_358 = arith.constant 1.000000e+00 : f32
    %1176 = vector.broadcast %cst_358 : f32 to vector<8x16xf32>
    %1177 = arith.addf %1176, %1175 : vector<8x16xf32>
    %1178 = arith.divf %1176, %1177 : vector<8x16xf32>
    %1179 = vector.extract_strided_slice %1166 {offsets = [0, 32], sizes = [8, 16], strides = [1, 1]} : vector<8x128xf32> to vector<8x16xf32>
    %1180 = math.tanh %1179 : vector<8x16xf32>
    %1181 = vector.extract_strided_slice %1166 {offsets = [0, 48], sizes = [8, 16], strides = [1, 1]} : vector<8x128xf32> to vector<8x16xf32>
    %1182 = arith.negf %1181 : vector<8x16xf32>
    %1183 = math.exp %1182 : vector<8x16xf32>
    %cst_359 = arith.constant 1.000000e+00 : f32
    %1184 = vector.broadcast %cst_359 : f32 to vector<8x16xf32>
    %1185 = arith.addf %1184, %1183 : vector<8x16xf32>
    %1186 = arith.divf %1184, %1185 : vector<8x16xf32>
    %1187 = arith.mulf %1178, %1103 : vector<8x16xf32>
    %1188 = arith.mulf %1172, %1180 : vector<8x16xf32>
    %1189 = arith.addf %1187, %1188 : vector<8x16xf32>
    %1190 = math.tanh %1189 : vector<8x16xf32>
    %1191 = arith.mulf %1186, %1190 : vector<8x16xf32>
    %c8_i32_360 = arith.constant 8 : i32
    %1192 = arith.muli %c6_i32_335, %c8_i32_360 : i32
    %1193 = tpu.assume_multiple %1192, 8 : i32
    %cst_361 = arith.constant 0.000000e+00 : f32
    %1194 = vector.broadcast %cst_361 : f32 to vector<8x112xf32>
    %1195 = tpu.concatenate %1191, %1194 in 1 : vector<8x16xf32>, vector<8x112xf32> -> vector<8x128xf32>
    %1196 = arith.addf %1195, %19 : vector<8x128xf32>
    %1197 = arith.index_cast %1193 : i32 to index
    %c0_362 = arith.constant 0 : index
    %1198 = vector.load %arg9[%1197, %c0_362] : memref<64x128xf32, #tpu.memory_space<vmem>>, vector<8x128xf32>
    tpu.vector_store %arg9[%1197, %c0_362], %1196 {strides = array<i32>} : memref<64x128xf32, #tpu.memory_space<vmem>>, vector<8x128xf32>,
    %c7_i32_363 = arith.constant 7 : i32
    %c2_i32_364 = arith.constant 2 : i32
    %c0_i32_365 = arith.constant 0 : i32
    %1199 = arith.cmpi eq, %c2_i32_364, %c0_i32_365 : i32
    %c1_i32_366 = arith.constant 1 : i32
    %1200 = arith.select %1199, %c1_i32_366, %c2_i32_364 : i32
    %1201 = arith.remsi %c7_i32_363, %1200 : i32
    %c0_i32_367 = arith.constant 0 : i32
    %1202 = arith.cmpi ne, %1201, %c0_i32_367 : i32
    %c0_i32_368 = arith.constant 0 : i32
    %1203 = arith.cmpi slt, %1201, %c0_i32_368 : i32
    %c0_i32_369 = arith.constant 0 : i32
    %1204 = arith.cmpi slt, %1200, %c0_i32_369 : i32
    %1205 = arith.xori %1203, %1204 : i1
    %1206 = arith.andi %1205, %1202 : i1
    %1207 = arith.addi %1201, %1200 : i32
    %1208 = arith.select %1206, %1207, %1201 : i32
    %1209 = arith.index_cast %1208 : i32 to index
    %c0_370 = arith.constant 0 : index
    %c0_371 = arith.constant 0 : index
    %1210 = vector.load %arg8[%1209, %c0_370, %c0_371] : memref<2x8x128xf32, #tpu.memory_space<vmem>>, vector<1x8x128xf32>
    %1211 = vector.shape_cast %1210 : vector<1x8x128xf32> to vector<8x128xf32>
    %cst_372 = arith.constant 0.000000e+00 : f32
    %1212 = vector.broadcast %cst_372 : f32 to vector<8x120xf32>
    %1213 = tpu.concatenate %1156, %1212 in 1 : vector<8x8xf32>, vector<8x120xf32> -> vector<8x128xf32>
    %1214 = arith.addf %1211, %1213 : vector<8x128xf32>
    %1215 = arith.truncf %1214 : vector<8x128xf32> to vector<8x128xbf16>
    %c0_373 = arith.constant 0 : index
    %c0_374 = arith.constant 0 : index
    %1216 = vector.load %arg4[%c0_373, %c0_374] : memref<128x128xbf16, #tpu.memory_space<vmem>>, vector<128x128xbf16>
    %cst_375 = arith.constant dense<0.000000e+00> : vector<8x128xf32>
    %1217 = tpu.matmul %1215, %1216, %cst_375 {dimension_numbers = #tpu.dot_dimension_numbers<[1], [0], [0], [1], [0, 0, 1, 1], [], []>} : vector<8x128xbf16>, vector<128x128xbf16>, vector<8x128xf32> -> vector<8x128xf32>
    %1218 = vector.extract_strided_slice %1217 {offsets = [0, 0], sizes = [8, 8], strides = [1, 1]} : vector<8x128xf32> to vector<8x8xf32>
    %1219 = arith.negf %1218 : vector<8x8xf32>
    %1220 = math.exp %1219 : vector<8x8xf32>
    %cst_376 = arith.constant 1.000000e+00 : f32
    %1221 = vector.broadcast %cst_376 : f32 to vector<8x8xf32>
    %1222 = arith.addf %1221, %1220 : vector<8x8xf32>
    %1223 = arith.divf %1221, %1222 : vector<8x8xf32>
    %1224 = vector.extract_strided_slice %1217 {offsets = [0, 8], sizes = [8, 8], strides = [1, 1]} : vector<8x128xf32> to vector<8x8xf32>
    %1225 = arith.negf %1224 : vector<8x8xf32>
    %1226 = math.exp %1225 : vector<8x8xf32>
    %cst_377 = arith.constant 1.000000e+00 : f32
    %1227 = vector.broadcast %cst_377 : f32 to vector<8x8xf32>
    %1228 = arith.addf %1227, %1226 : vector<8x8xf32>
    %1229 = arith.divf %1227, %1228 : vector<8x8xf32>
    %1230 = vector.extract_strided_slice %1217 {offsets = [0, 16], sizes = [8, 8], strides = [1, 1]} : vector<8x128xf32> to vector<8x8xf32>
    %1231 = math.tanh %1230 : vector<8x8xf32>
    %1232 = vector.extract_strided_slice %1217 {offsets = [0, 24], sizes = [8, 8], strides = [1, 1]} : vector<8x128xf32> to vector<8x8xf32>
    %1233 = arith.negf %1232 : vector<8x8xf32>
    %1234 = math.exp %1233 : vector<8x8xf32>
    %cst_378 = arith.constant 1.000000e+00 : f32
    %1235 = vector.broadcast %cst_378 : f32 to vector<8x8xf32>
    %1236 = arith.addf %1235, %1234 : vector<8x8xf32>
    %1237 = arith.divf %1235, %1236 : vector<8x8xf32>
    %1238 = arith.mulf %1229, %1154 : vector<8x8xf32>
    %1239 = arith.mulf %1223, %1231 : vector<8x8xf32>
    %1240 = arith.addf %1238, %1239 : vector<8x8xf32>
    %1241 = math.tanh %1240 : vector<8x8xf32>
    %1242 = arith.mulf %1237, %1241 : vector<8x8xf32>
    %cst_379 = arith.constant 0.000000e+00 : f32
    %1243 = vector.broadcast %cst_379 : f32 to vector<8x16xf32>
    %cst_380 = arith.constant 0.000000e+00 : f32
    %1244 = vector.broadcast %cst_380 : f32 to vector<8x104xf32>
    %1245 = tpu.concatenate %1243, %1242, %1244 in 1 : vector<8x16xf32>, vector<8x8xf32>, vector<8x104xf32> -> vector<8x128xf32>
    %1246 = arith.addf %1245, %14 : vector<8x128xf32>
    %cst_381 = arith.constant 0.000000e+00 : f32
    %1247 = vector.broadcast %cst_381 : f32 to vector<8x112xf32>
    %1248 = tpu.concatenate %1191, %1247 in 1 : vector<8x16xf32>, vector<8x112xf32> -> vector<8x128xf32>
    %1249 = arith.addf %1246, %1248 : vector<8x128xf32>
    %1250 = arith.truncf %1249 : vector<8x128xf32> to vector<8x128xbf16>
    %c0_382 = arith.constant 0 : index
    %c0_383 = arith.constant 0 : index
    %1251 = vector.load %arg5[%c0_382, %c0_383] : memref<128x128xbf16, #tpu.memory_space<vmem>>, vector<128x128xbf16>
    %cst_384 = arith.constant dense<0.000000e+00> : vector<8x128xf32>
    %1252 = tpu.matmul %1250, %1251, %cst_384 {dimension_numbers = #tpu.dot_dimension_numbers<[1], [0], [0], [1], [0, 0, 1, 1], [], []>} : vector<8x128xbf16>, vector<128x128xbf16>, vector<8x128xf32> -> vector<8x128xf32>
    %1253 = vector.extract_strided_slice %1252 {offsets = [0, 0], sizes = [8, 16], strides = [1, 1]} : vector<8x128xf32> to vector<8x16xf32>
    %1254 = arith.negf %1253 : vector<8x16xf32>
    %1255 = math.exp %1254 : vector<8x16xf32>
    %cst_385 = arith.constant 1.000000e+00 : f32
    %1256 = vector.broadcast %cst_385 : f32 to vector<8x16xf32>
    %1257 = arith.addf %1256, %1255 : vector<8x16xf32>
    %1258 = arith.divf %1256, %1257 : vector<8x16xf32>
    %1259 = vector.extract_strided_slice %1252 {offsets = [0, 16], sizes = [8, 16], strides = [1, 1]} : vector<8x128xf32> to vector<8x16xf32>
    %1260 = arith.negf %1259 : vector<8x16xf32>
    %1261 = math.exp %1260 : vector<8x16xf32>
    %cst_386 = arith.constant 1.000000e+00 : f32
    %1262 = vector.broadcast %cst_386 : f32 to vector<8x16xf32>
    %1263 = arith.addf %1262, %1261 : vector<8x16xf32>
    %1264 = arith.divf %1262, %1263 : vector<8x16xf32>
    %1265 = vector.extract_strided_slice %1252 {offsets = [0, 32], sizes = [8, 16], strides = [1, 1]} : vector<8x128xf32> to vector<8x16xf32>
    %1266 = math.tanh %1265 : vector<8x16xf32>
    %1267 = vector.extract_strided_slice %1252 {offsets = [0, 48], sizes = [8, 16], strides = [1, 1]} : vector<8x128xf32> to vector<8x16xf32>
    %1268 = arith.negf %1267 : vector<8x16xf32>
    %1269 = math.exp %1268 : vector<8x16xf32>
    %cst_387 = arith.constant 1.000000e+00 : f32
    %1270 = vector.broadcast %cst_387 : f32 to vector<8x16xf32>
    %1271 = arith.addf %1270, %1269 : vector<8x16xf32>
    %1272 = arith.divf %1270, %1271 : vector<8x16xf32>
    %1273 = arith.mulf %1264, %1189 : vector<8x16xf32>
    %1274 = arith.mulf %1258, %1266 : vector<8x16xf32>
    %1275 = arith.addf %1273, %1274 : vector<8x16xf32>
    %1276 = math.tanh %1275 : vector<8x16xf32>
    %1277 = arith.mulf %1272, %1276 : vector<8x16xf32>
    %c8_i32_388 = arith.constant 8 : i32
    %1278 = arith.muli %c7_i32_363, %c8_i32_388 : i32
    %1279 = tpu.assume_multiple %1278, 8 : i32
    %cst_389 = arith.constant 0.000000e+00 : f32
    %1280 = vector.broadcast %cst_389 : f32 to vector<8x112xf32>
    %1281 = tpu.concatenate %1277, %1280 in 1 : vector<8x16xf32>, vector<8x112xf32> -> vector<8x128xf32>
    %1282 = arith.addf %1281, %19 : vector<8x128xf32>
    %1283 = arith.index_cast %1279 : i32 to index
    %c0_390 = arith.constant 0 : index
    %1284 = vector.load %arg9[%1283, %c0_390] : memref<64x128xf32, #tpu.memory_space<vmem>>, vector<8x128xf32>
    tpu.vector_store %arg9[%1283, %c0_390], %1282 {strides = array<i32>} : memref<64x128xf32, #tpu.memory_space<vmem>>, vector<8x128xf32>,
    %c8_i32_391 = arith.constant 8 : i32
    %c0_392 = arith.constant 0 : index
    %c0_393 = arith.constant 0 : index
    %1285 = vector.load %arg9[%c0_392, %c0_393] : memref<64x128xf32, #tpu.memory_space<vmem>>, vector<64x128xf32>
    %1286 = arith.truncf %1285 : vector<64x128xf32> to vector<64x128xbf16>
    %c0_394 = arith.constant 0 : index
    %c0_395 = arith.constant 0 : index
    %1287 = vector.load %arg6[%c0_394, %c0_395] : memref<128x128xbf16, #tpu.memory_space<vmem>>, vector<128x128xbf16>
    %cst_396 = arith.constant dense<0.000000e+00> : vector<64x128xf32>
    %1288 = tpu.matmul %1286, %1287, %cst_396 {dimension_numbers = #tpu.dot_dimension_numbers<[1], [0], [0], [1], [0, 0, 1, 1], [], []>} : vector<64x128xbf16>, vector<128x128xbf16>, vector<64x128xf32> -> vector<64x128xf32>
    %c0_397 = arith.constant 0 : index
    %c0_398 = arith.constant 0 : index
    %1289 = vector.load %arg7[%c0_397, %c0_398] : memref<64x128xf32, #tpu.memory_space<vmem>>, vector<64x128xf32>
    tpu.vector_store %arg7[%c0_397, %c0_398], %1288 {strides = array<i32>} : memref<64x128xf32, #tpu.memory_space<vmem>>, vector<64x128xf32>,
    return
  }
}

</mosaic_0001>

<bundles_post_ra>
// kernel: lstm_autoencoder_forward.1
= control target key start
LH: loop header
LB: loop body
LE: loop exit
PB: predicated region body
PF: predicated region fallthrough
CT: control target
= control target key end

     0   :  { %v5513_v0 = vmov 0.0   ;;  %vm5514_vm0 = vmmov 0   ;;  %s5515_s19 = smov 96   ;;  %s5516_s20 = smov 16   ;;  %v27_v36 = vlaneseq  ;;  %vm170_vm2 = vcmask 64512   ;;  %s7094_s2 = inlined_call_operand.vmem [shape: bf16[128,128], index: 2, kind: input, shape index: {}]   ;;  %s7095_s0 = inlined_call_operand.vmem [shape: f32[8,8,128], index: 0, kind: input, shape index: {}]   ;;  %s7096_s3 = inlined_call_operand.vmem [shape: bf16[128,128], index: 3, kind: input, shape index: {}]   ;;  %s7097_s4 = inlined_call_operand.vmem [shape: bf16[128,128], index: 4, kind: input, shape index: {}]   ;;  %s7098_s1 = inlined_call_operand.vmem [shape: f32[2,8,8], index: 1, kind: input, shape index: {}]   ;;  %s7099_s5 = inlined_call_operand.vmem [shape: bf16[128,128], index: 5, kind: input, shape index: {}]   ;;  %s7100_s6 = inlined_call_operand.vmem [shape: bf16[128,128], index: 6, kind: input, shape index: {}]   ;;  %s7101_s7 = inlined_call_operand.vmem [shape: f32[64,128], index: 7, kind: output, shape index: {}]  }
   0x1   :  { %4404 = vmatprep.subr.bf16.mxu1 %v5513_v0  ;;  %v5568_v1 = vld [vmem:[%s7094_s2 + $0x38] sm:$0xff]   ;;  %4420 = vmatprep.mubr.msk.bf16.mxu1 %vm5514_vm0, %v5513_v0  ;;  %v5579_v2 = vld [vmem:[%s7094_s2 + $0x30] sm:$0xff]   ;;  %v5588_v3 = vld [vmem:[%s7094_s2 + $0x28] sm:$0xff]   ;;  %s5517_s27 = smov 32   ;;  %s5518_s15 = smov 88   ;;  %vm310_vm3 = vcmask 130048  }
   0x2   :  { %4444 = vmatprep.subr.bf16.mxu0 %v5513_v0  ;;  %4460 = vmatprep.mubr.msk.bf16.mxu0 %vm5514_vm0, %v5513_v0  ;;  %v5597_v4 = vld [vmem:[%s7094_s2 + $0x20] sm:$0xff]   ;;  %v5606_v5 = vld [vmem:[%s7094_s2 + $0x18] sm:$0xff]   ;;  %v5615_v6 = vld [vmem:[%s7094_s2 + $0x10] sm:$0xff]   ;;  %s5519_s16 = smov 80   ;;  %v5711_v37 = vand.u32 127, %v27_v36  ;;  %vm172_vm4 = vcmask 195584  }
   0x3   :  { %4405 = vmatpush3.bf16.msra.mxu1 %v5568_v1  ;;  %4445 = vmatpush3.bf16.msra.mxu0 %v5568_v1  ;;  %v5624_v7 = vld [vmem:[%s7094_s2 + $0x8] sm:$0xff]   ;;  %v5633_v8 = vld [vmem:[%s7094_s2] sm:$0xff]   ;;  %v5655_v25 = vld [vmem:[%s7096_s3 + $0x38] sm:$0xff]   ;;  %s5520_s21 = smov 112   ;;  %s5521_s22 = smov 8  }
   0x4   :  { %4406 = vmatprep.subr.bf16.mxu1 %v5513_v0  ;;  %4446 = vmatprep.subr.bf16.mxu0 %v5513_v0  ;;  %v35_v9 = vld [vmem:[%s7095_s0] sm:$0xff]  ;;  %v5661_v26 = vld [vmem:[%s7096_s3 + $0x30] sm:$0xff]   ;;  %v5668_v27 = vld [vmem:[%s7096_s3 + $0x28] sm:$0xff]   ;;  %vm29_vm1 = vcmp.eq.s32.totalorder %v5711_v37, 24  ;;  %s5522_s23 = smov 104   ;;  %vm32_vm5 = vcmp.eq.s32.totalorder %v5711_v37, 16 }
   0x5   :  { %v37_v10 = vpack.c.bf16 %v35_v9, %v35_v9  ;;  %v5676_v29 = vld [vmem:[%s7096_s3 + $0x20] sm:$0xff]   ;;  %v5683_v30 = vld [vmem:[%s7096_s3 + $0x18] sm:$0xff]   ;;  %v5690_v31 = vld [vmem:[%s7096_s3 + $0x10] sm:$0xff]   ;;  %v5718_v39 = vsel %vm29_vm1, 1.0, %v5513_v0  ;;  %s5523_s30 = smov 120  }
   0x6   :  { %v5697_v32 = vld [vmem:[%s7096_s3 + $0x8] sm:$0xff]   ;;  %v5705_v33 = vld [vmem:[%s7096_s3] sm:$0xff]   ;;  %v3925_v36 = vld [vmem:[%s7095_s0 + $0x10] sm:$0xff] }
   0x7   :  { %4407 = vmatpush3.bf16.msra.mxu1 %v5579_v2  ;;  %4447 = vmatpush3.bf16.msra.mxu0 %v5579_v2  ;;  %v3922_v38 = vld [vmem:[%s7095_s0 + $0x8] sm:$0xff] }
   0x8   :  { %4408 = vmatprep.subr.bf16.mxu1 %v5513_v0  ;;  %4448 = vmatprep.subr.bf16.mxu0 %v5513_v0 }
   0xb   :  { %4409 = vmatpush3.bf16.msra.mxu1 %v5588_v3  ;;  %4449 = vmatpush3.bf16.msra.mxu0 %v5588_v3 }
   0xc   :  { %4410 = vmatprep.subr.bf16.mxu1 %v5513_v0  ;;  %4450 = vmatprep.subr.bf16.mxu0 %v5513_v0 }
   0xf   :  { %4411 = vmatpush3.bf16.msra.mxu1 %v5597_v4  ;;  %4451 = vmatpush3.bf16.msra.mxu0 %v5597_v4 }
  0x10   :  { %4412 = vmatprep.subr.bf16.mxu1 %v5513_v0  ;;  %4452 = vmatprep.subr.bf16.mxu0 %v5513_v0 }
  0x13   :  { %4413 = vmatpush3.bf16.msra.mxu1 %v5606_v5  ;;  %4453 = vmatpush3.bf16.msra.mxu0 %v5606_v5 }
  0x14   :  { %4414 = vmatprep.subr.bf16.mxu1 %v5513_v0  ;;  %4454 = vmatprep.subr.bf16.mxu0 %v5513_v0 }
  0x17   :  { %4415 = vmatpush3.bf16.msra.mxu1 %v5615_v6  ;;  %4455 = vmatpush3.bf16.msra.mxu0 %v5615_v6 }
  0x18   :  { %4416 = vmatprep.subr.bf16.mxu1 %v5513_v0  ;;  %4456 = vmatprep.subr.bf16.mxu0 %v5513_v0 }
  0x1b   :  { %4417 = vmatpush3.bf16.msra.mxu1 %v5624_v7  ;;  %4457 = vmatpush3.bf16.msra.mxu0 %v5624_v7 }
  0x1c   :  { %4418 = vmatprep.subr.bf16.mxu1 %v5513_v0  ;;  %4458 = vmatprep.subr.bf16.mxu0 %v5513_v0 }
  0x1f   :  { %4419 = vmatpush3.bf16.msra.mxu1 %v5633_v8  ;;  %4459 = vmatpush3.bf16.msra.mxu0 %v5633_v8 }
  0x20   :  { %4424 = vmatprep.subr.bf16.mxu1 %v5513_v0  ;;  %4484 = vmatprep.subr.bf16.mxu0 %v5513_v0 }
  0x22   :  { %4421 = vmatmul.mubr.bf16.vlgmr.msra.gmra.mxu1 %v37_v10 }
  0x23   :  { %4440 = vmatprep.mubr.msk.bf16.mxu1 %vm5514_vm0, %v5513_v0  ;;  %4425 = vmatpush3.bf16.msra.mxu1 %v5655_v25 }
  0x24   :  { %4426 = vmatprep.subr.bf16.mxu1 %v5513_v0 }
  0x27   :  { %4427 = vmatpush3.bf16.msra.mxu1 %v5661_v26 }
  0x28   :  { %4428 = vmatprep.subr.bf16.mxu1 %v5513_v0 }
  0x2b   :  { %4429 = vmatpush3.bf16.msra.mxu1 %v5668_v27 }
  0x2c   :  { %4430 = vmatprep.subr.bf16.mxu1 %v5513_v0 }
  0x2f   :  { %4431 = vmatpush3.bf16.msra.mxu1 %v5676_v29 }
  0x30   :  { %4432 = vmatprep.subr.bf16.mxu1 %v5513_v0 }
  0x33   :  { %4433 = vmatpush3.bf16.msra.mxu1 %v5683_v30 }
  0x34   :  { %4434 = vmatprep.subr.bf16.mxu1 %v5513_v0 }
  0x37   :  { %4435 = vmatpush3.bf16.msra.mxu1 %v5690_v31 }
  0x38   :  { %4436 = vmatprep.subr.bf16.mxu1 %v5513_v0 }
  0x3b   :  { %4437 = vmatpush3.bf16.msra.mxu1 %v5697_v32 }
  0x3c   :  { %4438 = vmatprep.subr.bf16.mxu1 %v5513_v0 }
  0x3f   :  { %4439 = vmatpush3.bf16.msra.mxu1 %v5705_v33 }
  0x40   :  { %4464 = vmatprep.subr.bf16.mxu1 %v5513_v0 }
  0xe2   :  { %v136_v11 = vpop.f32.mrf.mxu1 }
  0xe3   :  { %5241 = vtanh.f32 %v136_v11  ;;  %v3912_v16 = vmul.f32 -1.442695, %v136_v11 }
  0xe4   :  { %v4422_v12 = vpop.f32.mrf.mxu1 }
  0xe5   :  { %5243 = vpow2.f32 %v3912_v16 }
  0xe6   :  { %v139_v13 = vpop.f32.mrf.mxu1 }
  0xe8   :  { %v4423_v14 = vpop.f32.mrf.mxu1 }
  0xf0   :  { %v5242_v15 = vpop.eup %5241 }
  0xf1   :  { %151 = vrot.lane.b32.xlu0 %v5242_v15, %s5515_s19 }
  0xf2   :  { %v5244_v17 = vpop.eup %5243 }
  0xf3   :  { %v145_v18 = vadd.f32 1.0, %v5244_v17 }
  0xf5   :  { %5245 = vrcp.f32 %v145_v18 }
 0x102   :  { %v5246_v19 = vpop.eup %5245 }
 0x103   :  { %v149_v22 = vmul.f32 0.0, %v5246_v19 }
 0x163   :  { %v152_v20 = vpop.permute.xlu0 %151 }
 0x164   :  { %v154_v21 = vmul.f32 %v5246_v19, %v152_v20 }
 0x166   :  { %156 = vrot.lane.b32.xlu0 %v154_v21, %s5516_s20 }
 0x1d8   :  { %v157_v23 = vpop.permute.xlu0 %156 }
 0x1d9   :  { %v5649_v24 = vadd.f32 %v157_v23, %v149_v22 }
 0x1db   :  { %5247 = vtanh.f32 %v5649_v24 }
 0x1e8   :  { %v5248_v28 = vpop.eup %5247 }
 0x1e9   :  { %162 = vrot.lane.b32.xlu1 %v5248_v28, %s5517_s27 }
 0x25b   :  { %v163_v34 = vpop.permute.xlu1 %162 }
 0x25c   :  { %v165_v35 = vmul.f32 %v5246_v19, %v163_v34 }
 0x25e   :  { %167 = vrot.lane.b32.xlu0 %v165_v35, %s5518_s15  ;;  %307 = vrot.lane.b32.xlu1 %v165_v35, %s5519_s16 }
 0x2d0   :  { %v168_v40 = vpop.permute.xlu0 %167  ;;  %v308_v41 = vpop.permute.xlu1 %307 }
 0x2d1   :  { %v171_v42 = vsel %vm170_vm2, 0.0, %v168_v40  ;;  %v311_v43 = vsel %vm310_vm3, %v308_v41, 0.0 }
 0x2d2   :  { %v173_v44 = vsel %vm172_vm4, %v171_v42, 0.0  ;;  %v312_v45 = vadd.f32 %v3922_v38, %v311_v43 }
 0x2d3   :  { %v174_v46 = vadd.f32 %v5718_v39, %v173_v44 }
 0x2d4   :  { %v313_v47 = vpack.c.bf16 %v312_v45, %v312_v45 }
 0x2d5   :  { %v176_v48 = vpack.c.bf16 %v174_v46, %v174_v46 }
 0x2d6   :  { %4461 = vmatmul.mubr.bf16.vlgmr.msra.gmra.mxu0 %v313_v47 }
 0x2d7   :  { %4441 = vmatmul.mubr.bf16.vlgmr.msra.gmra.mxu1 %v176_v48  ;;  %4485 = vmatpush3.bf16.msra.mxu0 %v5568_v1 }
 0x2d8   :  { %4486 = vmatprep.subr.bf16.mxu0 %v5513_v0  ;;  %4465 = vmatpush3.bf16.msra.mxu1 %v5655_v25 }
 0x2d9   :  { %4466 = vmatprep.subr.bf16.mxu1 %v5513_v0  ;;  %4500 = vmatprep.mubr.msk.bf16.mxu0 %vm5514_vm0, %v5513_v0 }
 0x2da   :  { %4480 = vmatprep.mubr.msk.bf16.mxu1 %vm5514_vm0, %v5513_v0 }
 0x2db   :  { %4487 = vmatpush3.bf16.msra.mxu0 %v5579_v2 }
 0x2dc   :  { %4488 = vmatprep.subr.bf16.mxu0 %v5513_v0  ;;  %4467 = vmatpush3.bf16.msra.mxu1 %v5661_v26 }
 0x2dd   :  { %4468 = vmatprep.subr.bf16.mxu1 %v5513_v0 }
 0x2df   :  { %4489 = vmatpush3.bf16.msra.mxu0 %v5588_v3 }
 0x2e0   :  { %4490 = vmatprep.subr.bf16.mxu0 %v5513_v0  ;;  %4469 = vmatpush3.bf16.msra.mxu1 %v5668_v27 }
 0x2e1   :  { %4470 = vmatprep.subr.bf16.mxu1 %v5513_v0 }
 0x2e3   :  { %4491 = vmatpush3.bf16.msra.mxu0 %v5597_v4 }
 0x2e4   :  { %4492 = vmatprep.subr.bf16.mxu0 %v5513_v0  ;;  %4471 = vmatpush3.bf16.msra.mxu1 %v5676_v29 }
 0x2e5   :  { %4472 = vmatprep.subr.bf16.mxu1 %v5513_v0 }
 0x2e7   :  { %4493 = vmatpush3.bf16.msra.mxu0 %v5606_v5 }
 0x2e8   :  { %4494 = vmatprep.subr.bf16.mxu0 %v5513_v0  ;;  %4473 = vmatpush3.bf16.msra.mxu1 %v5683_v30 }
 0x2e9   :  { %4474 = vmatprep.subr.bf16.mxu1 %v5513_v0 }
 0x2eb   :  { %4495 = vmatpush3.bf16.msra.mxu0 %v5615_v6 }
 0x2ec   :  { %4496 = vmatprep.subr.bf16.mxu0 %v5513_v0  ;;  %4475 = vmatpush3.bf16.msra.mxu1 %v5690_v31 }
 0x2ed   :  { %4476 = vmatprep.subr.bf16.mxu1 %v5513_v0 }
 0x2ef   :  { %4497 = vmatpush3.bf16.msra.mxu0 %v5624_v7 }
 0x2f0   :  { %4498 = vmatprep.subr.bf16.mxu0 %v5513_v0  ;;  %4477 = vmatpush3.bf16.msra.mxu1 %v5697_v32 }
 0x2f1   :  { %4478 = vmatprep.subr.bf16.mxu1 %v5513_v0 }
 0x2f3   :  { %4499 = vmatpush3.bf16.msra.mxu0 %v5633_v8 }
 0x2f4   :  { %4479 = vmatpush3.bf16.msra.mxu1 %v5705_v33  ;;  %4524 = vmatprep.subr.bf16.mxu0 %v5513_v0 }
 0x2f5   :  { %4504 = vmatprep.subr.bf16.mxu1 %v5513_v0 }
 0x396   :  { %v348_v49 = vpop.f32.mrf.mxu0 }
 0x397   :  { %5249 = vtanh.f32 %v348_v49  ;;  %v275_v50 = vpop.f32.mrf.mxu1  ;;  %v3923_v59 = vmul.f32 -1.442695, %v348_v49 }
 0x398   :  { %5251 = vtanh.f32 %v275_v50  ;;  %v4462_v51 = vpop.f32.mrf.mxu0  ;;  %v3921_v60 = vmul.f32 -1.442695, %v275_v50 }
 0x399   :  { %v4442_v52 = vpop.f32.mrf.mxu1  ;;  %5253 = vpow2.f32 %v3923_v59 }
 0x39a   :  { %v351_v53 = vpop.f32.mrf.mxu0  ;;  %5255 = vpow2.f32 %v3921_v60 }
 0x39b   :  { %v278_v54 = vpop.f32.mrf.mxu1 }
 0x39c   :  { %v4463_v55 = vpop.f32.mrf.mxu0 }
 0x39d   :  { %v4443_v56 = vpop.f32.mrf.mxu1 }
 0x3a4   :  { %v5250_v57 = vpop.eup %5249 }
 0x3a5   :  { %v5252_v58 = vpop.eup %5251  ;;  %363 = vrot.lane.b32.xlu1 %v5250_v57, %s5515_s19 }
 0x3a6   :  { %290 = vrot.lane.b32.xlu0 %v5252_v58, %s5520_s21  ;;  %v5254_v61 = vpop.eup %5253 }
 0x3a7   :  { %v5256_v62 = vpop.eup %5255  ;;  %v357_v63 = vadd.f32 1.0, %v5254_v61 }
 0x3a8   :  { %v284_v9 = vadd.f32 1.0, %v5256_v62 }
 0x3a9   :  { %5257 = vrcp.f32 %v357_v63 }
 0x3aa   :  { %5259 = vrcp.f32 %v284_v9 }
 0x3b6   :  { %v5258_v10 = vpop.eup %5257 }
 0x3b7   :  { %v5260_v12 = vpop.eup %5259  ;;  %v361_v16 = vmul.f32 %v5258_v10, %v5649_v24 }
 0x3b8   :  { %v288_v18 = vmul.f32 0.0, %v5260_v12 }
 0x417   :  { %v364_v11 = vpop.permute.xlu1 %363 }
 0x418   :  { %v366_v13 = vmul.f32 %v5258_v10, %v364_v11  ;;  %v291_v14 = vpop.permute.xlu0 %290 }
 0x419   :  { %v293_v15 = vmul.f32 %v5260_v12, %v291_v14 }
 0x41a   :  { %368 = vrot.lane.b32.xlu1 %v366_v13, %s5516_s20 }
 0x41b   :  { %295 = vrot.lane.b32.xlu0 %v293_v15, %s5521_s22 }
 0x48c   :  { %v369_v17 = vpop.permute.xlu1 %368 }
 0x48d   :  { %v5765_v19 = vadd.f32 %v369_v17, %v361_v16  ;;  %v296_v20 = vpop.permute.xlu0 %295 }
 0x48e   :  { %v5767_v21 = vadd.f32 %v296_v20, %v288_v18 }
 0x48f   :  { %5261 = vtanh.f32 %v5765_v19 }
 0x490   :  { %5263 = vtanh.f32 %v5767_v21 }
 0x49c   :  { %v5262_v22 = vpop.eup %5261 }
 0x49d   :  { %v5264_v23 = vpop.eup %5263  ;;  %374 = vrot.lane.b32.xlu1 %v5262_v22, %s5517_s27 }
 0x49e   :  { %301 = vrot.lane.b32.xlu0 %v5264_v23, %s5516_s20 }
 0x50f   :  { %v375_v28 = vpop.permute.xlu1 %374 }
 0x510   :  { %v377_v34 = vmul.f32 %v5258_v10, %v375_v28  ;;  %v302_v24 = vpop.permute.xlu0 %301 }
 0x511   :  { %v304_v35 = vmul.f32 %v5260_v12, %v302_v24 }
 0x512   :  { %379 = vrot.lane.b32.xlu1 %v377_v34, %s5518_s15  ;;  %458 = vrot.lane.b32.xlu0 %v377_v34, %s5519_s16 }
 0x516   :  { %386 = vrot.lane.b32.xlu1 %v304_v35, %s5522_s23 }
 0x584   :  { %v380_v38 = vpop.permute.xlu1 %379  ;;  %v459_v40 = vpop.permute.xlu0 %458 }
 0x585   :  { %v382_v41 = vsel %vm170_vm2, 0.0, %v380_v38  ;;  %v461_v42 = vsel %vm310_vm3, %v459_v40, 0.0 }
 0x586   :  { %v383_v43 = vsel %vm172_vm4, %v382_v41, 0.0  ;;  %v462_v44 = vadd.f32 %v3925_v36, %v461_v42 }
 0x587   :  { %v384_v45 = vadd.f32 %v5718_v39, %v383_v43 }
 0x588   :  { %v463_v46 = vpack.c.bf16 %v462_v44, %v462_v44  ;;  %v387_v47 = vpop.permute.xlu1 %386 }
 0x589   :  { %v389_v48 = vsel %vm170_vm2, %v387_v47, 0.0 }
 0x58a   :  { %v390_v49 = vadd.f32 %v389_v48, %v384_v45  ;;  %4501 = vmatmul.mubr.bf16.vlgmr.msra.gmra.mxu0 %v463_v46 }
 0x58b   :  { %4525 = vmatpush3.bf16.msra.mxu0 %v5568_v1  ;;  %4540 = vmatprep.mubr.msk.bf16.mxu0 %vm5514_vm0, %v5513_v0 }
 0x58c   :  { %v391_v50 = vpack.c.bf16 %v390_v49, %v390_v49  ;;  %4526 = vmatprep.subr.bf16.mxu0 %v5513_v0 }
 0x58e   :  { %4481 = vmatmul.mubr.bf16.vlgmr.msra.gmra.mxu1 %v391_v50 }
 0x58f   :  { %4505 = vmatpush3.bf16.msra.mxu1 %v5655_v25  ;;  %4527 = vmatpush3.bf16.msra.mxu0 %v5579_v2 }
 0x590   :  { %4506 = vmatprep.subr.bf16.mxu1 %v5513_v0  ;;  %4528 = vmatprep.subr.bf16.mxu0 %v5513_v0 }
 0x591   :  { %4520 = vmatprep.mubr.msk.bf16.mxu1 %vm5514_vm0, %v5513_v0 }
 0x593   :  { %4507 = vmatpush3.bf16.msra.mxu1 %v5661_v26  ;;  %4529 = vmatpush3.bf16.msra.mxu0 %v5588_v3 }
 0x594   :  { %4508 = vmatprep.subr.bf16.mxu1 %v5513_v0  ;;  %4530 = vmatprep.subr.bf16.mxu0 %v5513_v0 }
 0x597   :  { %4509 = vmatpush3.bf16.msra.mxu1 %v5668_v27  ;;  %4531 = vmatpush3.bf16.msra.mxu0 %v5597_v4 }
 0x598   :  { %4510 = vmatprep.subr.bf16.mxu1 %v5513_v0  ;;  %4532 = vmatprep.subr.bf16.mxu0 %v5513_v0 }
 0x59b   :  { %4511 = vmatpush3.bf16.msra.mxu1 %v5676_v29  ;;  %4533 = vmatpush3.bf16.msra.mxu0 %v5606_v5 }
 0x59c   :  { %4512 = vmatprep.subr.bf16.mxu1 %v5513_v0  ;;  %4534 = vmatprep.subr.bf16.mxu0 %v5513_v0 }
 0x59f   :  { %4513 = vmatpush3.bf16.msra.mxu1 %v5683_v30  ;;  %4535 = vmatpush3.bf16.msra.mxu0 %v5615_v6 }
 0x5a0   :  { %4514 = vmatprep.subr.bf16.mxu1 %v5513_v0  ;;  %4536 = vmatprep.subr.bf16.mxu0 %v5513_v0 }
 0x5a3   :  { %4515 = vmatpush3.bf16.msra.mxu1 %v5690_v31  ;;  %4537 = vmatpush3.bf16.msra.mxu0 %v5624_v7 }
 0x5a4   :  { %4516 = vmatprep.subr.bf16.mxu1 %v5513_v0  ;;  %4538 = vmatprep.subr.bf16.mxu0 %v5513_v0 }
 0x5a7   :  { %4517 = vmatpush3.bf16.msra.mxu1 %v5697_v32  ;;  %4539 = vmatpush3.bf16.msra.mxu0 %v5633_v8 }
 0x5a8   :  { %4518 = vmatprep.subr.bf16.mxu1 %v5513_v0  ;;  %4564 = vmatprep.subr.bf16.mxu0 %v5513_v0 }
 0x5ab   :  { %4519 = vmatpush3.bf16.msra.mxu1 %v5705_v33 }
 0x5ac   :  { %4544 = vmatprep.subr.bf16.mxu1 %v5513_v0 }
 0x64a   :  { %v498_v51 = vpop.f32.mrf.mxu0 }
 0x64b   :  { %5265 = vtanh.f32 %v498_v51  ;;  %v3926_v61 = vmul.f32 -1.442695, %v498_v51 }
 0x64c   :  { %v4502_v52 = vpop.f32.mrf.mxu0 }
 0x64e   :  { %v426_v53 = vpop.f32.mrf.mxu1  ;;  %v501_v54 = vpop.f32.mrf.mxu0 }
 0x64f   :  { %5267 = vtanh.f32 %v426_v53  ;;  %v3924_v62 = vmul.f32 -1.442695, %v426_v53 }
 0x650   :  { %v4482_v55 = vpop.f32.mrf.mxu1  ;;  %v4503_v56 = vpop.f32.mrf.mxu0  ;;  %5269 = vpow2.f32 %v3926_v61 }
 0x651   :  { %5271 = vpow2.f32 %v3924_v62 }
 0x652   :  { %v429_v57 = vpop.f32.mrf.mxu1 }
 0x654   :  { %v4483_v58 = vpop.f32.mrf.mxu1 }
 0x658   :  { %v5266_v59 = vpop.eup %5265 }
 0x659   :  { %513 = vrot.lane.b32.xlu0 %v5266_v59, %s5515_s19 }
 0x65c   :  { %v5268_v60 = vpop.eup %5267 }
 0x65d   :  { %441 = vrot.lane.b32.xlu1 %v5268_v60, %s5520_s21  ;;  %v5270_v63 = vpop.eup %5269 }
 0x65e   :  { %v507_v9 = vadd.f32 1.0, %v5270_v63  ;;  %v5272_v10 = vpop.eup %5271 }
 0x65f   :  { %v435_v11 = vadd.f32 1.0, %v5272_v10 }
 0x660   :  { %5273 = vrcp.f32 %v507_v9 }
 0x661   :  { %5275 = vrcp.f32 %v435_v11 }
 0x66d   :  { %v5274_v12 = vpop.eup %5273 }
 0x66e   :  { %v5276_v15 = vpop.eup %5275  ;;  %v511_v18 = vmul.f32 %v5274_v12, %v5765_v19 }
 0x66f   :  { %v439_v23 = vmul.f32 %v5276_v15, %v5767_v21  ;;  %v3928_v21 = vld [vmem:[%s7095_s0 + $0x18] sm:$0xff] }
 0x6cb   :  { %v514_v13 = vpop.permute.xlu0 %513 }
 0x6cc   :  { %v516_v14 = vmul.f32 %v5274_v12, %v514_v13 }
 0x6ce   :  { %518 = vrot.lane.b32.xlu0 %v516_v14, %s5516_s20 }
 0x6cf   :  { %v442_v16 = vpop.permute.xlu1 %441 }
 0x6d0   :  { %v444_v17 = vmul.f32 %v5276_v15, %v442_v16 }
 0x6d2   :  { %446 = vrot.lane.b32.xlu1 %v444_v17, %s5521_s22 }
 0x740   :  { %v519_v20 = vpop.permute.xlu0 %518 }
 0x741   :  { %v5825_v22 = vadd.f32 %v519_v20, %v511_v18 }
 0x743   :  { %5277 = vtanh.f32 %v5825_v22 }
 0x744   :  { %v447_v28 = vpop.permute.xlu1 %446 }
 0x745   :  { %v5829_v34 = vadd.f32 %v447_v28, %v439_v23 }
 0x747   :  { %5279 = vtanh.f32 %v5829_v34 }
 0x750   :  { %v5278_v24 = vpop.eup %5277 }
 0x751   :  { %524 = vrot.lane.b32.xlu0 %v5278_v24, %s5517_s27 }
 0x754   :  { %v5280_v35 = vpop.eup %5279 }
 0x755   :  { %452 = vrot.lane.b32.xlu1 %v5280_v35, %s5516_s20 }
 0x7c3   :  { %v525_v36 = vpop.permute.xlu0 %524 }
 0x7c4   :  { %v527_v19 = vmul.f32 %v5274_v12, %v525_v36 }
 0x7c6   :  { %529 = vrot.lane.b32.xlu0 %v527_v19, %s5518_s15  ;;  %608 = vrot.lane.b32.xlu1 %v527_v19, %s5519_s16 }
 0x7c7   :  { %v453_v38 = vpop.permute.xlu1 %452 }
 0x7c8   :  { %v455_v40 = vmul.f32 %v5276_v15, %v453_v38 }
 0x7ca   :  { %536 = vrot.lane.b32.xlu0 %v455_v40, %s5522_s23 }
 0x838   :  { %v530_v41 = vpop.permute.xlu0 %529  ;;  %v609_v42 = vpop.permute.xlu1 %608 }
 0x839   :  { %v532_v43 = vsel %vm170_vm2, 0.0, %v530_v41  ;;  %v611_v44 = vsel %vm310_vm3, %v609_v42, 0.0 }
 0x83a   :  { %v533_v45 = vsel %vm172_vm4, %v532_v43, 0.0  ;;  %v612_v46 = vadd.f32 %v3928_v21, %v611_v44 }
 0x83b   :  { %v534_v47 = vadd.f32 %v5718_v39, %v533_v45 }
 0x83c   :  { %v613_v48 = vpack.c.bf16 %v612_v46, %v612_v46  ;;  %v537_v49 = vpop.permute.xlu0 %536 }
 0x83d   :  { %v539_v50 = vsel %vm170_vm2, %v537_v49, 0.0 }
 0x83e   :  { %v540_v51 = vadd.f32 %v539_v50, %v534_v47  ;;  %4541 = vmatmul.mubr.bf16.vlgmr.msra.gmra.mxu0 %v613_v48 }
 0x83f   :  { %4565 = vmatpush3.bf16.msra.mxu0 %v5568_v1  ;;  %4580 = vmatprep.mubr.msk.bf16.mxu0 %vm5514_vm0, %v5513_v0 }
 0x840   :  { %v541_v52 = vpack.c.bf16 %v540_v51, %v540_v51  ;;  %4566 = vmatprep.subr.bf16.mxu0 %v5513_v0 }
 0x842   :  { %4521 = vmatmul.mubr.bf16.vlgmr.msra.gmra.mxu1 %v541_v52 }
 0x843   :  { %4545 = vmatpush3.bf16.msra.mxu1 %v5655_v25  ;;  %4567 = vmatpush3.bf16.msra.mxu0 %v5579_v2 }
 0x844   :  { %4546 = vmatprep.subr.bf16.mxu1 %v5513_v0  ;;  %4568 = vmatprep.subr.bf16.mxu0 %v5513_v0 }
 0x845   :  { %4560 = vmatprep.mubr.msk.bf16.mxu1 %vm5514_vm0, %v5513_v0 }
 0x847   :  { %4547 = vmatpush3.bf16.msra.mxu1 %v5661_v26  ;;  %4569 = vmatpush3.bf16.msra.mxu0 %v5588_v3 }
 0x848   :  { %4548 = vmatprep.subr.bf16.mxu1 %v5513_v0  ;;  %4570 = vmatprep.subr.bf16.mxu0 %v5513_v0 }
 0x84b   :  { %4549 = vmatpush3.bf16.msra.mxu1 %v5668_v27  ;;  %4571 = vmatpush3.bf16.msra.mxu0 %v5597_v4 }
 0x84c   :  { %4550 = vmatprep.subr.bf16.mxu1 %v5513_v0  ;;  %4572 = vmatprep.subr.bf16.mxu0 %v5513_v0 }
 0x84f   :  { %4551 = vmatpush3.bf16.msra.mxu1 %v5676_v29  ;;  %4573 = vmatpush3.bf16.msra.mxu0 %v5606_v5 }
 0x850   :  { %4552 = vmatprep.subr.bf16.mxu1 %v5513_v0  ;;  %4574 = vmatprep.subr.bf16.mxu0 %v5513_v0 }
 0x853   :  { %4553 = vmatpush3.bf16.msra.mxu1 %v5683_v30  ;;  %4575 = vmatpush3.bf16.msra.mxu0 %v5615_v6 }
 0x854   :  { %4554 = vmatprep.subr.bf16.mxu1 %v5513_v0  ;;  %4576 = vmatprep.subr.bf16.mxu0 %v5513_v0 }
 0x857   :  { %4555 = vmatpush3.bf16.msra.mxu1 %v5690_v31  ;;  %4577 = vmatpush3.bf16.msra.mxu0 %v5624_v7 }
 0x858   :  { %4556 = vmatprep.subr.bf16.mxu1 %v5513_v0  ;;  %4578 = vmatprep.subr.bf16.mxu0 %v5513_v0 }
 0x85b   :  { %4557 = vmatpush3.bf16.msra.mxu1 %v5697_v32  ;;  %4579 = vmatpush3.bf16.msra.mxu0 %v5633_v8 }
 0x85c   :  { %4558 = vmatprep.subr.bf16.mxu1 %v5513_v0  ;;  %4604 = vmatprep.subr.bf16.mxu0 %v5513_v0 }
 0x85f   :  { %4559 = vmatpush3.bf16.msra.mxu1 %v5705_v33 }
 0x860   :  { %4584 = vmatprep.subr.bf16.mxu1 %v5513_v0 }
 0x8fe   :  { %v648_v53 = vpop.f32.mrf.mxu0 }
 0x8ff   :  { %5281 = vtanh.f32 %v648_v53  ;;  %v3929_v63 = vmul.f32 -1.442695, %v648_v53 }
 0x900   :  { %v4542_v54 = vpop.f32.mrf.mxu0 }
 0x902   :  { %v576_v55 = vpop.f32.mrf.mxu1  ;;  %v651_v56 = vpop.f32.mrf.mxu0 }
 0x903   :  { %5283 = vtanh.f32 %v576_v55  ;;  %v3927_v9 = vmul.f32 -1.442695, %v576_v55 }
 0x904   :  { %v4522_v57 = vpop.f32.mrf.mxu1  ;;  %v4543_v58 = vpop.f32.mrf.mxu0  ;;  %5285 = vpow2.f32 %v3929_v63 }
 0x905   :  { %5287 = vpow2.f32 %v3927_v9 }
 0x906   :  { %v579_v59 = vpop.f32.mrf.mxu1 }
 0x908   :  { %v4523_v60 = vpop.f32.mrf.mxu1 }
 0x90c   :  { %v5282_v61 = vpop.eup %5281 }
 0x90d   :  { %663 = vrot.lane.b32.xlu1 %v5282_v61, %s5515_s19 }
 0x910   :  { %v5284_v62 = vpop.eup %5283 }
 0x911   :  { %591 = vrot.lane.b32.xlu0 %v5284_v62, %s5520_s21  ;;  %v5286_v10 = vpop.eup %5285 }
 0x912   :  { %v657_v11 = vadd.f32 1.0, %v5286_v10  ;;  %v5288_v12 = vpop.eup %5287 }
 0x913   :  { %v585_v13 = vadd.f32 1.0, %v5288_v12 }
 0x914   :  { %5289 = vrcp.f32 %v657_v11 }
 0x915   :  { %5291 = vrcp.f32 %v585_v13 }
 0x921   :  { %v5290_v14 = vpop.eup %5289 }
 0x922   :  { %v5292_v17 = vpop.eup %5291  ;;  %v661_v23 = vmul.f32 %v5290_v14, %v5825_v22 }
 0x923   :  { %v589_v35 = vmul.f32 %v5292_v17, %v5829_v34  ;;  %v3931_v34 = vld [vmem:[%s7095_s0 + $0x20] sm:$0xff] }
 0x97f   :  { %v664_v15 = vpop.permute.xlu1 %663 }
 0x980   :  { %v666_v16 = vmul.f32 %v5290_v14, %v664_v15 }
 0x982   :  { %668 = vrot.lane.b32.xlu1 %v666_v16, %s5516_s20 }
 0x983   :  { %v592_v18 = vpop.permute.xlu0 %591 }
 0x984   :  { %v594_v20 = vmul.f32 %v5292_v17, %v592_v18 }
 0x986   :  { %596 = vrot.lane.b32.xlu0 %v594_v20, %s5521_s22 }
 0x9f4   :  { %v669_v28 = vpop.permute.xlu1 %668 }
 0x9f5   :  { %v5886_v24 = vadd.f32 %v669_v28, %v661_v23 }
 0x9f7   :  { %5293 = vtanh.f32 %v5886_v24 }
 0x9f8   :  { %v597_v36 = vpop.permute.xlu0 %596 }
 0x9f9   :  { %v5890_v19 = vadd.f32 %v597_v36, %v589_v35 }
 0x9fb   :  { %5295 = vtanh.f32 %v5890_v19 }
 0xa04   :  { %v5294_v38 = vpop.eup %5293 }
 0xa05   :  { %674 = vrot.lane.b32.xlu1 %v5294_v38, %s5517_s27 }
 0xa08   :  { %v5296_v40 = vpop.eup %5295 }
 0xa09   :  { %602 = vrot.lane.b32.xlu0 %v5296_v40, %s5516_s20 }
 0xa77   :  { %v675_v21 = vpop.permute.xlu1 %674 }
 0xa78   :  { %v677_v22 = vmul.f32 %v5290_v14, %v675_v21 }
 0xa7a   :  { %679 = vrot.lane.b32.xlu1 %v677_v22, %s5518_s15  ;;  %758 = vrot.lane.b32.xlu0 %v677_v22, %s5519_s16 }
 0xa7b   :  { %v603_v41 = vpop.permute.xlu0 %602 }
 0xa7c   :  { %v605_v42 = vmul.f32 %v5292_v17, %v603_v41 }
 0xa7e   :  { %686 = vrot.lane.b32.xlu1 %v605_v42, %s5522_s23 }
 0xaec   :  { %v680_v43 = vpop.permute.xlu1 %679  ;;  %v759_v44 = vpop.permute.xlu0 %758 }
 0xaed   :  { %v682_v45 = vsel %vm170_vm2, 0.0, %v680_v43  ;;  %v761_v46 = vsel %vm310_vm3, %v759_v44, 0.0 }
 0xaee   :  { %v683_v47 = vsel %vm172_vm4, %v682_v45, 0.0  ;;  %v762_v48 = vadd.f32 %v3931_v34, %v761_v46 }
 0xaef   :  { %v684_v49 = vadd.f32 %v5718_v39, %v683_v47 }
 0xaf0   :  { %v763_v50 = vpack.c.bf16 %v762_v48, %v762_v48  ;;  %v687_v51 = vpop.permute.xlu1 %686  ;;  %v5970_v48 = vld [vmem:[%s7094_s2 + $0x38] sm:$0xff]  }
 0xaf1   :  { %v689_v52 = vsel %vm170_vm2, %v687_v51, 0.0  ;;  %v6000_v51 = vld [vmem:[%s7094_s2 + $0x20] sm:$0xff]  }
 0xaf2   :  { %v690_v53 = vadd.f32 %v689_v52, %v684_v49  ;;  %4581 = vmatmul.mubr.bf16.vlgmr.msra.gmra.mxu0 %v763_v50  ;;  %v5980_v50 = vld [vmem:[%s7094_s2 + $0x30] sm:$0xff]  }
 0xaf3   :  { %4605 = vmatpush3.bf16.msra.mxu0 %v5568_v1  ;;  %4620 = vmatprep.mubr.msk.bf16.mxu0 %vm5514_vm0, %v5513_v0 }
 0xaf4   :  { %v691_v54 = vpack.c.bf16 %v690_v53, %v690_v53  ;;  %4606 = vmatprep.subr.bf16.mxu0 %v5513_v0 }
 0xaf6   :  { %4561 = vmatmul.mubr.bf16.vlgmr.msra.gmra.mxu1 %v691_v54 }
 0xaf7   :  { %4585 = vmatpush3.bf16.msra.mxu1 %v5655_v25  ;;  %4607 = vmatpush3.bf16.msra.mxu0 %v5579_v2 }
 0xaf8   :  { %4586 = vmatprep.subr.bf16.mxu1 %v5513_v0  ;;  %4608 = vmatprep.subr.bf16.mxu0 %v5513_v0 }
 0xaf9   :  { %4600 = vmatprep.mubr.msk.bf16.mxu1 %vm5514_vm0, %v5513_v0 }
 0xafb   :  { %4587 = vmatpush3.bf16.msra.mxu1 %v5661_v26  ;;  %4609 = vmatpush3.bf16.msra.mxu0 %v5588_v3 }
 0xafc   :  { %4588 = vmatprep.subr.bf16.mxu1 %v5513_v0  ;;  %4610 = vmatprep.subr.bf16.mxu0 %v5513_v0 }
 0xaff   :  { %4589 = vmatpush3.bf16.msra.mxu1 %v5668_v27  ;;  %4611 = vmatpush3.bf16.msra.mxu0 %v5597_v4 }
 0xb00   :  { %4590 = vmatprep.subr.bf16.mxu1 %v5513_v0  ;;  %4612 = vmatprep.subr.bf16.mxu0 %v5513_v0 }
 0xb03   :  { %4591 = vmatpush3.bf16.msra.mxu1 %v5676_v29  ;;  %4613 = vmatpush3.bf16.msra.mxu0 %v5606_v5 }
 0xb04   :  { %4592 = vmatprep.subr.bf16.mxu1 %v5513_v0  ;;  %4614 = vmatprep.subr.bf16.mxu0 %v5513_v0 }
 0xb07   :  { %4593 = vmatpush3.bf16.msra.mxu1 %v5683_v30  ;;  %4615 = vmatpush3.bf16.msra.mxu0 %v5615_v6 }
 0xb08   :  { %4594 = vmatprep.subr.bf16.mxu1 %v5513_v0  ;;  %4616 = vmatprep.subr.bf16.mxu0 %v5513_v0 }
 0xb0b   :  { %4595 = vmatpush3.bf16.msra.mxu1 %v5690_v31  ;;  %4617 = vmatpush3.bf16.msra.mxu0 %v5624_v7 }
 0xb0c   :  { %4596 = vmatprep.subr.bf16.mxu1 %v5513_v0  ;;  %4618 = vmatprep.subr.bf16.mxu0 %v5513_v0 }
 0xb0f   :  { %4597 = vmatpush3.bf16.msra.mxu1 %v5697_v32  ;;  %4619 = vmatpush3.bf16.msra.mxu0 %v5633_v8 }
 0xb10   :  { %4598 = vmatprep.subr.bf16.mxu1 %v5513_v0  ;;  %4644 = vmatprep.subr.bf16.mxu0 %v5513_v0 }
 0xb13   :  { %4599 = vmatpush3.bf16.msra.mxu1 %v5705_v33 }
 0xb14   :  { %4624 = vmatprep.subr.bf16.mxu1 %v5513_v0 }
 0xbb2   :  { %v798_v1 = vpop.f32.mrf.mxu0 }
 0xbb3   :  { %5297 = vtanh.f32 %v798_v1  ;;  %v3932_v57 = vmul.f32 -1.442695, %v798_v1 }
 0xbb4   :  { %v4582_v2 = vpop.f32.mrf.mxu0 }
 0xbb6   :  { %v726_v3 = vpop.f32.mrf.mxu1  ;;  %v801_v4 = vpop.f32.mrf.mxu0 }
 0xbb7   :  { %5299 = vtanh.f32 %v726_v3  ;;  %v3930_v58 = vmul.f32 -1.442695, %v726_v3 }
 0xbb8   :  { %v4562_v5 = vpop.f32.mrf.mxu1  ;;  %v4583_v6 = vpop.f32.mrf.mxu0  ;;  %5301 = vpow2.f32 %v3932_v57 }
 0xbb9   :  { %5303 = vpow2.f32 %v3930_v58 }
 0xbba   :  { %v729_v7 = vpop.f32.mrf.mxu1 }
 0xbbc   :  { %v4563_v55 = vpop.f32.mrf.mxu1 }
 0xbc0   :  { %v5298_v56 = vpop.eup %5297 }
 0xbc1   :  { %813 = vrot.lane.b32.xlu0 %v5298_v56, %s5515_s19 }
 0xbc4   :  { %v5300_v8 = vpop.eup %5299 }
 0xbc5   :  { %741 = vrot.lane.b32.xlu1 %v5300_v8, %s5520_s21  ;;  %v5302_v59 = vpop.eup %5301 }
 0xbc6   :  { %v807_v60 = vadd.f32 1.0, %v5302_v59  ;;  %v5304_v61 = vpop.eup %5303 }
 0xbc7   :  { %v735_v62 = vadd.f32 1.0, %v5304_v61 }
 0xbc8   :  { %5305 = vrcp.f32 %v807_v60 }
 0xbc9   :  { %5307 = vrcp.f32 %v735_v62 }
 0xbd5   :  { %v5306_v63 = vpop.eup %5305 }
 0xbd6   :  { %v5308_v11 = vpop.eup %5307  ;;  %v811_v14 = vmul.f32 %v5306_v63, %v5886_v24 }
 0xbd7   :  { %v739_v17 = vmul.f32 %v5308_v11, %v5890_v19  ;;  %v3934_v19 = vld [vmem:[%s7095_s0 + $0x28] sm:$0xff] }
 0xc33   :  { %v814_v9 = vpop.permute.xlu0 %813 }
 0xc34   :  { %v816_v10 = vmul.f32 %v5306_v63, %v814_v9 }
 0xc36   :  { %818 = vrot.lane.b32.xlu0 %v816_v10, %s5516_s20 }
 0xc37   :  { %v742_v12 = vpop.permute.xlu1 %741 }
 0xc38   :  { %v744_v13 = vmul.f32 %v5308_v11, %v742_v12 }
 0xc3a   :  { %746 = vrot.lane.b32.xlu1 %v744_v13, %s5521_s22 }
 0xca8   :  { %v819_v15 = vpop.permute.xlu0 %818 }
 0xca9   :  { %v5947_v16 = vadd.f32 %v819_v15, %v811_v14 }
 0xcab   :  { %5309 = vtanh.f32 %v5947_v16 }
 0xcac   :  { %v747_v18 = vpop.permute.xlu1 %746 }
 0xcad   :  { %v5951_v20 = vadd.f32 %v747_v18, %v739_v17 }
 0xcaf   :  { %5311 = vtanh.f32 %v5951_v20 }
 0xcb8   :  { %v5310_v23 = vpop.eup %5309 }
 0xcb9   :  { %824 = vrot.lane.b32.xlu0 %v5310_v23, %s5517_s27 }
 0xcbc   :  { %v5312_v28 = vpop.eup %5311 }
 0xcbd   :  { %752 = vrot.lane.b32.xlu1 %v5312_v28, %s5516_s20 }
 0xd2b   :  { %v825_v35 = vpop.permute.xlu0 %824 }
 0xd2c   :  { %v827_v24 = vmul.f32 %v5306_v63, %v825_v35 }
 0xd2e   :  { %829 = vrot.lane.b32.xlu0 %v827_v24, %s5518_s15  ;;  %908 = vrot.lane.b32.xlu1 %v827_v24, %s5519_s16 }
 0xd2f   :  { %v753_v36 = vpop.permute.xlu1 %752 }
 0xd30   :  { %v755_v38 = vmul.f32 %v5308_v11, %v753_v36 }
 0xd32   :  { %836 = vrot.lane.b32.xlu0 %v755_v38, %s5522_s23 }
 0xda0   :  { %v830_v40 = vpop.permute.xlu0 %829  ;;  %v909_v21 = vpop.permute.xlu1 %908 }
 0xda1   :  { %v832_v22 = vsel %vm170_vm2, 0.0, %v830_v40  ;;  %v911_v41 = vsel %vm310_vm3, %v909_v21, 0.0 }
 0xda2   :  { %v833_v42 = vsel %vm172_vm4, %v832_v22, 0.0  ;;  %v912_v34 = vadd.f32 %v3934_v19, %v911_v41 }
 0xda3   :  { %v834_v43 = vadd.f32 %v5718_v39, %v833_v42 }
 0xda4   :  { %v913_v44 = vpack.c.bf16 %v912_v34, %v912_v34  ;;  %v837_v45 = vpop.permute.xlu0 %836 }
 0xda5   :  { %v839_v46 = vsel %vm170_vm2, %v837_v45, 0.0  ;;  %v6095_v45 = vld [vmem:[%s7096_s3 + $0x28] sm:$0xff]  }
 0xda6   :  { %v840_v47 = vadd.f32 %v839_v46, %v834_v43  ;;  %4621 = vmatmul.mubr.bf16.vlgmr.msra.gmra.mxu0 %v913_v44  ;;  %v6075_v43 = vld [vmem:[%s7096_s3 + $0x38] sm:$0xff]   ;;  %v6086_v44 = vld [vmem:[%s7096_s3 + $0x30] sm:$0xff]   ;;  %v6104_v46 = vld [vmem:[%s7096_s3 + $0x20] sm:$0xff]  }
 0xda7   :  { %4645 = vmatpush3.bf16.msra.mxu0 %v5970_v48  ;;  %4660 = vmatprep.mubr.msk.bf16.mxu0 %vm5514_vm0, %v5513_v0 }
 0xda8   :  { %v841_v49 = vpack.c.bf16 %v840_v47, %v840_v47  ;;  %4646 = vmatprep.subr.bf16.mxu0 %v5513_v0  ;;  %v6113_v47 = vld [vmem:[%s7096_s3 + $0x18] sm:$0xff]  }
 0xdaa   :  { %4601 = vmatmul.mubr.bf16.vlgmr.msra.gmra.mxu1 %v841_v49  ;;  %v6131_v49 = vld [vmem:[%s7096_s3 + $0x8] sm:$0xff]  }
 0xdab   :  { %4625 = vmatpush3.bf16.msra.mxu1 %v5655_v25  ;;  %4647 = vmatpush3.bf16.msra.mxu0 %v5980_v50  ;;  %v5991_v25 = vld [vmem:[%s7094_s2 + $0x28] sm:$0xff]  }
 0xdac   :  { %4626 = vmatprep.subr.bf16.mxu1 %v5513_v0  ;;  %4648 = vmatprep.subr.bf16.mxu0 %v5513_v0 }
 0xdad   :  { %4640 = vmatprep.mubr.msk.bf16.mxu1 %vm5514_vm0, %v5513_v0 }
 0xdaf   :  { %4627 = vmatpush3.bf16.msra.mxu1 %v5661_v26  ;;  %4649 = vmatpush3.bf16.msra.mxu0 %v5991_v25  ;;  %v6009_v26 = vld [vmem:[%s7094_s2 + $0x18] sm:$0xff]  }
 0xdb0   :  { %4628 = vmatprep.subr.bf16.mxu1 %v5513_v0  ;;  %4650 = vmatprep.subr.bf16.mxu0 %v5513_v0 }
 0xdb3   :  { %4629 = vmatpush3.bf16.msra.mxu1 %v5668_v27  ;;  %4651 = vmatpush3.bf16.msra.mxu0 %v6000_v51  ;;  %v6018_v27 = vld [vmem:[%s7094_s2 + $0x10] sm:$0xff]  }
 0xdb4   :  { %4630 = vmatprep.subr.bf16.mxu1 %v5513_v0  ;;  %4652 = vmatprep.subr.bf16.mxu0 %v5513_v0 }
 0xdb7   :  { %4631 = vmatpush3.bf16.msra.mxu1 %v5676_v29  ;;  %4653 = vmatpush3.bf16.msra.mxu0 %v6009_v26  ;;  %v6027_v29 = vld [vmem:[%s7094_s2 + $0x8] sm:$0xff]  }
 0xdb8   :  { %4632 = vmatprep.subr.bf16.mxu1 %v5513_v0  ;;  %4654 = vmatprep.subr.bf16.mxu0 %v5513_v0 }
 0xdbb   :  { %4633 = vmatpush3.bf16.msra.mxu1 %v5683_v30  ;;  %4655 = vmatpush3.bf16.msra.mxu0 %v6018_v27  ;;  %v6036_v30 = vld [vmem:[%s7094_s2] sm:$0xff]  }
 0xdbc   :  { %4634 = vmatprep.subr.bf16.mxu1 %v5513_v0  ;;  %4656 = vmatprep.subr.bf16.mxu0 %v5513_v0 }
 0xdbf   :  { %4635 = vmatpush3.bf16.msra.mxu1 %v5690_v31  ;;  %4657 = vmatpush3.bf16.msra.mxu0 %v6027_v29 }
 0xdc0   :  { %4636 = vmatprep.subr.bf16.mxu1 %v5513_v0  ;;  %4658 = vmatprep.subr.bf16.mxu0 %v5513_v0 }
 0xdc3   :  { %4637 = vmatpush3.bf16.msra.mxu1 %v5697_v32  ;;  %4659 = vmatpush3.bf16.msra.mxu0 %v6036_v30 }
 0xdc4   :  { %4638 = vmatprep.subr.bf16.mxu1 %v5513_v0  ;;  %4684 = vmatprep.subr.bf16.mxu0 %v5513_v0 }
 0xdc7   :  { %4639 = vmatpush3.bf16.msra.mxu1 %v5705_v33 }
 0xdc8   :  { %4664 = vmatprep.subr.bf16.mxu1 %v5513_v0 }
 0xe66   :  { %v948_v31 = vpop.f32.mrf.mxu0 }
 0xe67   :  { %5313 = vtanh.f32 %v948_v31  ;;  %v3935_v6 = vmul.f32 -1.442695, %v948_v31 }
 0xe68   :  { %v4622_v52 = vpop.f32.mrf.mxu0 }
 0xe6a   :  { %v876_v53 = vpop.f32.mrf.mxu1  ;;  %v951_v32 = vpop.f32.mrf.mxu0 }
 0xe6b   :  { %5315 = vtanh.f32 %v876_v53  ;;  %v3933_v33 = vmul.f32 -1.442695, %v876_v53 }
 0xe6c   :  { %v4602_v54 = vpop.f32.mrf.mxu1  ;;  %v4623_v1 = vpop.f32.mrf.mxu0  ;;  %5317 = vpow2.f32 %v3935_v6 }
 0xe6d   :  { %5319 = vpow2.f32 %v3933_v33 }
 0xe6e   :  { %v879_v2 = vpop.f32.mrf.mxu1 }
 0xe70   :  { %v4603_v3 = vpop.f32.mrf.mxu1 }
 0xe74   :  { %v5314_v4 = vpop.eup %5313 }
 0xe75   :  { %963 = vrot.lane.b32.xlu1 %v5314_v4, %s5515_s19 }
 0xe78   :  { %v5316_v5 = vpop.eup %5315 }
 0xe79   :  { %891 = vrot.lane.b32.xlu0 %v5316_v5, %s5520_s21  ;;  %v5318_v7 = vpop.eup %5317 }
 0xe7a   :  { %v957_v55 = vadd.f32 1.0, %v5318_v7  ;;  %v5320_v56 = vpop.eup %5319 }
 0xe7b   :  { %v885_v8 = vadd.f32 1.0, %v5320_v56 }
 0xe7c   :  { %5321 = vrcp.f32 %v957_v55 }
 0xe7d   :  { %5323 = vrcp.f32 %v885_v8 }
 0xe89   :  { %v5322_v57 = vpop.eup %5321 }
 0xe8a   :  { %v5324_v60 = vpop.eup %5323  ;;  %v961_v63 = vmul.f32 %v5322_v57, %v5947_v16 }
 0xe8b   :  { %v889_v11 = vmul.f32 %v5324_v60, %v5951_v20  ;;  %v3937_v20 = vld [vmem:[%s7095_s0 + $0x30] sm:$0xff] }
 0xee7   :  { %v964_v58 = vpop.permute.xlu1 %963 }
 0xee8   :  { %v966_v59 = vmul.f32 %v5322_v57, %v964_v58 }
 0xeea   :  { %968 = vrot.lane.b32.xlu1 %v966_v59, %s5516_s20 }
 0xeeb   :  { %v892_v61 = vpop.permute.xlu0 %891 }
 0xeec   :  { %v894_v62 = vmul.f32 %v5324_v60, %v892_v61 }
 0xeee   :  { %896 = vrot.lane.b32.xlu0 %v894_v62, %s5521_s22 }
 0xf5c   :  { %v969_v9 = vpop.permute.xlu1 %968 }
 0xf5d   :  { %v6048_v10 = vadd.f32 %v969_v9, %v961_v63 }
 0xf5f   :  { %5325 = vtanh.f32 %v6048_v10 }
 0xf60   :  { %v897_v12 = vpop.permute.xlu0 %896 }
 0xf61   :  { %v6052_v13 = vadd.f32 %v897_v12, %v889_v11 }
 0xf63   :  { %5327 = vtanh.f32 %v6052_v13 }
 0xf6c   :  { %v5326_v14 = vpop.eup %5325 }
 0xf6d   :  { %974 = vrot.lane.b32.xlu1 %v5326_v14, %s5517_s27 }
 0xf70   :  { %v5328_v15 = vpop.eup %5327 }
 0xf71   :  { %902 = vrot.lane.b32.xlu0 %v5328_v15, %s5516_s20 }
 0xfdf   :  { %v975_v17 = vpop.permute.xlu1 %974 }
 0xfe0   :  { %v977_v16 = vmul.f32 %v5322_v57, %v975_v17 }
 0xfe2   :  { %979 = vrot.lane.b32.xlu1 %v977_v16, %s5518_s15  ;;  %1058 = vrot.lane.b32.xlu0 %v977_v16, %s5519_s16 }
 0xfe3   :  { %v903_v18 = vpop.permute.xlu0 %902 }
 0xfe4   :  { %v905_v23 = vmul.f32 %v5324_v60, %v903_v18 }
 0xfe6   :  { %986 = vrot.lane.b32.xlu1 %v905_v23, %s5522_s23 }
0x1054   :  { %v980_v28 = vpop.permute.xlu1 %979  ;;  %v1059_v35 = vpop.permute.xlu0 %1058 }
0x1055   :  { %v982_v24 = vsel %vm170_vm2, 0.0, %v980_v28  ;;  %v1061_v36 = vsel %vm310_vm3, %v1059_v35, 0.0 }
0x1056   :  { %v983_v38 = vsel %vm172_vm4, %v982_v24, 0.0  ;;  %v1062_v19 = vadd.f32 %v3937_v20, %v1061_v36 }
0x1057   :  { %v984_v40 = vadd.f32 %v5718_v39, %v983_v38 }
0x1058   :  { %v1063_v21 = vpack.c.bf16 %v1062_v19, %v1062_v19  ;;  %v987_v22 = vpop.permute.xlu1 %986 }
0x1059   :  { %v989_v41 = vsel %vm170_vm2, %v987_v22, 0.0 }
0x105a   :  { %v990_v42 = vadd.f32 %v989_v41, %v984_v40  ;;  %4661 = vmatmul.mubr.bf16.vlgmr.msra.gmra.mxu0 %v1063_v21 }
0x105b   :  { %4685 = vmatpush3.bf16.msra.mxu0 %v5970_v48  ;;  %4700 = vmatprep.mubr.msk.bf16.mxu0 %vm5514_vm0, %v5513_v0  ;;  %v6122_v48 = vld [vmem:[%s7096_s3 + $0x10] sm:$0xff]  }
0x105c   :  { %v991_v34 = vpack.c.bf16 %v990_v42, %v990_v42  ;;  %4686 = vmatprep.subr.bf16.mxu0 %v5513_v0 }
0x105e   :  { %4641 = vmatmul.mubr.bf16.vlgmr.msra.gmra.mxu1 %v991_v34 }
0x105f   :  { %4665 = vmatpush3.bf16.msra.mxu1 %v6075_v43  ;;  %4687 = vmatpush3.bf16.msra.mxu0 %v5980_v50  ;;  %v6140_v50 = vld [vmem:[%s7096_s3] sm:$0xff]  }
0x1060   :  { %4666 = vmatprep.subr.bf16.mxu1 %v5513_v0  ;;  %4688 = vmatprep.subr.bf16.mxu0 %v5513_v0 }
0x1061   :  { %4680 = vmatprep.mubr.msk.bf16.mxu1 %vm5514_vm0, %v5513_v0 }
0x1063   :  { %4667 = vmatpush3.bf16.msra.mxu1 %v6086_v44  ;;  %4689 = vmatpush3.bf16.msra.mxu0 %v5991_v25 }
0x1064   :  { %4668 = vmatprep.subr.bf16.mxu1 %v5513_v0  ;;  %4690 = vmatprep.subr.bf16.mxu0 %v5513_v0 }
0x1067   :  { %4669 = vmatpush3.bf16.msra.mxu1 %v6095_v45  ;;  %4691 = vmatpush3.bf16.msra.mxu0 %v6000_v51 }
0x1068   :  { %4670 = vmatprep.subr.bf16.mxu1 %v5513_v0  ;;  %4692 = vmatprep.subr.bf16.mxu0 %v5513_v0 }
0x106b   :  { %4671 = vmatpush3.bf16.msra.mxu1 %v6104_v46  ;;  %4693 = vmatpush3.bf16.msra.mxu0 %v6009_v26 }
0x106c   :  { %4672 = vmatprep.subr.bf16.mxu1 %v5513_v0  ;;  %4694 = vmatprep.subr.bf16.mxu0 %v5513_v0 }
0x106f   :  { %4673 = vmatpush3.bf16.msra.mxu1 %v6113_v47  ;;  %4695 = vmatpush3.bf16.msra.mxu0 %v6018_v27 }
0x1070   :  { %4674 = vmatprep.subr.bf16.mxu1 %v5513_v0  ;;  %4696 = vmatprep.subr.bf16.mxu0 %v5513_v0 }
0x1073   :  { %4675 = vmatpush3.bf16.msra.mxu1 %v6122_v48  ;;  %4697 = vmatpush3.bf16.msra.mxu0 %v6027_v29 }
0x1074   :  { %4676 = vmatprep.subr.bf16.mxu1 %v5513_v0  ;;  %4698 = vmatprep.subr.bf16.mxu0 %v5513_v0 }
0x1077   :  { %4677 = vmatpush3.bf16.msra.mxu1 %v6131_v49  ;;  %4699 = vmatpush3.bf16.msra.mxu0 %v6036_v30 }
0x1078   :  { %4678 = vmatprep.subr.bf16.mxu1 %v5513_v0  ;;  %4724 = vmatprep.subr.mxu0 %v5513_v0 }
0x107b   :  { %4679 = vmatpush3.bf16.msra.mxu1 %v6140_v50 }
0x107c   :  { %4704 = vmatprep.subr.bf16.mxu1 %v5513_v0 }
0x111a   :  { %v1098_v25 = vpop.f32.mrf.mxu0 }
0x111b   :  { %5329 = vtanh.f32 %v1098_v25  ;;  %v3938_v54 = vmul.f32 -1.442695, %v1098_v25 }
0x111c   :  { %v4662_v51 = vpop.f32.mrf.mxu0 }
0x111e   :  { %v1026_v26 = vpop.f32.mrf.mxu1  ;;  %v1101_v27 = vpop.f32.mrf.mxu0 }
0x111f   :  { %5331 = vtanh.f32 %v1026_v26  ;;  %v3936_v1 = vmul.f32 -1.442695, %v1026_v26 }
0x1120   :  { %v4642_v29 = vpop.f32.mrf.mxu1  ;;  %v4663_v30 = vpop.f32.mrf.mxu0  ;;  %5333 = vpow2.f32 %v3938_v54 }
0x1121   :  { %5335 = vpow2.f32 %v3936_v1 }
0x1122   :  { %v1029_v31 = vpop.f32.mrf.mxu1 }
0x1124   :  { %v4643_v52 = vpop.f32.mrf.mxu1 }
0x1128   :  { %v5330_v53 = vpop.eup %5329 }
0x1129   :  { %1113 = vrot.lane.b32.xlu0 %v5330_v53, %s5515_s19 }
0x112c   :  { %v5332_v32 = vpop.eup %5331 }
0x112d   :  { %1041 = vrot.lane.b32.xlu1 %v5332_v32, %s5520_s21  ;;  %v5334_v2 = vpop.eup %5333 }
0x112e   :  { %v1107_v3 = vadd.f32 1.0, %v5334_v2  ;;  %v5336_v4 = vpop.eup %5335 }
0x112f   :  { %v1035_v5 = vadd.f32 1.0, %v5336_v4 }
0x1130   :  { %5337 = vrcp.f32 %v1107_v3 }
0x1131   :  { %5339 = vrcp.f32 %v1035_v5 }
0x113d   :  { %v5338_v6 = vpop.eup %5337 }
0x113e   :  { %v5340_v55 = vpop.eup %5339  ;;  %v1111_v57 = vmul.f32 %v5338_v6, %v6048_v10 }
0x113f   :  { %v1039_v60 = vmul.f32 %v5340_v55, %v6052_v13  ;;  %v3940_v13 = vld [vmem:[%s7095_s0 + $0x38] sm:$0xff] }
0x119b   :  { %v1114_v33 = vpop.permute.xlu0 %1113 }
0x119c   :  { %v1116_v7 = vmul.f32 %v5338_v6, %v1114_v33 }
0x119e   :  { %1118 = vrot.lane.b32.xlu0 %v1116_v7, %s5516_s20 }
0x119f   :  { %v1042_v56 = vpop.permute.xlu1 %1041 }
0x11a0   :  { %v1044_v8 = vmul.f32 %v5340_v55, %v1042_v56 }
0x11a2   :  { %1046 = vrot.lane.b32.xlu1 %v1044_v8, %s5521_s22 }
0x1210   :  { %v1119_v58 = vpop.permute.xlu0 %1118 }
0x1211   :  { %v6149_v59 = vadd.f32 %v1119_v58, %v1111_v57 }
0x1213   :  { %5341 = vtanh.f32 %v6149_v59 }
0x1214   :  { %v1047_v61 = vpop.permute.xlu1 %1046 }
0x1215   :  { %v6153_v62 = vadd.f32 %v1047_v61, %v1039_v60 }
0x1217   :  { %5343 = vtanh.f32 %v6153_v62 }
0x1220   :  { %v5342_v63 = vpop.eup %5341 }
0x1221   :  { %1124 = vrot.lane.b32.xlu0 %v5342_v63, %s5517_s27 }
0x1224   :  { %v5344_v9 = vpop.eup %5343 }
0x1225   :  { %1052 = vrot.lane.b32.xlu1 %v5344_v9, %s5516_s20 }
0x1293   :  { %v1125_v11 = vpop.permute.xlu0 %1124 }
0x1294   :  { %v1127_v10 = vmul.f32 %v5338_v6, %v1125_v11 }
0x1296   :  { %1129 = vrot.lane.b32.xlu0 %v1127_v10, %s5518_s15  ;;  %1208 = vrot.lane.b32.xlu1 %v1127_v10, %s5519_s16 }
0x1297   :  { %v1053_v12 = vpop.permute.xlu1 %1052 }
0x1298   :  { %v1055_v14 = vmul.f32 %v5340_v55, %v1053_v12 }
0x129a   :  { %1136 = vrot.lane.b32.xlu0 %v1055_v14, %s5522_s23 }
0x1308   :  { %v1130_v15 = vpop.permute.xlu0 %1129  ;;  %v1209_v17 = vpop.permute.xlu1 %1208 }
0x1309   :  { %v1132_v16 = vsel %vm170_vm2, 0.0, %v1130_v15  ;;  %v1211_v18 = vsel %vm310_vm3, %v1209_v17, 0.0 }
0x130a   :  { %v1133_v23 = vsel %vm172_vm4, %v1132_v16, 0.0  ;;  %v1212_v20 = vadd.f32 %v3940_v13, %v1211_v18 }
0x130b   :  { %v1134_v28 = vadd.f32 %v5718_v39, %v1133_v23 }
0x130c   :  { %v1213_v35 = vpack.c.bf16 %v1212_v20, %v1212_v20  ;;  %v1137_v24 = vpop.permute.xlu0 %1136 }
0x130d   :  { %v1139_v36 = vsel %vm170_vm2, %v1137_v24, 0.0 }
0x130e   :  { %v1140_v38 = vadd.f32 %v1139_v36, %v1134_v28  ;;  %4701 = vmatmul.mubr.bf16.vlgmr.msra.gmra.mxu0 %v1213_v35 }
0x130f   :  { %4726 = vmatprep.mubr.msk.f32.mxu0 %vm5514_vm0, %v5513_v0 }
0x1310   :  { %v1141_v19 = vpack.c.bf16 %v1140_v38, %v1140_v38 }
0x1312   :  { %4681 = vmatmul.mubr.bf16.vlgmr.msra.gmra.mxu1 %v1141_v19  ;;  %v1362_v19 = vld [vmem:[%s7098_s1] sm:$0xff] }
0x1313   :  { %4705 = vmatpush3.bf16.msra.mxu1 %v6075_v43  ;;  %4720 = vmatprep.mubr.msk.bf16.mxu1 %vm5514_vm0, %v5513_v0 }
0x1314   :  { %4706 = vmatprep.subr.bf16.mxu1 %v5513_v0 }
0x1317   :  { %4707 = vmatpush3.bf16.msra.mxu1 %v6086_v44 }
0x1318   :  { %4708 = vmatprep.subr.bf16.mxu1 %v5513_v0 }
0x131b   :  { %4709 = vmatpush3.bf16.msra.mxu1 %v6095_v45 }
0x131c   :  { %4710 = vmatprep.subr.bf16.mxu1 %v5513_v0 }
0x131f   :  { %4711 = vmatpush3.bf16.msra.mxu1 %v6104_v46 }
0x1320   :  { %4712 = vmatprep.subr.bf16.mxu1 %v5513_v0 }
0x1323   :  { %4713 = vmatpush3.bf16.msra.mxu1 %v6113_v47 }
0x1324   :  { %4714 = vmatprep.subr.bf16.mxu1 %v5513_v0 }
0x1327   :  { %4715 = vmatpush3.bf16.msra.mxu1 %v6122_v48 }
0x1328   :  { %4716 = vmatprep.subr.bf16.mxu1 %v5513_v0 }
0x132b   :  { %4717 = vmatpush3.bf16.msra.mxu1 %v6131_v49 }
0x132c   :  { %4718 = vmatprep.subr.bf16.mxu1 %v5513_v0 }
0x132f   :  { %4719 = vmatpush3.bf16.msra.mxu1 %v6140_v50 }
0x1330   :  { %4754 = vmatprep.subr.bf16.mxu1 %v5513_v0 }
0x13ce   :  { %v1248_v40 = vpop.f32.mrf.mxu0 }
0x13cf   :  { %5345 = vtanh.f32 %v1248_v40  ;;  %v3941_v47 = vmul.f32 -1.442695, %v1248_v40 }
0x13d0   :  { %v4702_v21 = vpop.f32.mrf.mxu0 }
0x13d1   :  { %v3945_v21 = vld [vmem:[%s7098_s1 + $0x8] sm:$0xff] }
0x13d2   :  { %v1176_v22 = vpop.f32.mrf.mxu1  ;;  %v1251_v41 = vpop.f32.mrf.mxu0 }
0x13d3   :  { %5347 = vtanh.f32 %v1176_v22  ;;  %v3939_v48 = vmul.f32 -1.442695, %v1176_v22  ;;  %v5105_v22 = vld [vmem:[%s7097_s4 + $0x38] sm:$0xff]   ;;  %v5106_v41 = vld [vmem:[%s7097_s4 + $0x30] sm:$0xff]  }
0x13d4   :  { %v4682_v42 = vpop.f32.mrf.mxu1  ;;  %v4703_v34 = vpop.f32.mrf.mxu0  ;;  %5349 = vpow2.f32 %v3941_v47  ;;  %v6260_v47 = vsel %vm32_vm5, 1.0, %v5513_v0 }
0x13d5   :  { %5351 = vpow2.f32 %v3939_v48  ;;  %v5107_v42 = vld [vmem:[%s7097_s4 + $0x28] sm:$0xff]   ;;  %v5108_v34 = vld [vmem:[%s7097_s4 + $0x20] sm:$0xff]  }
0x13d6   :  { %v1179_v43 = vpop.f32.mrf.mxu1 }
0x13d7   :  { %v5109_v43 = vld [vmem:[%s7097_s4 + $0x18] sm:$0xff]  }
0x13d8   :  { %v4683_v44 = vpop.f32.mrf.mxu1 }
0x13d9   :  { %v5110_v44 = vld [vmem:[%s7097_s4 + $0x10] sm:$0xff]  }
0x13dc   :  { %v5346_v45 = vpop.eup %5345 }
0x13dd   :  { %1263 = vrot.lane.b32.xlu1 %v5346_v45, %s5515_s19  ;;  %v5111_v45 = vld [vmem:[%s7097_s4 + $0x8] sm:$0xff]  }
0x13e0   :  { %v5348_v46 = vpop.eup %5347 }
0x13e1   :  { %1191 = vrot.lane.b32.xlu0 %v5348_v46, %s5520_s21  ;;  %v5350_v49 = vpop.eup %5349  ;;  %v5112_v46 = vld [vmem:[%s7097_s4] sm:$0xff]  }
0x13e2   :  { %v1257_v50 = vadd.f32 1.0, %v5350_v49  ;;  %v5352_v25 = vpop.eup %5351 }
0x13e3   :  { %v1185_v51 = vadd.f32 1.0, %v5352_v25 }
0x13e4   :  { %5353 = vrcp.f32 %v1257_v50 }
0x13e5   :  { %5355 = vrcp.f32 %v1185_v51 }
0x13f1   :  { %v5354_v26 = vpop.eup %5353 }
0x13f2   :  { %v5356_v30 = vpop.eup %5355  ;;  %v1261_v53 = vmul.f32 %v5354_v26, %v6149_v59 }
0x13f3   :  { %v1189_v1 = vmul.f32 %v5356_v30, %v6153_v62 }
0x144f   :  { %v1264_v27 = vpop.permute.xlu1 %1263 }
0x1450   :  { %v1266_v29 = vmul.f32 %v5354_v26, %v1264_v27 }
0x1452   :  { %1268 = vrot.lane.b32.xlu1 %v1266_v29, %s5516_s20 }
0x1453   :  { %v1192_v31 = vpop.permute.xlu0 %1191 }
0x1454   :  { %v1194_v52 = vmul.f32 %v5356_v30, %v1192_v31 }
0x1456   :  { %1196 = vrot.lane.b32.xlu0 %v1194_v52, %s5521_s22 }
0x14c4   :  { %v1269_v32 = vpop.permute.xlu1 %1268 }
0x14c5   :  { %v1271_v54 = vadd.f32 %v1269_v32, %v1261_v53 }
0x14c7   :  { %5357 = vtanh.f32 %v1271_v54 }
0x14c8   :  { %v1197_v2 = vpop.permute.xlu0 %1196 }
0x14c9   :  { %v1199_v3 = vadd.f32 %v1197_v2, %v1189_v1 }
0x14cb   :  { %5359 = vtanh.f32 %v1199_v3 }
0x14d4   :  { %v5358_v4 = vpop.eup %5357 }
0x14d5   :  { %1274 = vrot.lane.b32.xlu1 %v5358_v4, %s5517_s27 }
0x14d8   :  { %v5360_v5 = vpop.eup %5359 }
0x14d9   :  { %1202 = vrot.lane.b32.xlu0 %v5360_v5, %s5516_s20 }
0x1547   :  { %v1275_v6 = vpop.permute.xlu1 %1274 }
0x1548   :  { %v1277_v33 = vmul.f32 %v5354_v26, %v1275_v6  ;;  %v5113_v6 = vld [vmem:[%s7097_s4 + $0x38] sm:$0xff]  }
0x154a   :  { %1279 = vrot.lane.b32.xlu1 %v1277_v33, %s5518_s15  ;;  %v5114_v33 = vld [vmem:[%s7099_s5 + $0x38] sm:$0xff]  }
0x154b   :  { %v1203_v7 = vpop.permute.xlu0 %1202 }
0x154c   :  { %v1205_v55 = vmul.f32 %v5356_v30, %v1203_v7  ;;  %v5115_v7 = vld [vmem:[%s7097_s4 + $0x30] sm:$0xff]  }
0x154e   :  { %1286 = vrot.lane.b32.xlu0 %v1205_v55, %s5522_s23  ;;  %v5116_v55 = vld [vmem:[%s7099_s5 + $0x30] sm:$0xff]  }
0x15bc   :  { %v1280_v56 = vpop.permute.xlu1 %1279 }
0x15bd   :  { %v1282_v8 = vsel %vm170_vm2, 0.0, %v1280_v56  ;;  %v5117_v56 = vld [vmem:[%s7097_s4 + $0x28] sm:$0xff]  }
0x15be   :  { %v1283_v57 = vsel %vm172_vm4, %v1282_v8, 0.0  ;;  %v5118_v8 = vld [vmem:[%s7099_s5 + $0x28] sm:$0xff]  }
0x15bf   :  { %v1284_v58 = vadd.f32 %v5718_v39, %v1283_v57  ;;  %v5119_v57 = vld [vmem:[%s7097_s4 + $0x20] sm:$0xff]  }
0x15c0   :  { %v1287_v59 = vpop.permute.xlu0 %1286 }
0x15c1   :  { %v1289_v60 = vsel %vm170_vm2, %v1287_v59, 0.0 }
0x15c2   :  { %v1290_v61 = vadd.f32 %v1289_v60, %v1284_v58  ;;  %v5120_v58 = vld [vmem:[%s7099_s5 + $0x20] sm:$0xff]   ;;  %v5121_v60 = vld [vmem:[%s7097_s4 + $0x18] sm:$0xff]  }
0x15c4   :  { %v1291_v62 = vpack.c.bf16 %v1290_v61, %v1290_v61  ;;  %v5122_v61 = vld [vmem:[%s7099_s5 + $0x18] sm:$0xff]  }
0x15c6   :  { %4721 = vmatmul.mubr.bf16.vlgmr.msra.gmra.mxu1 %v1291_v62  ;;  %v5123_v62 = vld [vmem:[%s7097_s4 + $0x10] sm:$0xff]  }
0x15c7   :  { %4770 = vmatprep.mubr.msk.bf16.mxu1 %vm5514_vm0, %v5513_v0  ;;  %4755 = vmatpush3.bf16.msra.mxu1 %v5114_v33 }
0x15c8   :  { %4756 = vmatprep.subr.bf16.mxu1 %v5513_v0 }
0x15cb   :  { %4757 = vmatpush3.bf16.msra.mxu1 %v5116_v55  ;;  %v5134_v55 = vld [vmem:[%s7099_s5 + $0x28] sm:$0xff]  }
0x15cc   :  { %4758 = vmatprep.subr.bf16.mxu1 %v5513_v0 }
0x15cf   :  { %4759 = vmatpush3.bf16.msra.mxu1 %v5118_v8  ;;  %v5135_v8 = vld [vmem:[%s7097_s4 + $0x20] sm:$0xff]  }
0x15d0   :  { %4760 = vmatprep.subr.bf16.mxu1 %v5513_v0 }
0x15d3   :  { %4761 = vmatpush3.bf16.msra.mxu1 %v5120_v58  ;;  %v5137_v58 = vld [vmem:[%s7097_s4 + $0x18] sm:$0xff]  }
0x15d4   :  { %4762 = vmatprep.subr.bf16.mxu1 %v5513_v0 }
0x15d7   :  { %4763 = vmatpush3.bf16.msra.mxu1 %v5122_v61  ;;  %v5140_v61 = vld [vmem:[%s7099_s5 + $0x10] sm:$0xff]  }
0x15d8   :  { %4764 = vmatprep.subr.bf16.mxu1 %v5513_v0 }
0x1686   :  { %v1326_v63 = vpop.f32.mrf.mxu1 }
0x1687   :  { %5361 = vtanh.f32 %v1326_v63  ;;  %v3942_v14 = vmul.f32 -1.442695, %v1326_v63  ;;  %v5124_v63 = vld [vmem:[%s7099_s5 + $0x10] sm:$0xff]  }
0x1688   :  { %v4722_v9 = vpop.f32.mrf.mxu1  ;;  %4765 = vmatpush3.bf16.msra.mxu1 %v5124_v63  ;;  %v5142_v63 = vld [vmem:[%s7099_s5 + $0x8] sm:$0xff]  }
0x1689   :  { %5363 = vpow2.f32 %v3942_v14  ;;  %v5125_v9 = vld [vmem:[%s7097_s4 + $0x8] sm:$0xff]   ;;  %4766 = vmatprep.subr.bf16.mxu1 %v5513_v0 }
0x168a   :  { %v1329_v11 = vpop.f32.mrf.mxu1 }
0x168b   :  { %v5126_v11 = vld [vmem:[%s7099_s5 + $0x8] sm:$0xff]  }
0x168c   :  { %v4723_v10 = vpop.f32.mrf.mxu1  ;;  %4767 = vmatpush3.bf16.msra.mxu1 %v5126_v11  ;;  %v5144_v11 = vld [vmem:[%s7099_s5] sm:$0xff]  }
0x168d   :  { %4768 = vmatprep.subr.bf16.mxu1 %v5513_v0  ;;  %v5127_v10 = vld [vmem:[%s7097_s4] sm:$0xff]  }
0x1694   :  { %v5362_v12 = vpop.eup %5361 }
0x1695   :  { %1341 = vrot.lane.b32.xlu1 %v5362_v12, %s5520_s21  ;;  %v5128_v12 = vld [vmem:[%s7099_s5] sm:$0xff]  }
0x1696   :  { %v5364_v13 = vpop.eup %5363  ;;  %4769 = vmatpush3.bf16.msra.mxu1 %v5128_v12 }
0x1697   :  { %v1335_v15 = vadd.f32 1.0, %v5364_v13  ;;  %4794 = vmatprep.subr.bf16.mxu1 %v5513_v0 }
0x1699   :  { %5365 = vrcp.f32 %v1335_v15 }
0x16a6   :  { %v5366_v17 = vpop.eup %5365 }
0x16a7   :  { %v1339_v23 = vmul.f32 %v5366_v17, %v1199_v3 }
0x1707   :  { %v1342_v16 = vpop.permute.xlu1 %1341 }
0x1708   :  { %v1344_v18 = vmul.f32 %v5366_v17, %v1342_v16 }
0x170a   :  { %1346 = vrot.lane.b32.xlu0 %v1344_v18, %s5521_s22 }
0x177c   :  { %v1347_v20 = vpop.permute.xlu0 %1346 }
0x177d   :  { %v1349_v28 = vadd.f32 %v1347_v20, %v1339_v23 }
0x177f   :  { %5367 = vtanh.f32 %v1349_v28 }
0x178c   :  { %v5368_v35 = vpop.eup %5367 }
0x178d   :  { %1352 = vrot.lane.b32.xlu1 %v5368_v35, %s5516_s20 }
0x17ff   :  { %v1353_v24 = vpop.permute.xlu1 %1352 }
0x1800   :  { %v1355_v36 = vmul.f32 %v5366_v17, %v1353_v24 }
0x1802   :  { %1357 = vrot.lane.b32.xlu0 %v1355_v36, %s5520_s21 }
0x1874   :  { %v1358_v38 = vpop.permute.xlu0 %1357 }
0x1875   :  { %v1360_v40 = vsel %vm170_vm2, 0.0, %v1358_v38 }
0x1876   :  { %4725 = vmatpush3.msk.msra.mxu0 %vm310_vm3, %v1360_v40 }
0x1877   :  { %4727 = vmatmul.mubr.msk.f32.vlgmr.msra.gmra.mxu0 %vm170_vm2, %v1362_v19  ;;  %4729 = vmatprep.subr.mxu0 %v5513_v0 }
0x1878   :  { %4730 = vmatpush3.msk.msra.mxu0 %vm310_vm3, %v1360_v40  ;;  %4731 = vmatprep.mubr.msk.f32.mxu0 %vm5514_vm0, %v5513_v0 }
0x1879   :  { %4734 = vmatprep.subr.bf16.mxu0 %v5513_v0 }
0x187b   :  { %4732 = vmatmul.mubr.msk.f32.vlgmr.msra.gmra.mxu0 %vm170_vm2, %v3945_v21 }
0x187c   :  { %4735 = vmatpush3.bf16.msra.mxu0 %v5105_v22  ;;  %4750 = vmatprep.mubr.msk.bf16.mxu0 %vm5514_vm0, %v5513_v0 }
0x187d   :  { %4736 = vmatprep.subr.bf16.mxu0 %v5513_v0 }
0x1880   :  { %4737 = vmatpush3.bf16.msra.mxu0 %v5106_v41 }
0x1881   :  { %4738 = vmatprep.subr.bf16.mxu0 %v5513_v0 }
0x1884   :  { %4739 = vmatpush3.bf16.msra.mxu0 %v5107_v42 }
0x1885   :  { %4740 = vmatprep.subr.bf16.mxu0 %v5513_v0 }
0x1888   :  { %4741 = vmatpush3.bf16.msra.mxu0 %v5108_v34 }
0x1889   :  { %4742 = vmatprep.subr.bf16.mxu0 %v5513_v0 }
0x188c   :  { %4743 = vmatpush3.bf16.msra.mxu0 %v5109_v43 }
0x188d   :  { %4744 = vmatprep.subr.bf16.mxu0 %v5513_v0 }
0x1890   :  { %4745 = vmatpush3.bf16.msra.mxu0 %v5110_v44 }
0x1891   :  { %4746 = vmatprep.subr.bf16.mxu0 %v5513_v0 }
0x1894   :  { %4747 = vmatpush3.bf16.msra.mxu0 %v5111_v45 }
0x1895   :  { %4748 = vmatprep.subr.bf16.mxu0 %v5513_v0 }
0x1898   :  { %4749 = vmatpush3.bf16.msra.mxu0 %v5112_v46 }
0x1899   :  { %4774 = vmatprep.subr.bf16.mxu0 %v5513_v0 }
0x1937   :  { %v1432_v48 = vpop.f32.mrf.mxu0 }
0x1938   :  { %v6263_v49 = vadd.f32 %v6260_v47, %v1432_v48 }
0x1939   :  { %v4728_v50 = vpop.f32.mrf.mxu0 }
0x193a   :  { %v1516_v25 = vpack.c.bf16 %v6263_v49, %v6263_v49 }
0x193b   :  { %v6267_v51 = vpop.f32.mrf.mxu0 }
0x193c   :  { %4751 = vmatmul.mubr.bf16.vlgmr.msra.gmra.mxu0 %v1516_v25  ;;  %v6345_v15 = vadd.f32 %v6260_v47, %v6267_v51 }
0x193d   :  { %v4733_v26 = vpop.f32.mrf.mxu0  ;;  %4790 = vmatprep.mubr.msk.bf16.mxu0 %vm5514_vm0, %v5513_v0  ;;  %4775 = vmatpush3.bf16.msra.mxu0 %v5113_v6  ;;  %v5132_v6 = vld [vmem:[%s7099_s5 + $0x30] sm:$0xff]  }
0x193e   :  { %4776 = vmatprep.subr.bf16.mxu0 %v5513_v0 }
0x1941   :  { %4777 = vmatpush3.bf16.msra.mxu0 %v5115_v7  ;;  %v5133_v7 = vld [vmem:[%s7097_s4 + $0x28] sm:$0xff]  }
0x1942   :  { %4778 = vmatprep.subr.bf16.mxu0 %v5513_v0 }
0x1945   :  { %4779 = vmatpush3.bf16.msra.mxu0 %v5117_v56 }
0x1946   :  { %4780 = vmatprep.subr.bf16.mxu0 %v5513_v0 }
0x1949   :  { %4781 = vmatpush3.bf16.msra.mxu0 %v5119_v57  ;;  %v5136_v57 = vld [vmem:[%s7099_s5 + $0x20] sm:$0xff]  }
0x194a   :  { %4782 = vmatprep.subr.bf16.mxu0 %v5513_v0 }
0x194d   :  { %4783 = vmatpush3.bf16.msra.mxu0 %v5121_v60  ;;  %v5139_v60 = vld [vmem:[%s7097_s4 + $0x10] sm:$0xff]  }
0x194e   :  { %4784 = vmatprep.subr.bf16.mxu0 %v5513_v0 }
0x1951   :  { %4785 = vmatpush3.bf16.msra.mxu0 %v5123_v62  ;;  %v5141_v62 = vld [vmem:[%s7097_s4 + $0x8] sm:$0xff]  }
0x1952   :  { %4786 = vmatprep.subr.bf16.mxu0 %v5513_v0 }
0x1955   :  { %4787 = vmatpush3.bf16.msra.mxu0 %v5125_v9  ;;  %v5143_v9 = vld [vmem:[%s7097_s4] sm:$0xff]  }
0x1956   :  { %4788 = vmatprep.subr.bf16.mxu0 %v5513_v0 }
0x1959   :  { %4789 = vmatpush3.bf16.msra.mxu0 %v5127_v10 }
0x195a   :  { %4814 = vmatprep.subr.bf16.mxu0 %v5513_v0 }
0x19fc   :  { %v1615_v27 = vpop.f32.mrf.mxu0 }
0x19fd   :  { %5369 = vtanh.f32 %v1615_v27  ;;  %v3956_v52 = vmul.f32 -1.442695, %v1615_v27 }
0x19fe   :  { %v4752_v37 = vpop.f32.mrf.mxu0 }
0x19ff   :  { %5371 = vpow2.f32 %v3956_v52 }
0x1a00   :  { %v1618_v29 = vpop.f32.mrf.mxu0 }
0x1a02   :  { %v4753_v30 = vpop.f32.mrf.mxu0 }
0x1a0a   :  { %v5370_v31 = vpop.eup %5369 }
0x1a0b   :  { %1630 = vrot.lane.b32.xlu1 %v5370_v31, %s5520_s21 }
0x1a0c   :  { %v5372_v53 = vpop.eup %5371 }
0x1a0d   :  { %v1624_v32 = vadd.f32 1.0, %v5372_v53 }
0x1a0f   :  { %5373 = vrcp.f32 %v1624_v32 }
0x1a1c   :  { %v5374_v54 = vpop.eup %5373 }
0x1a1d   :  { %v1628_v3 = vmul.f32 0.0, %v5374_v54 }
0x1a7d   :  { %v1631_v1 = vpop.permute.xlu1 %1630 }
0x1a7e   :  { %v1633_v2 = vmul.f32 %v5374_v54, %v1631_v1 }
0x1a80   :  { %1635 = vrot.lane.b32.xlu0 %v1633_v2, %s5521_s22 }
0x1af2   :  { %v1636_v4 = vpop.permute.xlu0 %1635 }
0x1af3   :  { %v6273_v5 = vadd.f32 %v1636_v4, %v1628_v3  ;;  %v5129_v3 = vld [vmem:[%s7097_s4 + $0x38] sm:$0xff]  }
0x1af4   :  { %v5130_v4 = vld [vmem:[%s7099_s5 + $0x38] sm:$0xff]  }
0x1af5   :  { %5375 = vtanh.f32 %v6273_v5 }
0x1b02   :  { %v5376_v59 = vpop.eup %5375 }
0x1b03   :  { %1641 = vrot.lane.b32.xlu1 %v5376_v59, %s5516_s20  ;;  %v5138_v59 = vld [vmem:[%s7099_s5 + $0x18] sm:$0xff]  }
0x1b75   :  { %v1642_v14 = vpop.permute.xlu1 %1641 }
0x1b76   :  { %v1644_v13 = vmul.f32 %v5374_v54, %v1642_v14 }
0x1b78   :  { %1646 = vrot.lane.b32.xlu1 %v1644_v13, %s5523_s30  ;;  %1790 = vrot.lane.b32.xlu0 %v1644_v13, %s5522_s23 }
0x1bea   :  { %v1647_v17 = vpop.permute.xlu1 %1646  ;;  %v1791_v16 = vpop.permute.xlu0 %1790 }
0x1beb   :  { %v1649_v18 = vsel %vm310_vm3, 0.0, %v1647_v17  ;;  %v1793_v23 = vsel %vm170_vm2, %v1791_v16, 0.0 }
0x1bec   :  { %v1650_v20 = vsel %vm172_vm4, %v1649_v18, 0.0  ;;  %v1794_v28 = vadd.f32 %v1793_v23, %v6345_v15 }
0x1bed   :  { %v1651_v35 = vadd.f32 %v5718_v39, %v1650_v20 }
0x1bee   :  { %v1795_v24 = vpack.c.bf16 %v1794_v28, %v1794_v28 }
0x1bef   :  { %v1653_v36 = vpack.c.bf16 %v1651_v35, %v1651_v35 }
0x1bf0   :  { %4791 = vmatmul.mubr.bf16.vlgmr.msra.gmra.mxu0 %v1795_v24 }
0x1bf1   :  { %4771 = vmatmul.mubr.bf16.vlgmr.msra.gmra.mxu1 %v1653_v36  ;;  %4830 = vmatprep.mubr.msk.bf16.mxu0 %vm5514_vm0, %v5513_v0 }
0x1bf2   :  { %4810 = vmatprep.mubr.msk.bf16.mxu1 %vm5514_vm0, %v5513_v0  ;;  %4815 = vmatpush3.bf16.msra.mxu0 %v5129_v3 }
0x1bf3   :  { %4795 = vmatpush3.bf16.msra.mxu1 %v5130_v4  ;;  %4816 = vmatprep.subr.bf16.mxu0 %v5513_v0 }
0x1bf4   :  { %4796 = vmatprep.subr.bf16.mxu1 %v5513_v0 }
0x1bf7   :  { %4797 = vmatpush3.bf16.msra.mxu1 %v5132_v6 }
0x1bf8   :  { %4798 = vmatprep.subr.bf16.mxu1 %v5513_v0 }
0x1bfb   :  { %4799 = vmatpush3.bf16.msra.mxu1 %v5134_v55  ;;  %v5147_v55 = vld [vmem:[%s7097_s4 + $0x30] sm:$0xff]  }
0x1bfc   :  { %4800 = vmatprep.subr.bf16.mxu1 %v5513_v0 }
0x1bff   :  { %4801 = vmatpush3.bf16.msra.mxu1 %v5136_v57  ;;  %v5150_v57 = vld [vmem:[%s7099_s5 + $0x28] sm:$0xff]  }
0x1c00   :  { %4802 = vmatprep.subr.bf16.mxu1 %v5513_v0 }
0x1c03   :  { %4803 = vmatpush3.bf16.msra.mxu1 %v5138_v59  ;;  %v5151_v59 = vld [vmem:[%s7097_s4 + $0x20] sm:$0xff]  }
0x1c04   :  { %4804 = vmatprep.subr.bf16.mxu1 %v5513_v0 }
0x1c07   :  { %4805 = vmatpush3.bf16.msra.mxu1 %v5140_v61  ;;  %v5153_v61 = vld [vmem:[%s7097_s4 + $0x18] sm:$0xff]  }
0x1c08   :  { %4806 = vmatprep.subr.bf16.mxu1 %v5513_v0 }
0x1c0b   :  { %4807 = vmatpush3.bf16.msra.mxu1 %v5142_v63  ;;  %v5155_v63 = vld [vmem:[%s7097_s4 + $0x10] sm:$0xff]  }
0x1c0c   :  { %4808 = vmatprep.subr.bf16.mxu1 %v5513_v0 }
0x1c0f   :  { %4809 = vmatpush3.bf16.msra.mxu1 %v5144_v11  ;;  %v5157_v11 = vld [vmem:[%s7097_s4 + $0x8] sm:$0xff]  }
0x1c10   :  { %4834 = vmatprep.subr.bf16.mxu1 %v5513_v0 }
0x1cb0   :  { %v1894_v38 = vpop.f32.mrf.mxu0 }
0x1cb1   :  { %5377 = vtanh.f32 %v1894_v38  ;;  %v1752_v19 = vpop.f32.mrf.mxu1  ;;  %v3974_v45 = vmul.f32 -1.442695, %v1894_v38 }
0x1cb2   :  { %5379 = vtanh.f32 %v1752_v19  ;;  %v4792_v40 = vpop.f32.mrf.mxu0  ;;  %v3965_v46 = vmul.f32 -1.442695, %v1752_v19 }
0x1cb3   :  { %v4772_v21 = vpop.f32.mrf.mxu1  ;;  %5381 = vpow2.f32 %v3974_v45 }
0x1cb4   :  { %v1897_v22 = vpop.f32.mrf.mxu0  ;;  %5383 = vpow2.f32 %v3965_v46 }
0x1cb5   :  { %v1755_v41 = vpop.f32.mrf.mxu1 }
0x1cb6   :  { %v4793_v42 = vpop.f32.mrf.mxu0 }
0x1cb7   :  { %v4773_v34 = vpop.f32.mrf.mxu1 }
0x1cbe   :  { %v5378_v43 = vpop.eup %5377 }
0x1cbf   :  { %v5380_v44 = vpop.eup %5379  ;;  %1909 = vrot.lane.b32.xlu0 %v5378_v43, %s5520_s21 }
0x1cc0   :  { %1767 = vrot.lane.b32.xlu1 %v5380_v44, %s5515_s19  ;;  %v5382_v48 = vpop.eup %5381 }
0x1cc1   :  { %v5384_v50 = vpop.eup %5383  ;;  %v1903_v25 = vadd.f32 1.0, %v5382_v48 }
0x1cc2   :  { %v1761_v51 = vadd.f32 1.0, %v5384_v50 }
0x1cc3   :  { %5385 = vrcp.f32 %v1903_v25 }
0x1cc4   :  { %5387 = vrcp.f32 %v1761_v51 }
0x1cd0   :  { %v6358_v26 = vpop.eup %5385 }
0x1cd1   :  { %v6360_v37 = vpop.eup %5387  ;;  %v1907_v52 = vmul.f32 %v6358_v26, %v6273_v5  ;;  %v5131_v5 = vld [vmem:[%s7097_s4 + $0x30] sm:$0xff]  }
0x1cd2   :  { %v1765_v32 = vmul.f32 0.0, %v6360_v37  ;;  %4817 = vmatpush3.bf16.msra.mxu0 %v5131_v5 }
0x1cd3   :  { %4818 = vmatprep.subr.bf16.mxu0 %v5513_v0 }
0x1cd6   :  { %4819 = vmatpush3.bf16.msra.mxu0 %v5133_v7  ;;  %v5145_v7 = vld [vmem:[%s7097_s4 + $0x38] sm:$0xff]  }
0x1cd7   :  { %4820 = vmatprep.subr.bf16.mxu0 %v5513_v0 }
0x1cda   :  { %4821 = vmatpush3.bf16.msra.mxu0 %v5135_v8  ;;  %v5149_v8 = vld [vmem:[%s7097_s4 + $0x28] sm:$0xff]  }
0x1cdb   :  { %4822 = vmatprep.subr.bf16.mxu0 %v5513_v0 }
0x1cde   :  { %4823 = vmatpush3.bf16.msra.mxu0 %v5137_v58 }
0x1cdf   :  { %4824 = vmatprep.subr.bf16.mxu0 %v5513_v0 }
0x1ce2   :  { %4825 = vmatpush3.bf16.msra.mxu0 %v5139_v60  ;;  %v5152_v60 = vld [vmem:[%s7099_s5 + $0x20] sm:$0xff]  }
0x1ce3   :  { %4826 = vmatprep.subr.bf16.mxu0 %v5513_v0 }
0x1ce6   :  { %4827 = vmatpush3.bf16.msra.mxu0 %v5141_v62  ;;  %v5154_v62 = vld [vmem:[%s7099_s5 + $0x18] sm:$0xff]  }
0x1ce7   :  { %4828 = vmatprep.subr.bf16.mxu0 %v5513_v0 }
0x1cea   :  { %4829 = vmatpush3.bf16.msra.mxu0 %v5143_v9  ;;  %v5156_v9 = vld [vmem:[%s7099_s5 + $0x10] sm:$0xff]  }
0x1ceb   :  { %4854 = vmatprep.subr.bf16.mxu0 %v5513_v0 }
0x1d31   :  { %v1910_v27 = vpop.permute.xlu0 %1909 }
0x1d32   :  { %v1912_v29 = vmul.f32 %v6358_v26, %v1910_v27  ;;  %v1768_v30 = vpop.permute.xlu1 %1767 }
0x1d33   :  { %v1770_v31 = vmul.f32 %v6360_v37, %v1768_v30 }
0x1d34   :  { %1914 = vrot.lane.b32.xlu0 %v1912_v29, %s5521_s22 }
0x1d35   :  { %1772 = vrot.lane.b32.xlu1 %v1770_v31, %s5516_s20 }
0x1da6   :  { %v1915_v53 = vpop.permute.xlu0 %1914 }
0x1da7   :  { %v6369_v54 = vadd.f32 %v1915_v53, %v1907_v52  ;;  %v1773_v1 = vpop.permute.xlu1 %1772 }
0x1da8   :  { %v6371_v2 = vadd.f32 %v1773_v1, %v1765_v32 }
0x1da9   :  { %5389 = vtanh.f32 %v6369_v54 }
0x1daa   :  { %5391 = vtanh.f32 %v6371_v2 }
0x1db6   :  { %v5390_v33 = vpop.eup %5389 }
0x1db7   :  { %v5392_v56 = vpop.eup %5391  ;;  %1920 = vrot.lane.b32.xlu0 %v5390_v33, %s5516_s20 }
0x1db8   :  { %1778 = vrot.lane.b32.xlu1 %v5392_v56, %s5517_s27 }
0x1e29   :  { %v1921_v10 = vpop.permute.xlu0 %1920 }
0x1e2a   :  { %v1923_v12 = vmul.f32 %v6358_v26, %v1921_v10  ;;  %v1779_v14 = vpop.permute.xlu1 %1778  ;;  %v5158_v10 = vld [vmem:[%s7099_s5 + $0x8] sm:$0xff]  }
0x1e2b   :  { %v1781_v13 = vmul.f32 %v6360_v37, %v1779_v14  ;;  %v5160_v14 = vld [vmem:[%s7099_s5] sm:$0xff]  }
0x1e2c   :  { %1925 = vrot.lane.b32.xlu0 %v1923_v12, %s5523_s30  ;;  %2070 = vrot.lane.b32.xlu1 %v1923_v12, %s5522_s23  ;;  %v5159_v12 = vld [vmem:[%s7097_s4] sm:$0xff]  }
0x1e30   :  { %1783 = vrot.lane.b32.xlu0 %v1781_v13, %s5519_s16 }
0x1e9e   :  { %v1926_v17 = vpop.permute.xlu0 %1925  ;;  %v2071_v16 = vpop.permute.xlu1 %2070 }
0x1e9f   :  { %v1928_v18 = vsel %vm310_vm3, 0.0, %v1926_v17  ;;  %v2073_v23 = vsel %vm170_vm2, %v2071_v16, 0.0 }
0x1ea0   :  { %v1929_v20 = vsel %vm172_vm4, %v1928_v18, 0.0  ;;  %v2074_v28 = vadd.f32 %v2073_v23, %v6263_v49 }
0x1ea1   :  { %v1930_v35 = vadd.f32 %v5718_v39, %v1929_v20 }
0x1ea2   :  { %v2075_v24 = vpack.c.bf16 %v2074_v28, %v2074_v28  ;;  %v1784_v36 = vpop.permute.xlu0 %1783 }
0x1ea3   :  { %v6452_v38 = vsel %vm310_vm3, %v1784_v36, 0.0 }
0x1ea4   :  { %v1931_v19 = vadd.f32 %v1930_v35, %v6452_v38  ;;  %4831 = vmatmul.mubr.bf16.vlgmr.msra.gmra.mxu0 %v2075_v24 }
0x1ea5   :  { %4870 = vmatprep.mubr.msk.bf16.mxu0 %vm5514_vm0, %v5513_v0  ;;  %4855 = vmatpush3.bf16.msra.mxu0 %v5145_v7 }
0x1ea6   :  { %v1932_v40 = vpack.c.bf16 %v1931_v19, %v1931_v19  ;;  %4856 = vmatprep.subr.bf16.mxu0 %v5513_v0 }
0x1ea8   :  { %4811 = vmatmul.mubr.bf16.vlgmr.msra.gmra.mxu1 %v1932_v40 }
0x1ea9   :  { %4850 = vmatprep.mubr.msk.bf16.mxu1 %vm5514_vm0, %v5513_v0  ;;  %4857 = vmatpush3.bf16.msra.mxu0 %v5147_v55 }
0x1eaa   :  { %4858 = vmatprep.subr.bf16.mxu0 %v5513_v0 }
0x1ead   :  { %4859 = vmatpush3.bf16.msra.mxu0 %v5149_v8 }
0x1eae   :  { %4860 = vmatprep.subr.bf16.mxu0 %v5513_v0 }
0x1eb1   :  { %4861 = vmatpush3.bf16.msra.mxu0 %v5151_v59  ;;  %v5161_v59 = vld [vmem:[%s7097_s4 + $0x38] sm:$0xff]  }
0x1eb2   :  { %4862 = vmatprep.subr.bf16.mxu0 %v5513_v0 }
0x1eb5   :  { %4863 = vmatpush3.bf16.msra.mxu0 %v5153_v61 }
0x1eb6   :  { %4864 = vmatprep.subr.bf16.mxu0 %v5513_v0 }
0x1eb9   :  { %4865 = vmatpush3.bf16.msra.mxu0 %v5155_v63  ;;  %v5166_v63 = vld [vmem:[%s7099_s5 + $0x28] sm:$0xff]  }
0x1eba   :  { %4866 = vmatprep.subr.bf16.mxu0 %v5513_v0 }
0x1ebd   :  { %4867 = vmatpush3.bf16.msra.mxu0 %v5157_v11  ;;  %v5167_v11 = vld [vmem:[%s7097_s4 + $0x20] sm:$0xff]  }
0x1ebe   :  { %4868 = vmatprep.subr.bf16.mxu0 %v5513_v0 }
0x1ec1   :  { %4869 = vmatpush3.bf16.msra.mxu0 %v5159_v12  ;;  %v5169_v12 = vld [vmem:[%s7097_s4 + $0x18] sm:$0xff]  }
0x1ec2   :  { %4894 = vmatprep.subr.bf16.mxu0 %v5513_v0 }
0x1f64   :  { %v2174_v21 = vpop.f32.mrf.mxu0 }
0x1f65   :  { %5393 = vtanh.f32 %v2174_v21  ;;  %v3992_v50 = vmul.f32 -1.442695, %v2174_v21 }
0x1f66   :  { %v4832_v22 = vpop.f32.mrf.mxu0 }
0x1f68   :  { %v2031_v41 = vpop.f32.mrf.mxu1  ;;  %v2177_v42 = vpop.f32.mrf.mxu0 }
0x1f69   :  { %5395 = vtanh.f32 %v2031_v41  ;;  %v3983_v25 = vmul.f32 -1.442695, %v2031_v41  ;;  %v6558_v41 = vadd.f32 %v6260_v47, %v6452_v38 }
0x1f6a   :  { %v4812_v34 = vpop.f32.mrf.mxu1  ;;  %v4833_v43 = vpop.f32.mrf.mxu0  ;;  %5397 = vpow2.f32 %v3992_v50 }
0x1f6b   :  { %5399 = vpow2.f32 %v3983_v25 }
0x1f6c   :  { %v2034_v44 = vpop.f32.mrf.mxu1 }
0x1f6e   :  { %v4813_v45 = vpop.f32.mrf.mxu1 }
0x1f72   :  { %v5394_v46 = vpop.eup %5393 }
0x1f73   :  { %2189 = vrot.lane.b32.xlu1 %v5394_v46, %s5520_s21 }
0x1f76   :  { %v5396_v48 = vpop.eup %5395 }
0x1f77   :  { %2046 = vrot.lane.b32.xlu0 %v5396_v48, %s5515_s19  ;;  %v5398_v51 = vpop.eup %5397 }
0x1f78   :  { %v2183_v26 = vadd.f32 1.0, %v5398_v51  ;;  %v5400_v27 = vpop.eup %5399 }
0x1f79   :  { %v2040_v37 = vadd.f32 1.0, %v5400_v27 }
0x1f7a   :  { %5401 = vrcp.f32 %v2183_v26 }
0x1f7b   :  { %5403 = vrcp.f32 %v2040_v37 }
0x1f87   :  { %v6461_v29 = vpop.eup %5401 }
0x1f88   :  { %v6465_v52 = vpop.eup %5403  ;;  %v2187_v1 = vmul.f32 %v6461_v29, %v6369_v54  ;;  %v5146_v54 = vld [vmem:[%s7099_s5 + $0x38] sm:$0xff]  }
0x1f89   :  { %v2044_v5 = vmul.f32 %v6465_v52, %v6371_v2  ;;  %4835 = vmatpush3.bf16.msra.mxu1 %v5146_v54  ;;  %v5148_v2 = vld [vmem:[%s7099_s5 + $0x30] sm:$0xff]  }
0x1f8a   :  { %4836 = vmatprep.subr.bf16.mxu1 %v5513_v0 }
0x1f8d   :  { %4837 = vmatpush3.bf16.msra.mxu1 %v5148_v2 }
0x1f8e   :  { %4838 = vmatprep.subr.bf16.mxu1 %v5513_v0 }
0x1f91   :  { %4839 = vmatpush3.bf16.msra.mxu1 %v5150_v57 }
0x1f92   :  { %4840 = vmatprep.subr.bf16.mxu1 %v5513_v0 }
0x1f95   :  { %4841 = vmatpush3.bf16.msra.mxu1 %v5152_v60  ;;  %v5163_v60 = vld [vmem:[%s7097_s4 + $0x30] sm:$0xff]  }
0x1f96   :  { %4842 = vmatprep.subr.bf16.mxu1 %v5513_v0 }
0x1f99   :  { %4843 = vmatpush3.bf16.msra.mxu1 %v5154_v62  ;;  %v5165_v62 = vld [vmem:[%s7097_s4 + $0x28] sm:$0xff]  }
0x1f9a   :  { %4844 = vmatprep.subr.bf16.mxu1 %v5513_v0 }
0x1f9d   :  { %4845 = vmatpush3.bf16.msra.mxu1 %v5156_v9 }
0x1f9e   :  { %4846 = vmatprep.subr.bf16.mxu1 %v5513_v0 }
0x1fa1   :  { %4847 = vmatpush3.bf16.msra.mxu1 %v5158_v10  ;;  %v5168_v10 = vld [vmem:[%s7099_s5 + $0x20] sm:$0xff]  }
0x1fa2   :  { %4848 = vmatprep.subr.bf16.mxu1 %v5513_v0 }
0x1fa5   :  { %4849 = vmatpush3.bf16.msra.mxu1 %v5160_v14  ;;  %v5170_v14 = vld [vmem:[%s7099_s5 + $0x18] sm:$0xff]  }
0x1fa6   :  { %4874 = vmatprep.subr.bf16.mxu1 %v5513_v0 }
0x1fe5   :  { %v2190_v30 = vpop.permute.xlu1 %2189 }
0x1fe6   :  { %v2192_v31 = vmul.f32 %v6461_v29, %v2190_v30 }
0x1fe8   :  { %2194 = vrot.lane.b32.xlu1 %v2192_v31, %s5521_s22 }
0x1fe9   :  { %v2047_v53 = vpop.permute.xlu0 %2046 }
0x1fea   :  { %v2049_v32 = vmul.f32 %v6465_v52, %v2047_v53 }
0x1fec   :  { %2051 = vrot.lane.b32.xlu0 %v2049_v32, %s5516_s20 }
0x205a   :  { %v2195_v3 = vpop.permute.xlu1 %2194 }
0x205b   :  { %v6471_v4 = vadd.f32 %v2195_v3, %v2187_v1 }
0x205d   :  { %5405 = vtanh.f32 %v6471_v4 }
0x205e   :  { %v2052_v6 = vpop.permute.xlu0 %2051 }
0x205f   :  { %v6476_v33 = vadd.f32 %v2052_v6, %v2044_v5 }
0x2061   :  { %5407 = vtanh.f32 %v6476_v33 }
0x206a   :  { %v5406_v56 = vpop.eup %5405 }
0x206b   :  { %2200 = vrot.lane.b32.xlu1 %v5406_v56, %s5516_s20 }
0x206e   :  { %v5408_v58 = vpop.eup %5407 }
0x206f   :  { %2057 = vrot.lane.b32.xlu0 %v5408_v58, %s5517_s27 }
0x20dd   :  { %v2201_v13 = vpop.permute.xlu1 %2200 }
0x20de   :  { %v2203_v17 = vmul.f32 %v6461_v29, %v2201_v13  ;;  %v5171_v13 = vld [vmem:[%s7097_s4 + $0x10] sm:$0xff]  }
0x20e0   :  { %2205 = vrot.lane.b32.xlu1 %v2203_v17, %s5523_s30  ;;  %2350 = vrot.lane.b32.xlu0 %v2203_v17, %s5522_s23  ;;  %v5172_v17 = vld [vmem:[%s7099_s5 + $0x10] sm:$0xff]  }
0x20e1   :  { %v2058_v16 = vpop.permute.xlu0 %2057 }
0x20e2   :  { %v2060_v18 = vmul.f32 %v6465_v52, %v2058_v16  ;;  %v5173_v16 = vld [vmem:[%s7097_s4 + $0x8] sm:$0xff]  }
0x20e4   :  { %2062 = vrot.lane.b32.xlu1 %v2060_v18, %s5519_s16  ;;  %v5174_v18 = vld [vmem:[%s7099_s5 + $0x8] sm:$0xff]  }
0x2152   :  { %v2206_v23 = vpop.permute.xlu1 %2205  ;;  %v2351_v20 = vpop.permute.xlu0 %2350 }
0x2153   :  { %v2208_v28 = vsel %vm310_vm3, 0.0, %v2206_v23  ;;  %v2353_v35 = vsel %vm170_vm2, %v2351_v20, 0.0  ;;  %v5175_v23 = vld [vmem:[%s7097_s4] sm:$0xff]  }
0x2154   :  { %v2209_v24 = vsel %vm172_vm4, %v2208_v28, 0.0  ;;  %v2354_v36 = vadd.f32 %v2353_v35, %v6345_v15  ;;  %v5176_v20 = vld [vmem:[%s7099_s5] sm:$0xff]  }
0x2155   :  { %v2210_v19 = vadd.f32 %v5718_v39, %v2209_v24 }
0x2156   :  { %v2355_v40 = vpack.c.bf16 %v2354_v36, %v2354_v36  ;;  %v2063_v21 = vpop.permute.xlu1 %2062 }
0x2157   :  { %v2065_v22 = vsel %vm310_vm3, %v2063_v21, 0.0 }
0x2158   :  { %v6561_v42 = vadd.f32 %v6260_v47, %v2065_v22  ;;  %v2211_v34 = vadd.f32 %v2210_v19, %v2065_v22  ;;  %4871 = vmatmul.mubr.bf16.vlgmr.msra.gmra.mxu0 %v2355_v40 }
0x2159   :  { %4910 = vmatprep.mubr.msk.bf16.mxu0 %vm5514_vm0, %v5513_v0  ;;  %4895 = vmatpush3.bf16.msra.mxu0 %v5161_v59 }
0x215a   :  { %v2212_v43 = vpack.c.bf16 %v2211_v34, %v2211_v34  ;;  %v3757_v44 = vpack.c.bf16 %v6561_v42, %v6558_v41  ;;  %4896 = vmatprep.subr.bf16.mxu0 %v5513_v0  ;;  %v5229_v41 = vld [vmem:[%s7100_s6 + $0x18] sm:$0xff]   ;;  %v5230_v42 = vld [vmem:[%s7100_s6 + $0x10] sm:$0xff]  }
0x215c   :  { %4851 = vmatmul.mubr.bf16.vlgmr.msra.gmra.mxu1 %v2212_v43 }
0x215d   :  { %4890 = vmatprep.mubr.msk.bf16.mxu1 %vm5514_vm0, %v5513_v0  ;;  %4897 = vmatpush3.bf16.msra.mxu0 %v5163_v60 }
0x215e   :  { %4898 = vmatprep.subr.bf16.mxu0 %v5513_v0 }
0x2161   :  { %4899 = vmatpush3.bf16.msra.mxu0 %v5165_v62 }
0x2162   :  { %4900 = vmatprep.subr.bf16.mxu0 %v5513_v0 }
0x2165   :  { %4901 = vmatpush3.bf16.msra.mxu0 %v5167_v11  ;;  %v5177_v11 = vld [vmem:[%s7097_s4 + $0x38] sm:$0xff]  }
0x2166   :  { %4902 = vmatprep.subr.bf16.mxu0 %v5513_v0 }
0x2169   :  { %4903 = vmatpush3.bf16.msra.mxu0 %v5169_v12 }
0x216a   :  { %4904 = vmatprep.subr.bf16.mxu0 %v5513_v0 }
0x216d   :  { %4905 = vmatpush3.bf16.msra.mxu0 %v5171_v13  ;;  %v5182_v13 = vld [vmem:[%s7099_s5 + $0x28] sm:$0xff]  }
0x216e   :  { %4906 = vmatprep.subr.bf16.mxu0 %v5513_v0 }
0x2171   :  { %4907 = vmatpush3.bf16.msra.mxu0 %v5173_v16  ;;  %v5183_v16 = vld [vmem:[%s7097_s4 + $0x20] sm:$0xff]  }
0x2172   :  { %4908 = vmatprep.subr.bf16.mxu0 %v5513_v0 }
0x2175   :  { %4909 = vmatpush3.bf16.msra.mxu0 %v5175_v23  ;;  %v5185_v23 = vld [vmem:[%s7097_s4 + $0x18] sm:$0xff]  }
0x2176   :  { %4934 = vmatprep.subr.bf16.mxu0 %v5513_v0 }
0x2218   :  { %v2454_v45 = vpop.f32.mrf.mxu0 }
0x2219   :  { %5409 = vtanh.f32 %v2454_v45  ;;  %v4010_v29 = vmul.f32 -1.442695, %v2454_v45 }
0x221a   :  { %v4872_v38 = vpop.f32.mrf.mxu0 }
0x221c   :  { %v2311_v46 = vpop.f32.mrf.mxu1  ;;  %v2457_v48 = vpop.f32.mrf.mxu0 }
0x221d   :  { %5411 = vtanh.f32 %v2311_v46  ;;  %v4001_v30 = vmul.f32 -1.442695, %v2311_v46 }
0x221e   :  { %v4852_v50 = vpop.f32.mrf.mxu1  ;;  %v4873_v25 = vpop.f32.mrf.mxu0  ;;  %5413 = vpow2.f32 %v4010_v29 }
0x221f   :  { %5415 = vpow2.f32 %v4001_v30 }
0x2220   :  { %v2314_v51 = vpop.f32.mrf.mxu1 }
0x2222   :  { %v4853_v26 = vpop.f32.mrf.mxu1 }
0x2226   :  { %v5410_v27 = vpop.eup %5409 }
0x2227   :  { %2469 = vrot.lane.b32.xlu0 %v5410_v27, %s5520_s21 }
0x222a   :  { %v5412_v37 = vpop.eup %5411 }
0x222b   :  { %2326 = vrot.lane.b32.xlu1 %v5412_v37, %s5515_s19  ;;  %v5414_v31 = vpop.eup %5413 }
0x222c   :  { %v2463_v52 = vadd.f32 1.0, %v5414_v31  ;;  %v5416_v53 = vpop.eup %5415 }
0x222d   :  { %v2320_v32 = vadd.f32 1.0, %v5416_v53 }
0x222e   :  { %5417 = vrcp.f32 %v2463_v52 }
0x222f   :  { %5419 = vrcp.f32 %v2320_v32 }
0x223b   :  { %v6571_v1 = vpop.eup %5417 }
0x223c   :  { %v6575_v6 = vpop.eup %5419  ;;  %v2467_v55 = vmul.f32 %v6571_v1, %v6471_v4  ;;  %v5162_v4 = vld [vmem:[%s7099_s5 + $0x38] sm:$0xff]  }
0x223d   :  { %v2324_v8 = vmul.f32 %v6575_v6, %v6476_v33  ;;  %4875 = vmatpush3.bf16.msra.mxu1 %v5162_v4  ;;  %v5164_v33 = vld [vmem:[%s7099_s5 + $0x30] sm:$0xff]  }
0x223e   :  { %4876 = vmatprep.subr.bf16.mxu1 %v5513_v0 }
0x2241   :  { %4877 = vmatpush3.bf16.msra.mxu1 %v5164_v33 }
0x2242   :  { %4878 = vmatprep.subr.bf16.mxu1 %v5513_v0 }
0x2245   :  { %4879 = vmatpush3.bf16.msra.mxu1 %v5166_v63 }
0x2246   :  { %4880 = vmatprep.subr.bf16.mxu1 %v5513_v0 }
0x2249   :  { %4881 = vmatpush3.bf16.msra.mxu1 %v5168_v10  ;;  %v5179_v10 = vld [vmem:[%s7097_s4 + $0x30] sm:$0xff]  }
0x224a   :  { %4882 = vmatprep.subr.bf16.mxu1 %v5513_v0 }
0x224d   :  { %4883 = vmatpush3.bf16.msra.mxu1 %v5170_v14  ;;  %v5181_v14 = vld [vmem:[%s7097_s4 + $0x28] sm:$0xff]  }
0x224e   :  { %4884 = vmatprep.subr.bf16.mxu1 %v5513_v0 }
0x2251   :  { %4885 = vmatpush3.bf16.msra.mxu1 %v5172_v17 }
0x2252   :  { %4886 = vmatprep.subr.bf16.mxu1 %v5513_v0 }
0x2255   :  { %4887 = vmatpush3.bf16.msra.mxu1 %v5174_v18  ;;  %v5184_v18 = vld [vmem:[%s7099_s5 + $0x20] sm:$0xff]  }
0x2256   :  { %4888 = vmatprep.subr.bf16.mxu1 %v5513_v0 }
0x2259   :  { %4889 = vmatpush3.bf16.msra.mxu1 %v5176_v20  ;;  %v5186_v20 = vld [vmem:[%s7099_s5 + $0x18] sm:$0xff]  }
0x225a   :  { %4914 = vmatprep.subr.bf16.mxu1 %v5513_v0 }
0x2299   :  { %v2470_v3 = vpop.permute.xlu0 %2469 }
0x229a   :  { %v2472_v5 = vmul.f32 %v6571_v1, %v2470_v3 }
0x229c   :  { %2474 = vrot.lane.b32.xlu0 %v2472_v5, %s5521_s22 }
0x229d   :  { %v2327_v7 = vpop.permute.xlu1 %2326 }
0x229e   :  { %v2329_v54 = vmul.f32 %v6575_v6, %v2327_v7 }
0x22a0   :  { %2331 = vrot.lane.b32.xlu1 %v2329_v54, %s5516_s20 }
0x230e   :  { %v2475_v2 = vpop.permute.xlu0 %2474 }
0x230f   :  { %v6581_v56 = vadd.f32 %v2475_v2, %v2467_v55 }
0x2311   :  { %5421 = vtanh.f32 %v6581_v56 }
0x2312   :  { %v2332_v57 = vpop.permute.xlu1 %2331 }
0x2313   :  { %v6586_v58 = vadd.f32 %v2332_v57, %v2324_v8 }
0x2315   :  { %5423 = vtanh.f32 %v6586_v58 }
0x231e   :  { %v5422_v61 = vpop.eup %5421 }
0x231f   :  { %2480 = vrot.lane.b32.xlu0 %v5422_v61, %s5516_s20 }
0x2322   :  { %v5424_v9 = vpop.eup %5423 }
0x2323   :  { %2337 = vrot.lane.b32.xlu1 %v5424_v9, %s5517_s27 }
0x2391   :  { %v2481_v28 = vpop.permute.xlu0 %2480 }
0x2392   :  { %v2483_v35 = vmul.f32 %v6571_v1, %v2481_v28  ;;  %v5187_v28 = vld [vmem:[%s7097_s4 + $0x10] sm:$0xff]  }
0x2394   :  { %2485 = vrot.lane.b32.xlu0 %v2483_v35, %s5523_s30  ;;  %2630 = vrot.lane.b32.xlu1 %v2483_v35, %s5522_s23  ;;  %v5188_v35 = vld [vmem:[%s7099_s5 + $0x10] sm:$0xff]  }
0x2395   :  { %v2338_v24 = vpop.permute.xlu1 %2337 }
0x2396   :  { %v2340_v36 = vmul.f32 %v6575_v6, %v2338_v24  ;;  %v5189_v24 = vld [vmem:[%s7097_s4 + $0x8] sm:$0xff]  }
0x2398   :  { %2342 = vrot.lane.b32.xlu0 %v2340_v36, %s5519_s16  ;;  %v5190_v36 = vld [vmem:[%s7099_s5 + $0x8] sm:$0xff]  }
0x2406   :  { %v2486_v19 = vpop.permute.xlu0 %2485  ;;  %v2631_v40 = vpop.permute.xlu1 %2630 }
0x2407   :  { %v2488_v21 = vsel %vm310_vm3, 0.0, %v2486_v19  ;;  %v2633_v22 = vsel %vm170_vm2, %v2631_v40, 0.0  ;;  %v5191_v19 = vld [vmem:[%s7097_s4] sm:$0xff]  }
0x2408   :  { %v2489_v34 = vsel %vm172_vm4, %v2488_v21, 0.0  ;;  %v2634_v43 = vadd.f32 %v2633_v22, %v6263_v49  ;;  %v5192_v40 = vld [vmem:[%s7099_s5] sm:$0xff]  }
0x2409   :  { %v2490_v45 = vadd.f32 %v5718_v39, %v2489_v34 }
0x240a   :  { %v2635_v38 = vpack.c.bf16 %v2634_v43, %v2634_v43  ;;  %v2343_v46 = vpop.permute.xlu0 %2342 }
0x240b   :  { %v6666_v48 = vsel %vm310_vm3, %v2343_v46, 0.0 }
0x240c   :  { %v2491_v50 = vadd.f32 %v2490_v45, %v6666_v48  ;;  %4911 = vmatmul.mubr.bf16.vlgmr.msra.gmra.mxu0 %v2635_v38 }
0x240d   :  { %4950 = vmatprep.mubr.msk.bf16.mxu0 %vm5514_vm0, %v5513_v0  ;;  %4935 = vmatpush3.bf16.msra.mxu0 %v5177_v11 }
0x240e   :  { %v2492_v25 = vpack.c.bf16 %v2491_v50, %v2491_v50  ;;  %4936 = vmatprep.subr.bf16.mxu0 %v5513_v0 }
0x2410   :  { %4891 = vmatmul.mubr.bf16.vlgmr.msra.gmra.mxu1 %v2492_v25 }
0x2411   :  { %4930 = vmatprep.mubr.msk.bf16.mxu1 %vm5514_vm0, %v5513_v0  ;;  %4937 = vmatpush3.bf16.msra.mxu0 %v5179_v10 }
0x2412   :  { %4938 = vmatprep.subr.bf16.mxu0 %v5513_v0 }
0x2415   :  { %4939 = vmatpush3.bf16.msra.mxu0 %v5181_v14 }
0x2416   :  { %4940 = vmatprep.subr.bf16.mxu0 %v5513_v0 }
0x2419   :  { %4941 = vmatpush3.bf16.msra.mxu0 %v5183_v16 }
0x241a   :  { %4942 = vmatprep.subr.bf16.mxu0 %v5513_v0 }
0x241d   :  { %4943 = vmatpush3.bf16.msra.mxu0 %v5185_v23 }
0x241e   :  { %4944 = vmatprep.subr.bf16.mxu0 %v5513_v0 }
0x2421   :  { %4945 = vmatpush3.bf16.msra.mxu0 %v5187_v28  ;;  %v5195_v28 = vld [vmem:[%s7097_s4 + $0x30] sm:$0xff]  }
0x2422   :  { %4946 = vmatprep.subr.bf16.mxu0 %v5513_v0 }
0x2425   :  { %4947 = vmatpush3.bf16.msra.mxu0 %v5189_v24  ;;  %v5197_v24 = vld [vmem:[%s7097_s4 + $0x28] sm:$0xff]  }
0x2426   :  { %4948 = vmatprep.subr.bf16.mxu0 %v5513_v0 }
0x2429   :  { %4949 = vmatpush3.bf16.msra.mxu0 %v5191_v19 }
0x242a   :  { %4974 = vmatprep.subr.bf16.mxu0 %v5513_v0 }
0x24cc   :  { %v2734_v51 = vpop.f32.mrf.mxu0 }
0x24cd   :  { %5425 = vtanh.f32 %v2734_v51  ;;  %v4028_v1 = vmul.f32 -1.442695, %v2734_v51 }
0x24ce   :  { %v4912_v26 = vpop.f32.mrf.mxu0 }
0x24d0   :  { %v2591_v27 = vpop.f32.mrf.mxu1  ;;  %v2737_v37 = vpop.f32.mrf.mxu0 }
0x24d1   :  { %5427 = vtanh.f32 %v2591_v27  ;;  %v4019_v3 = vmul.f32 -1.442695, %v2591_v27 }
0x24d2   :  { %v4892_v29 = vpop.f32.mrf.mxu1  ;;  %v4913_v30 = vpop.f32.mrf.mxu0  ;;  %5429 = vpow2.f32 %v4028_v1 }
0x24d3   :  { %5431 = vpow2.f32 %v4019_v3  ;;  %v6772_v30 = vadd.f32 %v6260_v47, %v6666_v48 }
0x24d4   :  { %v2594_v31 = vpop.f32.mrf.mxu1 }
0x24d6   :  { %v4893_v52 = vpop.f32.mrf.mxu1 }
0x24da   :  { %v5426_v53 = vpop.eup %5425 }
0x24db   :  { %2749 = vrot.lane.b32.xlu1 %v5426_v53, %s5520_s21 }
0x24de   :  { %v5428_v32 = vpop.eup %5427 }
0x24df   :  { %2606 = vrot.lane.b32.xlu0 %v5428_v32, %s5515_s19  ;;  %v5430_v5 = vpop.eup %5429 }
0x24e0   :  { %v2743_v6 = vadd.f32 1.0, %v5430_v5  ;;  %v5432_v7 = vpop.eup %5431 }
0x24e1   :  { %v2600_v54 = vadd.f32 1.0, %v5432_v7 }
0x24e2   :  { %5433 = vrcp.f32 %v2743_v6 }
0x24e3   :  { %5435 = vrcp.f32 %v2600_v54 }
0x24ef   :  { %v6675_v55 = vpop.eup %5433 }
0x24f0   :  { %v6679_v57 = vpop.eup %5435  ;;  %v2747_v60 = vmul.f32 %v6675_v55, %v6581_v56  ;;  %v5178_v56 = vld [vmem:[%s7099_s5 + $0x38] sm:$0xff]  }
0x24f1   :  { %v2604_v62 = vmul.f32 %v6679_v57, %v6586_v58  ;;  %4915 = vmatpush3.bf16.msra.mxu1 %v5178_v56  ;;  %v5180_v58 = vld [vmem:[%s7099_s5 + $0x30] sm:$0xff]  }
0x24f2   :  { %4916 = vmatprep.subr.bf16.mxu1 %v5513_v0 }
0x24f5   :  { %4917 = vmatpush3.bf16.msra.mxu1 %v5180_v58 }
0x24f6   :  { %4918 = vmatprep.subr.bf16.mxu1 %v5513_v0 }
0x24f9   :  { %4919 = vmatpush3.bf16.msra.mxu1 %v5182_v13 }
0x24fa   :  { %4920 = vmatprep.subr.bf16.mxu1 %v5513_v0 }
0x24fd   :  { %4921 = vmatpush3.bf16.msra.mxu1 %v5184_v18 }
0x24fe   :  { %4922 = vmatprep.subr.bf16.mxu1 %v5513_v0 }
0x2501   :  { %4923 = vmatpush3.bf16.msra.mxu1 %v5186_v20  ;;  %v5193_v20 = vld [vmem:[%s7097_s4 + $0x38] sm:$0xff]  }
0x2502   :  { %4924 = vmatprep.subr.bf16.mxu1 %v5513_v0 }
0x2505   :  { %4925 = vmatpush3.bf16.msra.mxu1 %v5188_v35 }
0x2506   :  { %4926 = vmatprep.subr.bf16.mxu1 %v5513_v0 }
0x2509   :  { %4927 = vmatpush3.bf16.msra.mxu1 %v5190_v36  ;;  %v5198_v36 = vld [vmem:[%s7099_s5 + $0x28] sm:$0xff]  }
0x250a   :  { %4928 = vmatprep.subr.bf16.mxu1 %v5513_v0 }
0x250d   :  { %4929 = vmatpush3.bf16.msra.mxu1 %v5192_v40  ;;  %v5199_v40 = vld [vmem:[%s7097_s4 + $0x20] sm:$0xff]  }
0x250e   :  { %4954 = vmatprep.subr.bf16.mxu1 %v5513_v0 }
0x254d   :  { %v2750_v2 = vpop.permute.xlu1 %2749 }
0x254e   :  { %v2752_v8 = vmul.f32 %v6675_v55, %v2750_v2 }
0x2550   :  { %2754 = vrot.lane.b32.xlu1 %v2752_v8, %s5521_s22 }
0x2551   :  { %v2607_v59 = vpop.permute.xlu0 %2606 }
0x2552   :  { %v2609_v4 = vmul.f32 %v6679_v57, %v2607_v59 }
0x2554   :  { %2611 = vrot.lane.b32.xlu0 %v2609_v4, %s5516_s20 }
0x25c2   :  { %v2755_v33 = vpop.permute.xlu1 %2754 }
0x25c3   :  { %v6685_v61 = vadd.f32 %v2755_v33, %v2747_v60 }
0x25c5   :  { %5437 = vtanh.f32 %v6685_v61 }
0x25c6   :  { %v2612_v63 = vpop.permute.xlu0 %2611 }
0x25c7   :  { %v6690_v9 = vadd.f32 %v2612_v63, %v2604_v62 }
0x25c9   :  { %5439 = vtanh.f32 %v6690_v9 }
0x25d2   :  { %v5438_v12 = vpop.eup %5437 }
0x25d3   :  { %2760 = vrot.lane.b32.xlu1 %v5438_v12, %s5516_s20 }
0x25d6   :  { %v5440_v17 = vpop.eup %5439 }
0x25d7   :  { %2617 = vrot.lane.b32.xlu0 %v5440_v17, %s5517_s27 }
0x2645   :  { %v2761_v21 = vpop.permute.xlu1 %2760 }
0x2646   :  { %v2763_v22 = vmul.f32 %v6675_v55, %v2761_v21  ;;  %v5200_v21 = vld [vmem:[%s7099_s5 + $0x20] sm:$0xff]  }
0x2648   :  { %2765 = vrot.lane.b32.xlu1 %v2763_v22, %s5523_s30  ;;  %2910 = vrot.lane.b32.xlu0 %v2763_v22, %s5522_s23  ;;  %v5201_v22 = vld [vmem:[%s7097_s4 + $0x18] sm:$0xff]  }
0x2649   :  { %v2618_v34 = vpop.permute.xlu0 %2617 }
0x264a   :  { %v2620_v43 = vmul.f32 %v6679_v57, %v2618_v34  ;;  %v5202_v34 = vld [vmem:[%s7099_s5 + $0x18] sm:$0xff]  }
0x264c   :  { %2622 = vrot.lane.b32.xlu1 %v2620_v43, %s5519_s16  ;;  %v5203_v43 = vld [vmem:[%s7097_s4 + $0x10] sm:$0xff]  }
0x26ba   :  { %v2766_v45 = vpop.permute.xlu1 %2765  ;;  %v2911_v38 = vpop.permute.xlu0 %2910 }
0x26bb   :  { %v2768_v46 = vsel %vm310_vm3, 0.0, %v2766_v45  ;;  %v2913_v50 = vsel %vm170_vm2, %v2911_v38, 0.0  ;;  %v5204_v45 = vld [vmem:[%s7099_s5 + $0x10] sm:$0xff]   ;;  %v5205_v38 = vld [vmem:[%s7097_s4 + $0x8] sm:$0xff]  }
0x26bc   :  { %v2769_v25 = vsel %vm172_vm4, %v2768_v46, 0.0  ;;  %v2914_v51 = vadd.f32 %v2913_v50, %v6345_v15  ;;  %v5206_v46 = vld [vmem:[%s7099_s5 + $0x8] sm:$0xff]   ;;  %v5207_v50 = vld [vmem:[%s7097_s4] sm:$0xff]  }
0x26bd   :  { %v2770_v26 = vadd.f32 %v5718_v39, %v2769_v25  ;;  %v5208_v25 = vld [vmem:[%s7099_s5] sm:$0xff]  }
0x26be   :  { %v2915_v27 = vpack.c.bf16 %v2914_v51, %v2914_v51  ;;  %v2623_v37 = vpop.permute.xlu1 %2622 }
0x26bf   :  { %v2625_v29 = vsel %vm310_vm3, %v2623_v37, 0.0 }
0x26c0   :  { %v6775_v31 = vadd.f32 %v6260_v47, %v2625_v29  ;;  %v2771_v52 = vadd.f32 %v2770_v26, %v2625_v29  ;;  %4951 = vmatmul.mubr.bf16.vlgmr.msra.gmra.mxu0 %v2915_v27 }
0x26c1   :  { %4990 = vmatprep.mubr.msk.bf16.mxu0 %vm5514_vm0, %v5513_v0  ;;  %4975 = vmatpush3.bf16.msra.mxu0 %v5193_v20 }
0x26c2   :  { %v2772_v53 = vpack.c.bf16 %v2771_v52, %v2771_v52  ;;  %v3758_v32 = vpack.c.bf16 %v6775_v31, %v6772_v30  ;;  %4976 = vmatprep.subr.bf16.mxu0 %v5513_v0 }
0x26c4   :  { %4931 = vmatmul.mubr.bf16.vlgmr.msra.gmra.mxu1 %v2772_v53 }
0x26c5   :  { %4970 = vmatprep.mubr.msk.bf16.mxu1 %vm5514_vm0, %v5513_v0  ;;  %4977 = vmatpush3.bf16.msra.mxu0 %v5195_v28 }
0x26c6   :  { %4978 = vmatprep.subr.bf16.mxu0 %v5513_v0 }
0x26c9   :  { %4979 = vmatpush3.bf16.msra.mxu0 %v5197_v24 }
0x26ca   :  { %4980 = vmatprep.subr.bf16.mxu0 %v5513_v0 }
0x26cd   :  { %4981 = vmatpush3.bf16.msra.mxu0 %v5199_v40 }
0x26ce   :  { %4982 = vmatprep.subr.bf16.mxu0 %v5513_v0 }
0x26d1   :  { %4983 = vmatpush3.bf16.msra.mxu0 %v5201_v22  ;;  %v5209_v22 = vld [vmem:[%s7097_s4 + $0x38] sm:$0xff]  }
0x26d2   :  { %4984 = vmatprep.subr.bf16.mxu0 %v5513_v0 }
0x26d5   :  { %4985 = vmatpush3.bf16.msra.mxu0 %v5203_v43 }
0x26d6   :  { %4986 = vmatprep.subr.bf16.mxu0 %v5513_v0 }
0x26d9   :  { %4987 = vmatpush3.bf16.msra.mxu0 %v5205_v38  ;;  %v5215_v38 = vld [vmem:[%s7099_s5 + $0x28] sm:$0xff]  }
0x26da   :  { %4988 = vmatprep.subr.bf16.mxu0 %v5513_v0 }
0x26dd   :  { %4989 = vmatpush3.bf16.msra.mxu0 %v5207_v50  ;;  %v5214_v50 = vld [vmem:[%s7097_s4 + $0x20] sm:$0xff]  }
0x26de   :  { %5014 = vmatprep.subr.bf16.mxu0 %v5513_v0 }
0x2780   :  { %v3014_v1 = vpop.f32.mrf.mxu0 }
0x2781   :  { %5441 = vtanh.f32 %v3014_v1  ;;  %v4046_v57 = vmul.f32 -1.442695, %v3014_v1 }
0x2782   :  { %v4952_v48 = vpop.f32.mrf.mxu0 }
0x2784   :  { %v2871_v3 = vpop.f32.mrf.mxu1  ;;  %v3017_v5 = vpop.f32.mrf.mxu0 }
0x2785   :  { %5443 = vtanh.f32 %v2871_v3  ;;  %v4037_v59 = vmul.f32 -1.442695, %v2871_v3 }
0x2786   :  { %v4932_v6 = vpop.f32.mrf.mxu1  ;;  %v4953_v7 = vpop.f32.mrf.mxu0  ;;  %5445 = vpow2.f32 %v4046_v57 }
0x2787   :  { %5447 = vpow2.f32 %v4037_v59 }
0x2788   :  { %v2874_v54 = vpop.f32.mrf.mxu1 }
0x278a   :  { %v4933_v55 = vpop.f32.mrf.mxu1 }
0x278e   :  { %v5442_v2 = vpop.eup %5441 }
0x278f   :  { %3029 = vrot.lane.b32.xlu0 %v5442_v2, %s5520_s21 }
0x2792   :  { %v5444_v8 = vpop.eup %5443 }
0x2793   :  { %2886 = vrot.lane.b32.xlu1 %v5444_v8, %s5515_s19  ;;  %v5446_v4 = vpop.eup %5445 }
0x2794   :  { %v3023_v60 = vadd.f32 1.0, %v5446_v4  ;;  %v5448_v33 = vpop.eup %5447 }
0x2795   :  { %v2880_v62 = vadd.f32 1.0, %v5448_v33 }
0x2796   :  { %5449 = vrcp.f32 %v3023_v60 }
0x2797   :  { %5451 = vrcp.f32 %v2880_v62 }
0x27a3   :  { %v6785_v63 = vpop.eup %5449 }
0x27a4   :  { %v6789_v10 = vpop.eup %5451  ;;  %v3027_v14 = vmul.f32 %v6785_v63, %v6685_v61  ;;  %v5194_v61 = vld [vmem:[%s7099_s5 + $0x38] sm:$0xff]  }
0x27a5   :  { %v2884_v16 = vmul.f32 %v6789_v10, %v6690_v9  ;;  %4955 = vmatpush3.bf16.msra.mxu1 %v5194_v61  ;;  %v5196_v9 = vld [vmem:[%s7099_s5 + $0x30] sm:$0xff]  }
0x27a6   :  { %4956 = vmatprep.subr.bf16.mxu1 %v5513_v0 }
0x27a9   :  { %4957 = vmatpush3.bf16.msra.mxu1 %v5196_v9 }
0x27aa   :  { %4958 = vmatprep.subr.bf16.mxu1 %v5513_v0 }
0x27ad   :  { %4959 = vmatpush3.bf16.msra.mxu1 %v5198_v36 }
0x27ae   :  { %4960 = vmatprep.subr.bf16.mxu1 %v5513_v0 }
0x27b1   :  { %4961 = vmatpush3.bf16.msra.mxu1 %v5200_v21 }
0x27b2   :  { %4962 = vmatprep.subr.bf16.mxu1 %v5513_v0 }
0x27b5   :  { %4963 = vmatpush3.bf16.msra.mxu1 %v5202_v34  ;;  %v5210_v34 = vld [vmem:[%s7097_s4 + $0x30] sm:$0xff]  }
0x27b6   :  { %4964 = vmatprep.subr.bf16.mxu1 %v5513_v0 }
0x27b9   :  { %4965 = vmatpush3.bf16.msra.mxu1 %v5204_v45  ;;  %v5212_v45 = vld [vmem:[%s7097_s4 + $0x28] sm:$0xff]  }
0x27ba   :  { %4966 = vmatprep.subr.bf16.mxu1 %v5513_v0 }
0x27bd   :  { %4967 = vmatpush3.bf16.msra.mxu1 %v5206_v46 }
0x27be   :  { %4968 = vmatprep.subr.bf16.mxu1 %v5513_v0 }
0x27c1   :  { %4969 = vmatpush3.bf16.msra.mxu1 %v5208_v25  ;;  %v5217_v25 = vld [vmem:[%s7099_s5 + $0x20] sm:$0xff]  }
0x27c2   :  { %4994 = vmatprep.subr.bf16.mxu1 %v5513_v0 }
0x2801   :  { %v3030_v11 = vpop.permute.xlu0 %3029 }
0x2802   :  { %v3032_v56 = vmul.f32 %v6785_v63, %v3030_v11 }
0x2804   :  { %3034 = vrot.lane.b32.xlu0 %v3032_v56, %s5521_s22 }
0x2805   :  { %v2887_v58 = vpop.permute.xlu1 %2886 }
0x2806   :  { %v2889_v12 = vmul.f32 %v6789_v10, %v2887_v58 }
0x2808   :  { %2891 = vrot.lane.b32.xlu1 %v2889_v12, %s5516_s20 }
0x2876   :  { %v3035_v13 = vpop.permute.xlu0 %3034 }
0x2877   :  { %v6795_v17 = vadd.f32 %v3035_v13, %v3027_v14 }
0x2879   :  { %5453 = vtanh.f32 %v6795_v17 }
0x287a   :  { %v2892_v18 = vpop.permute.xlu1 %2891 }
0x287b   :  { %v6800_v23 = vadd.f32 %v2892_v18, %v2884_v16 }
0x287d   :  { %5455 = vtanh.f32 %v6800_v23 }
0x2886   :  { %v5454_v35 = vpop.eup %5453 }
0x2887   :  { %3040 = vrot.lane.b32.xlu0 %v5454_v35, %s5516_s20 }
0x288a   :  { %v5456_v19 = vpop.eup %5455 }
0x288b   :  { %2897 = vrot.lane.b32.xlu1 %v5456_v19, %s5517_s27 }
0x28f9   :  { %v3041_v51 = vpop.permute.xlu0 %3040 }
0x28fa   :  { %v3043_v26 = vmul.f32 %v6785_v63, %v3041_v51  ;;  %v5216_v51 = vld [vmem:[%s7097_s4 + $0x18] sm:$0xff]  }
0x28fc   :  { %3045 = vrot.lane.b32.xlu0 %v3043_v26, %s5523_s30  ;;  %3190 = vrot.lane.b32.xlu1 %v3043_v26, %s5522_s23  ;;  %v5219_v26 = vld [vmem:[%s7099_s5 + $0x18] sm:$0xff]  }
0x28fd   :  { %v2898_v27 = vpop.permute.xlu1 %2897 }
0x28fe   :  { %v2900_v37 = vmul.f32 %v6789_v10, %v2898_v27  ;;  %v5218_v27 = vld [vmem:[%s7097_s4 + $0x10] sm:$0xff]  }
0x2900   :  { %2902 = vrot.lane.b32.xlu0 %v2900_v37, %s5519_s16  ;;  %v5221_v37 = vld [vmem:[%s7099_s5 + $0x10] sm:$0xff]  }
0x296e   :  { %v3046_v29 = vpop.permute.xlu0 %3045  ;;  %v3191_v52 = vpop.permute.xlu1 %3190 }
0x296f   :  { %v3048_v53 = vsel %vm310_vm3, 0.0, %v3046_v29  ;;  %v3193_v1 = vsel %vm170_vm2, %v3191_v52, 0.0  ;;  %v5220_v29 = vld [vmem:[%s7097_s4 + $0x8] sm:$0xff]   ;;  %v5222_v52 = vld [vmem:[%s7097_s4] sm:$0xff]  }
0x2970   :  { %v3049_v48 = vsel %vm172_vm4, %v3048_v53, 0.0  ;;  %v3194_v3 = vadd.f32 %v3193_v1, %v6263_v49  ;;  %v5223_v53 = vld [vmem:[%s7099_s5 + $0x8] sm:$0xff]   ;;  %v5224_v1 = vld [vmem:[%s7100_s6 + $0x38] sm:$0xff]  }
0x2971   :  { %v3050_v5 = vadd.f32 %v5718_v39, %v3049_v48  ;;  %v5225_v48 = vld [vmem:[%s7099_s5] sm:$0xff]  }
0x2972   :  { %v3195_v6 = vpack.c.bf16 %v3194_v3, %v3194_v3  ;;  %v2903_v7 = vpop.permute.xlu0 %2902 }
0x2973   :  { %v6880_v54 = vsel %vm310_vm3, %v2903_v7, 0.0 }
0x2974   :  { %v3051_v55 = vadd.f32 %v3050_v5, %v6880_v54  ;;  %4991 = vmatmul.mubr.bf16.vlgmr.msra.gmra.mxu0 %v3195_v6 }
0x2975   :  { %5030 = vmatprep.mubr.msk.bf16.mxu0 %vm5514_vm0, %v5513_v0  ;;  %5015 = vmatpush3.bf16.msra.mxu0 %v5209_v22 }
0x2976   :  { %v3052_v2 = vpack.c.bf16 %v3051_v55, %v3051_v55  ;;  %5016 = vmatprep.subr.bf16.mxu0 %v5513_v0 }
0x2978   :  { %4971 = vmatmul.mubr.bf16.vlgmr.msra.gmra.mxu1 %v3052_v2 }
0x2979   :  { %5010 = vmatprep.mubr.msk.bf16.mxu1 %vm5514_vm0, %v5513_v0  ;;  %5017 = vmatpush3.bf16.msra.mxu0 %v5210_v34 }
0x297a   :  { %5018 = vmatprep.subr.bf16.mxu0 %v5513_v0 }
0x297d   :  { %5019 = vmatpush3.bf16.msra.mxu0 %v5212_v45 }
0x297e   :  { %5020 = vmatprep.subr.bf16.mxu0 %v5513_v0 }
0x2981   :  { %5021 = vmatpush3.bf16.msra.mxu0 %v5214_v50 }
0x2982   :  { %5022 = vmatprep.subr.bf16.mxu0 %v5513_v0 }
0x2985   :  { %5023 = vmatpush3.bf16.msra.mxu0 %v5216_v51 }
0x2986   :  { %5024 = vmatprep.subr.bf16.mxu0 %v5513_v0 }
0x2989   :  { %5025 = vmatpush3.bf16.msra.mxu0 %v5218_v27 }
0x298a   :  { %5026 = vmatprep.subr.bf16.mxu0 %v5513_v0 }
0x298d   :  { %5027 = vmatpush3.bf16.msra.mxu0 %v5220_v29 }
0x298e   :  { %5028 = vmatprep.subr.bf16.mxu0 %v5513_v0 }
0x2991   :  { %5029 = vmatpush3.bf16.msra.mxu0 %v5222_v52 }
0x2992   :  { %5054 = vmatprep.subr.bf16.mxu0 %v5224_v1 }
0x2a34   :  { %v3294_v8 = vpop.f32.mrf.mxu0 }
0x2a35   :  { %5457 = vtanh.f32 %v3294_v8  ;;  %v4064_v56 = vmul.f32 -1.442695, %v3294_v8 }
0x2a36   :  { %v4992_v49 = vpop.f32.mrf.mxu0 }
0x2a38   :  { %v3151_v57 = vpop.f32.mrf.mxu1  ;;  %v3297_v59 = vpop.f32.mrf.mxu0 }
0x2a39   :  { %5459 = vtanh.f32 %v3151_v57  ;;  %v4055_v10 = vmul.f32 -1.442695, %v3151_v57 }
0x2a3a   :  { %v4972_v4 = vpop.f32.mrf.mxu1  ;;  %v4993_v60 = vpop.f32.mrf.mxu0  ;;  %5461 = vpow2.f32 %v4064_v56 }
0x2a3b   :  { %5463 = vpow2.f32 %v4055_v10  ;;  %v5228_v10 = vld [vmem:[%s7100_s6 + $0x20] sm:$0xff]  }
0x2a3c   :  { %v3154_v33 = vpop.f32.mrf.mxu1 }
0x2a3e   :  { %v4973_v62 = vpop.f32.mrf.mxu1 }
0x2a3f   :  { %v5226_v62 = vld [vmem:[%s7100_s6 + $0x30] sm:$0xff]  }
0x2a42   :  { %v5458_v63 = vpop.eup %5457 }
0x2a43   :  { %3309 = vrot.lane.b32.xlu1 %v5458_v63, %s5520_s21 }
0x2a46   :  { %v5460_v11 = vpop.eup %5459 }
0x2a47   :  { %3166 = vrot.lane.b32.xlu0 %v5460_v11, %s5515_s19  ;;  %v5462_v58 = vpop.eup %5461 }
0x2a48   :  { %v3303_v12 = vadd.f32 1.0, %v5462_v58  ;;  %v5464_v14 = vpop.eup %5463  ;;  %v5232_v58 = vld [vmem:[%s7100_s6] sm:$0xff]  }
0x2a49   :  { %v3160_v13 = vadd.f32 1.0, %v5464_v14  ;;  %v2906_v14 = vadd.f32 %v6260_v47, %v6880_v54 }
0x2a4a   :  { %5465 = vrcp.f32 %v3303_v12 }
0x2a4b   :  { %5467 = vrcp.f32 %v3160_v13 }
0x2a57   :  { %v6889_v16 = vpop.eup %5465 }
0x2a58   :  { %v6893_v61 = vpop.eup %5467  ;;  %v3307_v35 = vmul.f32 %v6889_v16, %v6795_v17  ;;  %v5211_v17 = vld [vmem:[%s7099_s5 + $0x38] sm:$0xff]  }
0x2a59   :  { %v3164_v19 = vmul.f32 %v6893_v61, %v6800_v23  ;;  %4995 = vmatpush3.bf16.msra.mxu1 %v5211_v17  ;;  %v5213_v23 = vld [vmem:[%s7099_s5 + $0x30] sm:$0xff]  }
0x2a5a   :  { %4996 = vmatprep.subr.bf16.mxu1 %v5513_v0 }
0x2a5d   :  { %4997 = vmatpush3.bf16.msra.mxu1 %v5213_v23 }
0x2a5e   :  { %4998 = vmatprep.subr.bf16.mxu1 %v5513_v0 }
0x2a61   :  { %4999 = vmatpush3.bf16.msra.mxu1 %v5215_v38 }
0x2a62   :  { %5000 = vmatprep.subr.bf16.mxu1 %v5513_v0 }
0x2a65   :  { %5001 = vmatpush3.bf16.msra.mxu1 %v5217_v25 }
0x2a66   :  { %5002 = vmatprep.subr.bf16.mxu1 %v5513_v0 }
0x2a69   :  { %5003 = vmatpush3.bf16.msra.mxu1 %v5219_v26 }
0x2a6a   :  { %5004 = vmatprep.subr.bf16.mxu1 %v5513_v0 }
0x2a6d   :  { %5005 = vmatpush3.bf16.msra.mxu1 %v5221_v37 }
0x2a6e   :  { %5006 = vmatprep.subr.bf16.mxu1 %v5513_v0 }
0x2a71   :  { %5007 = vmatpush3.bf16.msra.mxu1 %v5223_v53 }
0x2a72   :  { %5008 = vmatprep.subr.bf16.mxu1 %v5513_v0 }
0x2a75   :  { %5009 = vmatpush3.bf16.msra.mxu1 %v5225_v48  ;;  %v5233_v48 = vld [vmem:[%s7099_s5 + $0x38] sm:$0xff]  }
0x2a76   :  { %5034 = vmatprep.subr.bf16.mxu1 %v5513_v0 }
0x2ab5   :  { %v3310_v18 = vpop.permute.xlu1 %3309 }
0x2ab6   :  { %v3312_v20 = vmul.f32 %v6889_v16, %v3310_v18 }
0x2ab8   :  { %3314 = vrot.lane.b32.xlu1 %v3312_v20, %s5521_s22 }
0x2ab9   :  { %v3167_v28 = vpop.permute.xlu0 %3166 }
0x2aba   :  { %v3169_v9 = vmul.f32 %v6893_v61, %v3167_v28 }
0x2abc   :  { %3171 = vrot.lane.b32.xlu0 %v3169_v9, %s5516_s20 }
0x2b2a   :  { %v3315_v24 = vpop.permute.xlu1 %3314 }
0x2b2b   :  { %v6899_v36 = vadd.f32 %v3315_v24, %v3307_v35 }
0x2b2d   :  { %5469 = vtanh.f32 %v6899_v36 }
0x2b2e   :  { %v3172_v40 = vpop.permute.xlu0 %3171 }
0x2b2f   :  { %v6904_v21 = vadd.f32 %v3172_v40, %v3164_v19 }
0x2b31   :  { %5471 = vtanh.f32 %v6904_v21 }
0x2b3a   :  { %v5470_v43 = vpop.eup %5469 }
0x2b3b   :  { %3320 = vrot.lane.b32.xlu1 %v5470_v43, %s5516_s20 }
0x2b3e   :  { %v5472_v46 = vpop.eup %5471 }
0x2b3f   :  { %3177 = vrot.lane.b32.xlu0 %v5472_v46, %s5517_s27 }
0x2bad   :  { %v3321_v3 = vpop.permute.xlu1 %3320 }
0x2bae   :  { %v3323_v5 = vmul.f32 %v6889_v16, %v3321_v3  ;;  %v5234_v3 = vld [vmem:[%s7099_s5 + $0x30] sm:$0xff]  }
0x2bb0   :  { %3325 = vrot.lane.b32.xlu1 %v3323_v5, %s5523_s30  ;;  %3470 = vrot.lane.b32.xlu0 %v3323_v5, %s5522_s23 }
0x2bb1   :  { %v3178_v6 = vpop.permute.xlu0 %3177 }
0x2bb2   :  { %v3180_v7 = vmul.f32 %v6893_v61, %v3178_v6  ;;  %v5236_v6 = vld [vmem:[%s7099_s5 + $0x20] sm:$0xff]  }
0x2bb4   :  { %3182 = vrot.lane.b32.xlu1 %v3180_v7, %s5519_s16  ;;  %v5237_v7 = vld [vmem:[%s7099_s5 + $0x18] sm:$0xff]  }
0x2c22   :  { %v3326_v55 = vpop.permute.xlu1 %3325  ;;  %v3471_v2 = vpop.permute.xlu0 %3470 }
0x2c23   :  { %v3328_v8 = vsel %vm310_vm3, 0.0, %v3326_v55  ;;  %v3473_v49 = vsel %vm170_vm2, %v3471_v2, 0.0  ;;  %v5238_v55 = vld [vmem:[%s7099_s5 + $0x10] sm:$0xff]   ;;  %v5239_v2 = vld [vmem:[%s7099_s5 + $0x8] sm:$0xff]  }
0x2c24   :  { %v3329_v57 = vsel %vm172_vm4, %v3328_v8, 0.0  ;;  %v3474_v59 = vadd.f32 %v3473_v49, %v6345_v15  ;;  %v5227_v15 = vld [vmem:[%s7100_s6 + $0x28] sm:$0xff]   ;;  %v5240_v8 = vld [vmem:[%s7099_s5] sm:$0xff]  }
0x2c25   :  { %v3330_v4 = vadd.f32 %v5718_v39, %v3329_v57 }
0x2c26   :  { %v3475_v60 = vpack.c.bf16 %v3474_v59, %v3474_v59  ;;  %v3183_v33 = vpop.permute.xlu1 %3182 }
0x2c27   :  { %v3185_v63 = vsel %vm310_vm3, %v3183_v33, 0.0 }
0x2c28   :  { %v3331_v11 = vadd.f32 %v3330_v4, %v3185_v63  ;;  %5031 = vmatmul.mubr.bf16.vlgmr.msra.gmra.mxu0 %v3475_v60  ;;  %v3186_v12 = vadd.f32 %v6260_v47, %v3185_v63 }
0x2c29   :  { %5055 = vmatpush3.bf16.msra.mxu0 %v5224_v1  ;;  %5070 = vmatprep.mubr.bf16.mxu0 %v3757_v44  ;;  %v5231_v44 = vld [vmem:[%s7100_s6 + $0x8] sm:$0xff]  }
0x2c2a   :  { %v3332_v56 = vpack.c.bf16 %v3331_v11, %v3331_v11  ;;  %5056 = vmatprep.subr.bf16.mxu0 %v5226_v62  ;;  %v3759_v13 = vpack.c.bf16 %v3186_v12, %v2906_v14 }
0x2c2c   :  { %5011 = vmatmul.mubr.bf16.vlgmr.msra.gmra.mxu1 %v3332_v56 }
0x2c2d   :  { %5057 = vmatpush3.bf16.msra.mxu0 %v5226_v62  ;;  %5050 = vmatprep.mubr.msk.bf16.mxu1 %vm5514_vm0, %v5513_v0 }
0x2c2e   :  { %5058 = vmatprep.subr.bf16.mxu0 %v5227_v15  ;;  %5035 = vmatpush3.bf16.msra.mxu1 %v5233_v48 }
0x2c2f   :  { %5036 = vmatprep.subr.bf16.mxu1 %v5513_v0 }
0x2c31   :  { %5059 = vmatpush3.bf16.msra.mxu0 %v5227_v15 }
0x2c32   :  { %5060 = vmatprep.subr.bf16.mxu0 %v5228_v10  ;;  %5037 = vmatpush3.bf16.msra.mxu1 %v5234_v3 }
0x2c33   :  { %5038 = vmatprep.subr.bf16.mxu1 %v5513_v0 }
0x2c35   :  { %5061 = vmatpush3.bf16.msra.mxu0 %v5228_v10 }
0x2c36   :  { %5062 = vmatprep.subr.bf16.mxu0 %v5229_v41 }
0x2c39   :  { %5063 = vmatpush3.bf16.msra.mxu0 %v5229_v41 }
0x2c3a   :  { %5064 = vmatprep.subr.bf16.mxu0 %v5230_v42 }
0x2c3d   :  { %5065 = vmatpush3.bf16.msra.mxu0 %v5230_v42 }
0x2c3e   :  { %5066 = vmatprep.subr.bf16.mxu0 %v5231_v44 }
0x2c41   :  { %5067 = vmatpush3.bf16.msra.mxu0 %v5231_v44 }
0x2c42   :  { %5068 = vmatprep.subr.bf16.mxu0 %v5232_v58 }
0x2c45   :  { %5069 = vmatpush3.bf16.msra.mxu0 %v5232_v58 }
0x2c48   :  { %5071 = vmatmul.mubr.bf16.vlgmr.msra.gmra.mxu0 %v3758_v32 }
0x2c49   :  { %5074 = vmatprep.mubr.bf16.mxu0 %v3759_v13 }
0x2ce8   :  { %v3574_v16 = vpop.f32.mrf.mxu0 }
0x2ce9   :  { %5473 = vtanh.f32 %v3574_v16  ;;  %v4082_v22 = vmul.f32 -1.442695, %v3574_v16 }
0x2cea   :  { %v5032_v18 = vpop.f32.mrf.mxu0 }
0x2cec   :  { %v3431_v20 = vpop.f32.mrf.mxu1  ;;  %v3577_v61 = vpop.f32.mrf.mxu0 }
0x2ced   :  { %5475 = vtanh.f32 %v3431_v20  ;;  %v4073_v17 = vmul.f32 -1.442695, %v3431_v20 }
0x2cee   :  { %v5012_v28 = vpop.f32.mrf.mxu1  ;;  %v5033_v9 = vpop.f32.mrf.mxu0  ;;  %5477 = vpow2.f32 %v4082_v22 }
0x2cef   :  { %5479 = vpow2.f32 %v4073_v17 }
0x2cf0   :  { %v3434_v35 = vpop.f32.mrf.mxu1 }
0x2cf2   :  { %v5013_v24 = vpop.f32.mrf.mxu1 }
0x2cf6   :  { %v5474_v19 = vpop.eup %5473 }
0x2cf7   :  { %3589 = vrot.lane.b32.xlu0 %v5474_v19, %s5520_s21 }
0x2cfa   :  { %v5476_v54 = vpop.eup %5475 }
0x2cfb   :  { %3446 = vrot.lane.b32.xlu1 %v5476_v54, %s5515_s19  ;;  %v5478_v34 = vpop.eup %5477 }
0x2cfc   :  { %v3583_v23 = vadd.f32 1.0, %v5478_v34  ;;  %v5480_v43 = vpop.eup %5479 }
0x2cfd   :  { %v3440_v45 = vadd.f32 1.0, %v5480_v43 }
0x2cfe   :  { %5481 = vrcp.f32 %v3583_v23 }
0x2cff   :  { %5483 = vrcp.f32 %v3440_v45 }
0x2d08   :  { %v5072_v40 = vpop.f32.mrf.mxu0 }
0x2d09   :  { %3892 = vst [vmem:[%s7101_s7 + $0x10] sm:$0xff] %v5072_v40 }
0x2d0a   :  { %v3859_v30 = vpop.f32.mrf.mxu0 }
0x2d0b   :  { %3890 = vst [vmem:[%s7101_s7] sm:$0xff] %v3859_v30  ;;  %v5482_v38 = vpop.eup %5481 }
0x2d0c   :  { %v5073_v31 = vpop.f32.mrf.mxu0  ;;  %v5484_v25 = vpop.eup %5483  ;;  %v3587_v27 = vmul.f32 %v5482_v38, %v6899_v36 }
0x2d0d   :  { %3893 = vst [vmem:[%s7101_s7 + $0x18] sm:$0xff] %v5073_v31  ;;  %v3444_v52 = vmul.f32 %v5484_v25, %v6904_v21  ;;  %v5235_v21 = vld [vmem:[%s7099_s5 + $0x28] sm:$0xff]  }
0x2d0e   :  { %v3862_v32 = vpop.f32.mrf.mxu0  ;;  %5039 = vmatpush3.bf16.msra.mxu1 %v5235_v21 }
0x2d0f   :  { %3891 = vst [vmem:[%s7101_s7 + $0x8] sm:$0xff] %v3862_v32  ;;  %5040 = vmatprep.subr.bf16.mxu1 %v5513_v0 }
0x2d12   :  { %5041 = vmatpush3.bf16.msra.mxu1 %v5236_v6 }
0x2d13   :  { %5042 = vmatprep.subr.bf16.mxu1 %v5513_v0 }
0x2d16   :  { %5043 = vmatpush3.bf16.msra.mxu1 %v5237_v7 }
0x2d17   :  { %5044 = vmatprep.subr.bf16.mxu1 %v5513_v0 }
0x2d1a   :  { %5045 = vmatpush3.bf16.msra.mxu1 %v5238_v55 }
0x2d1b   :  { %5046 = vmatprep.subr.bf16.mxu1 %v5513_v0 }
0x2d1e   :  { %5047 = vmatpush3.bf16.msra.mxu1 %v5239_v2 }
0x2d1f   :  { %5048 = vmatprep.subr.bf16.mxu1 %v5513_v0 }
0x2d22   :  { %5049 = vmatpush3.bf16.msra.mxu1 %v5240_v8 }
0x2d69   :  { %v3590_v46 = vpop.permute.xlu0 %3589 }
0x2d6a   :  { %v3592_v50 = vmul.f32 %v5482_v38, %v3590_v46 }
0x2d6c   :  { %3594 = vrot.lane.b32.xlu0 %v3592_v50, %s5521_s22 }
0x2d6d   :  { %v3447_v51 = vpop.permute.xlu1 %3446 }
0x2d6e   :  { %v3449_v26 = vmul.f32 %v5484_v25, %v3447_v51 }
0x2d70   :  { %3451 = vrot.lane.b32.xlu1 %v3449_v26, %s5516_s20 }
0x2dde   :  { %v3595_v37 = vpop.permute.xlu0 %3594 }
0x2ddf   :  { %v3597_v29 = vadd.f32 %v3595_v37, %v3587_v27 }
0x2de1   :  { %5485 = vtanh.f32 %v3597_v29 }
0x2de2   :  { %v3452_v53 = vpop.permute.xlu1 %3451 }
0x2de3   :  { %v3454_v1 = vadd.f32 %v3452_v53, %v3444_v52 }
0x2de5   :  { %5487 = vtanh.f32 %v3454_v1 }
0x2dee   :  { %v5486_v36 = vpop.eup %5485 }
0x2def   :  { %3600 = vrot.lane.b32.xlu0 %v5486_v36, %s5516_s20 }
0x2df2   :  { %v5488_v5 = vpop.eup %5487 }
0x2df3   :  { %3457 = vrot.lane.b32.xlu1 %v5488_v5, %s5517_s27 }
0x2e61   :  { %v3601_v49 = vpop.permute.xlu0 %3600 }
0x2e62   :  { %v3603_v57 = vmul.f32 %v5482_v38, %v3601_v49 }
0x2e64   :  { %3605 = vrot.lane.b32.xlu0 %v3603_v57, %s5523_s30 }
0x2e65   :  { %v3458_v59 = vpop.permute.xlu1 %3457 }
0x2e66   :  { %v3460_v4 = vmul.f32 %v5484_v25, %v3458_v59 }
0x2e68   :  { %3462 = vrot.lane.b32.xlu1 %v3460_v4, %s5519_s16 }
0x2ed6   :  { %v3606_v60 = vpop.permute.xlu0 %3605 }
0x2ed7   :  { %v3608_v33 = vsel %vm310_vm3, 0.0, %v3606_v60 }
0x2ed8   :  { %v3609_v62 = vsel %vm172_vm4, %v3608_v33, 0.0 }
0x2ed9   :  { %v3610_v0 = vadd.f32 %v5718_v39, %v3609_v62 }
0x2eda   :  { %v3463_v63 = vpop.permute.xlu1 %3462 }
0x2edb   :  { %v3465_v11 = vsel %vm310_vm3, %v3463_v63, 0.0 }
0x2edc   :  { %v3611_v56 = vadd.f32 %v3610_v0, %v3465_v11  ;;  %v3466_v40 = vadd.f32 %v6260_v47, %v3465_v11 }
0x2ede   :  { %v3612_v15 = vpack.c.bf16 %v3611_v56, %v3611_v56 }
0x2ee0   :  { %5051 = vmatmul.mubr.bf16.vlgmr.msra.gmra.mxu1 %v3612_v15 }
0x2fa0   :  { %v3711_v10 = vpop.f32.mrf.mxu1 }
0x2fa1   :  { %5489 = vtanh.f32 %v3711_v10  ;;  %v4091_v12 = vmul.f32 -1.442695, %v3711_v10 }
0x2fa2   :  { %v5052_v41 = vpop.f32.mrf.mxu1 }
0x2fa3   :  { %5491 = vpow2.f32 %v4091_v12 }
0x2fa4   :  { %v3714_v42 = vpop.f32.mrf.mxu1 }
0x2fa6   :  { %v5053_v44 = vpop.f32.mrf.mxu1 }
0x2fae   :  { %v5490_v58 = vpop.eup %5489 }
0x2faf   :  { %3726 = vrot.lane.b32.xlu0 %v5490_v58, %s5515_s19 }
0x2fb0   :  { %v5492_v14 = vpop.eup %5491 }
0x2fb1   :  { %v3720_v13 = vadd.f32 1.0, %v5492_v14 }
0x2fb3   :  { %5493 = vrcp.f32 %v3720_v13 }
0x2fc0   :  { %v5494_v39 = vpop.eup %5493 }
0x2fc1   :  { %v3724_v20 = vmul.f32 %v5494_v39, %v3454_v1 }
0x3021   :  { %v3727_v16 = vpop.permute.xlu0 %3726 }
0x3022   :  { %v3729_v18 = vmul.f32 %v5494_v39, %v3727_v16 }
0x3024   :  { %3731 = vrot.lane.b32.xlu1 %v3729_v18, %s5516_s20 }
0x3096   :  { %v3732_v61 = vpop.permute.xlu1 %3731 }
0x3097   :  { %v3734_v28 = vadd.f32 %v3732_v61, %v3724_v20 }
0x3099   :  { %5495 = vtanh.f32 %v3734_v28 }
0x30a6   :  { %v5496_v9 = vpop.eup %5495 }
0x30a7   :  { %3737 = vrot.lane.b32.xlu0 %v5496_v9, %s5517_s27 }
0x3119   :  { %v3738_v35 = vpop.permute.xlu0 %3737 }
0x311a   :  { %v3740_v24 = vmul.f32 %v5494_v39, %v3738_v35 }
0x311c   :  { %3742 = vrot.lane.b32.xlu1 %v3740_v24, %s5519_s16 }
0x318e   :  { %v3743_v19 = vpop.permute.xlu1 %3742 }
0x318f   :  { %v3745_v54 = vsel %vm310_vm3, %v3743_v19, 0.0 }
0x3190   :  { %v3746_v30 = vadd.f32 %v6260_v47, %v3745_v54 }
0x3192   :  { %v3760_v31 = vpack.c.bf16 %v3746_v30, %v3466_v40 }
0x3194   :  { %5075 = vmatmul.mubr.bf16.gmra.mxu0 %v3760_v31 }
0x3254   :  { %v5076_v32 = vpop.f32.mrf.mxu0 }
0x3255   :  { %3896 = vst [vmem:[%s7101_s7 + $0x30] sm:$0xff] %v5076_v32 }
0x3256   :  { %v3875_v22 = vpop.f32.mrf.mxu0 }
0x3257   :  { %3894 = vst [vmem:[%s7101_s7 + $0x20] sm:$0xff] %v3875_v22 }
0x3258   :  { %v5077_v17 = vpop.f32.mrf.mxu0 }
0x3259   :  { %3897 = vst [vmem:[%s7101_s7 + $0x38] sm:$0xff] %v5077_v17 }
0x325a   :  { %v3878_v34 = vpop.f32.mrf.mxu0 }
0x325b   :  { %3895 = vst [vmem:[%s7101_s7 + $0x28] sm:$0xff] %v3878_v34 }

</bundles_post_ra>
